<compile_context>
chip_gen: v5e
topology: v5e:2x2
jax: 0.10.0
libtpu: 0.0.40
codegen_flags: <defaults>
</compile_context>

<pallas_src>
import functools
import math

import jax
import jax.numpy as jnp
from jax import lax
from jax.experimental import pallas as pl
from jax.experimental.pallas import tpu as pltpu

EPS = 1e-5  # nn.LayerNorm default

PARAM_NAMES = (
    "g1", "b1", "g2", "b2", "g3", "b3",
    "sa_wqkv", "sa_bqkv", "sa_wo", "sa_bo",
    "ca_wq", "ca_bq", "ca_wkv", "ca_bkv", "ca_wo", "ca_bo",
    "w1", "fb1", "w2", "fb2",
)


# ----------------------------- in-kernel helpers -----------------------------

def _layernorm(x, g, b):
    # x: (N, E), g/b: (1, E); f32 throughout.
    mu = jnp.mean(x, axis=-1, keepdims=True)
    var = jnp.mean(jnp.square(x - mu), axis=-1, keepdims=True)
    return (x - mu) * lax.rsqrt(var + EPS) * g + b


def _dot(a, w):
    # a: f32 activation, w: pre-transposed bf16 weight -> f32 accumulation.
    return jnp.dot(a.astype(jnp.bfloat16), w, preferred_element_type=jnp.float32)


def _attention(q, k, v, attn_ref, num_heads, bias, BB, T, S, E):
    """q: (BB*T, E), k/v: (BB*S, E) f32. Writes the (BB*T, E) result into
    attn_ref (VMEM scratch) at per-head lane offsets; returns the full slab."""
    Dh = E // num_heads
    scale = 1.0 / math.sqrt(Dh)
    qb = (q * scale).astype(jnp.bfloat16)
    kb = k.astype(jnp.bfloat16)
    vb = v.astype(jnp.bfloat16)
    for b in range(BB):
        q_b = qb[b * T:(b + 1) * T]
        k_b = kb[b * S:(b + 1) * S]
        v_b = vb[b * S:(b + 1) * S]
        for h in range(num_heads):
            c0 = h * Dh
            # q_h @ k_h^T without an explicit in-kernel transpose.
            s = lax.dot_general(q_b[:, c0:c0 + Dh], k_b[:, c0:c0 + Dh],
                                dimension_numbers=(((1,), (1,)), ((), ())),
                                preferred_element_type=jnp.float32)     # (T, S)
            if bias is not None:
                s = s + bias
            m = jnp.max(s, axis=-1, keepdims=True)
            p = jnp.exp(s - m)
            p = p * pl.reciprocal(jnp.sum(p, axis=-1, keepdims=True), approx=True)
            o_h = jnp.dot(p.astype(jnp.bfloat16), v_b[:, c0:c0 + Dh],
                          preferred_element_type=jnp.float32)           # (T, Dh)
            attn_ref[pl.ds(b * T, T), pl.ds(c0, Dh)] = o_h
    return attn_ref[...]


# ------------------------------- fused kernel --------------------------------

def fused_decoder_kernel(ids_ref, mem_ref, emb_ref, pos_ref, *rest, num_heads):
    n = len(PARAM_NAMES)
    p = dict(zip(PARAM_NAMES, rest[:n]))
    ng_ref, nb_ref = rest[n], rest[n + 1]
    o_ref = rest[n + 2]
    x_scr, attn_scr, bias_scr = rest[n + 3], rest[n + 4], rest[n + 5]

    l = pl.program_id(1)
    num_layers = pl.num_programs(1)

    T, E = pos_ref.shape
    V = emb_ref.shape[0]
    BB, S, _ = mem_ref.shape

    # ---- first layer step of each batch block:
    #      token one-hot gather (MXU) + positional embedding + causal bias ----
    @pl.when(l == 0)
    def _():
        ids = ids_ref[...]                                          # (BB*T, 1) i32
        onehot = (ids == lax.broadcasted_iota(jnp.int32, (BB * T, V), 1)
                  ).astype(jnp.float32)                             # (BB*T, V)
        tok = jnp.dot(onehot, emb_ref[...],
                      preferred_element_type=jnp.float32)           # (BB*T, E)
        x0 = tok.reshape(BB, T, E) + pos_ref[...]                   # add positions
        x_scr[...] = x0.reshape(BB * T, E)
        r = lax.broadcasted_iota(jnp.int32, (T, T), 0)
        c = lax.broadcasted_iota(jnp.int32, (T, T), 1)
        bias_scr[...] = jnp.where(c > r, -1e30, 0.0).astype(jnp.float32)

    x = x_scr[...]                                                  # (BB*T, E)
    bias = bias_scr[...]                                            # (T, T)
    mem = mem_ref[...].reshape(BB * S, E)                           # (BB*S, E)

    # -- self-attention block (norm_first, causal) --
    h = _layernorm(x, p["g1"][...], p["b1"][...])
    qkv = _dot(h, p["sa_wqkv"][...]) + p["sa_bqkv"][...]            # (BB*T, 3E)
    attn = _attention(qkv[:, :E], qkv[:, E:2 * E], qkv[:, 2 * E:],
                      attn_scr, num_heads, bias, BB, T, T, E)
    x = x + _dot(attn, p["sa_wo"][...]) + p["sa_bo"][...]

    # -- cross-attention block (memory = enc_out) --
    h = _layernorm(x, p["g2"][...], p["b2"][...])
    q = _dot(h, p["ca_wq"][...]) + p["ca_bq"][...]                  # (BB*T, E)
    kv = _dot(mem, p["ca_wkv"][...]) + p["ca_bkv"][...]             # (BB*S, 2E)
    attn = _attention(q, kv[:, :E], kv[:, E:],
                      attn_scr, num_heads, None, BB, T, S, E)
    x = x + _dot(attn, p["ca_wo"][...]) + p["ca_bo"][...]

    # -- feed-forward block (Linear -> ReLU -> Linear) --
    h = _layernorm(x, p["g3"][...], p["b3"][...])
    f = jnp.maximum(_dot(h, p["w1"][...]) + p["fb1"][...], 0.0)
    x = x + _dot(f, p["w2"][...]) + p["fb2"][...]

    x_scr[...] = x                                                  # carry to l+1

    # ---- final LayerNorm + output write on the last layer step ----
    @pl.when(l == num_layers - 1)
    def _():
        y = _layernorm(x, ng_ref[...], nb_ref[...])
        o_ref[...] = y.reshape(BB, T, E)


# ------------------------------- Python wrapper -------------------------------

def decoder_forward(enc_out, tgt_ids, packed, num_heads, batch_block=None):
    B, S, E = enc_out.shape
    T = tgt_ids.shape[-1]
    L = packed["g1"].shape[0]

    if batch_block is None:
        batch_block = next(bb for bb in (8, 4, 2, 1) if B % bb == 0)
    BB = batch_block
    nb = B // BB

    plist = [packed[name] for name in PARAM_NAMES]

    def layer_spec(arr):
        nd = arr.ndim  # stacked (L, ...) -> stream one layer per step
        return pl.BlockSpec((None,) + arr.shape[1:],
                            lambda b, l, _nd=nd: (l,) + (0,) * (_nd - 1))

    def const_spec(arr):
        nd = arr.ndim
        return pl.BlockSpec(arr.shape, lambda b, l, _nd=nd: (0,) * _nd)

    in_specs = [
        pl.BlockSpec((BB * T, 1), lambda b, l: (b, 0)),       # token ids
        pl.BlockSpec((BB, S, E), lambda b, l: (b, 0, 0)),     # enc_out
        const_spec(packed["emb"]),
        const_spec(packed["pos"]),
    ]
    in_specs += [layer_spec(a) for a in plist]
    in_specs += [const_spec(packed["norm_g"]), const_spec(packed["norm_b"])]

    tgt_flat = tgt_ids.astype(jnp.int32).reshape(B * T, 1)

    out = pl.pallas_call(
        functools.partial(fused_decoder_kernel, num_heads=num_heads),
        out_shape=jax.ShapeDtypeStruct((B, T, E), jnp.float32),
        grid_spec=pltpu.PrefetchScalarGridSpec(
            num_scalar_prefetch=0,
            grid=(nb, L),                       # batch blocks (parallel) x layers
            in_specs=in_specs,
            out_specs=pl.BlockSpec((BB, T, E), lambda b, l: (b, 0, 0)),
            scratch_shapes=[
                pltpu.VMEM((BB * T, E), jnp.float32),   # activation carry
                pltpu.VMEM((BB * T, E), jnp.float32),   # attention head assembly
                pltpu.VMEM((T, T), jnp.float32),        # causal additive bias
            ]),
        compiler_params=pltpu.CompilerParams(
            dimension_semantics=("parallel", "arbitrary"),
            vmem_limit_bytes=32 * 1024 * 1024),
    )(tgt_flat, enc_out, packed["emb"], packed["pos"],
      *plist, packed["norm_g"], packed["norm_b"])
    return out


# ------------------------------- parameter init -------------------------------

def init_params(key, num_classes, tgt_len, embed_dim, ff_dim, num_layers):
    # PyTorch-layout parameters (nn.Linear / nn.MultiheadAttention conventions).
    E, F = embed_dim, ff_dim
    keys = jax.random.split(key, 2 + num_layers)
    params = {
        "emb": 0.02 * jax.random.normal(keys[0], (num_classes, E), jnp.float32),
        "pos": 0.02 * jax.random.normal(keys[1], (tgt_len, E), jnp.float32),
        "norm_g": jnp.ones((1, E), jnp.float32),
        "norm_b": jnp.zeros((1, E), jnp.float32),
        "layers": [],
    }
    for i in range(num_layers):
        k = jax.random.split(keys[2 + i], 6)
        layer = dict(
            g1=jnp.ones((1, E), jnp.float32), b1=jnp.zeros((1, E), jnp.float32),
            g2=jnp.ones((1, E), jnp.float32), b2=jnp.zeros((1, E), jnp.float32),
            g3=jnp.ones((1, E), jnp.float32), b3=jnp.zeros((1, E), jnp.float32),
            sa_in_w=jax.random.normal(k[0], (3 * E, E), jnp.float32) / jnp.sqrt(E),
            sa_in_b=jnp.zeros((1, 3 * E), jnp.float32),
            sa_out_w=jax.random.normal(k[1], (E, E), jnp.float32) / jnp.sqrt(E),
            sa_out_b=jnp.zeros((1, E), jnp.float32),
            ca_in_w=jax.random.normal(k[2], (3 * E, E), jnp.float32) / jnp.sqrt(E),
            ca_in_b=jnp.zeros((1, 3 * E), jnp.float32),
            ca_out_w=jax.random.normal(k[3], (E, E), jnp.float32) / jnp.sqrt(E),
            ca_out_b=jnp.zeros((1, E), jnp.float32),
            w1=jax.random.normal(k[4], (F, E), jnp.float32) / jnp.sqrt(E),
            fb1=jnp.zeros((1, F), jnp.float32),
            w2=jax.random.normal(k[5], (E, F), jnp.float32) / jnp.sqrt(F),
            fb2=jnp.zeros((1, E), jnp.float32),
        )
        params["layers"].append(layer)
    return params


def pack_params(params):
    """Host-side repacking: stack per-layer params (leading layer axis),
    pre-transpose all weight matrices and cast them to bf16. The embedding
    table stays a flat (V, E) f32 array (used via a one-hot MXU gather)."""
    E = params["norm_g"].shape[-1]
    layers = params["layers"]

    def stack(fn):
        return jnp.stack([fn(l) for l in layers], axis=0)

    bf16 = lambda a: a.astype(jnp.bfloat16)
    return {
        "emb": params["emb"],                                 # (V, E) f32
        "pos": params["pos"],                                 # (T, E)
        "norm_g": params["norm_g"], "norm_b": params["norm_b"],
        "g1": stack(lambda l: l["g1"]), "b1": stack(lambda l: l["b1"]),
        "g2": stack(lambda l: l["g2"]), "b2": stack(lambda l: l["b2"]),
        "g3": stack(lambda l: l["g3"]), "b3": stack(lambda l: l["b3"]),
        "sa_wqkv": stack(lambda l: bf16(l["sa_in_w"].T)),     # (L, E, 3E)
        "sa_bqkv": stack(lambda l: l["sa_in_b"]),             # (L, 1, 3E)
        "sa_wo": stack(lambda l: bf16(l["sa_out_w"].T)),      # (L, E, E)
        "sa_bo": stack(lambda l: l["sa_out_b"]),
        "ca_wq": stack(lambda l: bf16(l["ca_in_w"][:E].T)),   # (L, E, E)
        "ca_bq": stack(lambda l: l["ca_in_b"][:, :E]),
        "ca_wkv": stack(lambda l: bf16(l["ca_in_w"][E:].T)),  # (L, E, 2E)
        "ca_bkv": stack(lambda l: l["ca_in_b"][:, E:]),
        "ca_wo": stack(lambda l: bf16(l["ca_out_w"].T)),      # (L, E, E)
        "ca_bo": stack(lambda l: l["ca_out_b"]),
        "w1": stack(lambda l: bf16(l["w1"].T)),               # (L, E, F)
        "fb1": stack(lambda l: l["fb1"]),
        "w2": stack(lambda l: bf16(l["w2"].T)),               # (L, F, E)
        "fb2": stack(lambda l: l["fb2"]),
    }


# ------------------------------------ main ------------------------------------

if __name__ == "__main__":
    # Small config consistent with Decoder(batch_size, num_classes, tgt_len,
    #                                      embed_dim, num_heads, feed_forward_dim, num_layers)
    batch_size = 2
    num_classes = 10
    tgt_len = 8
    embed_dim = 32
    num_heads = 4
    feed_forward_dim = 64
    num_layers = 2
    mem_len = 16  # encoder output sequence length

    key = jax.random.PRNGKey(0)
    k_params, k_enc, k_tgt = jax.random.split(key, 3)

    params = init_params(k_params, num_classes, tgt_len, embed_dim,
                         feed_forward_dim, num_layers)
    packed = pack_params(params)

    enc_out = jax.random.normal(k_enc, (batch_size, mem_len, embed_dim), jnp.float32)
    tgt = jax.random.randint(k_tgt, (batch_size, tgt_len), 0, num_classes, jnp.int32)

    out = decoder_forward(enc_out, tgt, packed, num_heads)
    out = jax.block_until_ready(out)

    assert out.shape == (batch_size, tgt_len, embed_dim)
    assert bool(jnp.all(jnp.isfinite(out)))
    print("KERNEL_OK")
</pallas_src>

<mosaic_0001>
module attributes {stable_mosaic.version = 11 : i64} {
  func.func @fused_decoder_kernel(%arg0: i32, %arg1: i32, %arg2: memref<16x1xi32, #tpu.memory_space<vmem>>, %arg3: memref<2x16x32xf32, #tpu.memory_space<vmem>>, %arg4: memref<10x32xf32, #tpu.memory_space<vmem>>, %arg5: memref<8x32xf32, #tpu.memory_space<vmem>>, %arg6: memref<1x1x32xf32, #tpu.memory_space<vmem>>, %arg7: memref<1x1x32xf32, #tpu.memory_space<vmem>>, %arg8: memref<1x1x32xf32, #tpu.memory_space<vmem>>, %arg9: memref<1x1x32xf32, #tpu.memory_space<vmem>>, %arg10: memref<1x1x32xf32, #tpu.memory_space<vmem>>, %arg11: memref<1x1x32xf32, #tpu.memory_space<vmem>>, %arg12: memref<1x32x96xbf16, #tpu.memory_space<vmem>>, %arg13: memref<1x1x96xf32, #tpu.memory_space<vmem>>, %arg14: memref<1x32x32xbf16, #tpu.memory_space<vmem>>, %arg15: memref<1x1x32xf32, #tpu.memory_space<vmem>>, %arg16: memref<1x32x32xbf16, #tpu.memory_space<vmem>>, %arg17: memref<1x1x32xf32, #tpu.memory_space<vmem>>, %arg18: memref<1x32x64xbf16, #tpu.memory_space<vmem>>, %arg19: memref<1x1x64xf32, #tpu.memory_space<vmem>>, %arg20: memref<1x32x32xbf16, #tpu.memory_space<vmem>>, %arg21: memref<1x1x32xf32, #tpu.memory_space<vmem>>, %arg22: memref<1x32x64xbf16, #tpu.memory_space<vmem>>, %arg23: memref<1x1x64xf32, #tpu.memory_space<vmem>>, %arg24: memref<1x64x32xbf16, #tpu.memory_space<vmem>>, %arg25: memref<1x1x32xf32, #tpu.memory_space<vmem>>, %arg26: memref<1x32xf32, #tpu.memory_space<vmem>>, %arg27: memref<1x32xf32, #tpu.memory_space<vmem>>, %arg28: memref<2x8x32xf32, #tpu.memory_space<vmem>>, %arg29: memref<16x32xf32, #tpu.memory_space<vmem>>, %arg30: memref<16x32xf32, #tpu.memory_space<vmem>>, %arg31: memref<8x8xf32, #tpu.memory_space<vmem>>) attributes {dimension_semantics = [#tpu.dimension_semantics<parallel>, #tpu.dimension_semantics<arbitrary>], iteration_bounds = array<i64: 1, 2>, scalar_prefetch = 0 : i64, scratch_operands = 3 : i64, tpu.core_type = #tpu.core_type<tc>, window_params = [{transform_indices = @transform_0, window_bounds = array<i64: 16, 1>}, {transform_indices = @transform_1, window_bounds = array<i64: 2, 16, 32>}, {pipeline_mode = #tpu.pipeline_mode<synchronous>, transform_indices = @transform_2, window_bounds = array<i64: 10, 32>}, {pipeline_mode = #tpu.pipeline_mode<synchronous>, transform_indices = @transform_3, window_bounds = array<i64: 8, 32>}, {transform_indices = @transform_4, window_bounds = array<i64: 1, 1, 32>}, {transform_indices = @transform_5, window_bounds = array<i64: 1, 1, 32>}, {transform_indices = @transform_6, window_bounds = array<i64: 1, 1, 32>}, {transform_indices = @transform_7, window_bounds = array<i64: 1, 1, 32>}, {transform_indices = @transform_8, window_bounds = array<i64: 1, 1, 32>}, {transform_indices = @transform_9, window_bounds = array<i64: 1, 1, 32>}, {transform_indices = @transform_10, window_bounds = array<i64: 1, 32, 96>}, {transform_indices = @transform_11, window_bounds = array<i64: 1, 1, 96>}, {transform_indices = @transform_12, window_bounds = array<i64: 1, 32, 32>}, {transform_indices = @transform_13, window_bounds = array<i64: 1, 1, 32>}, {transform_indices = @transform_14, window_bounds = array<i64: 1, 32, 32>}, {transform_indices = @transform_15, window_bounds = array<i64: 1, 1, 32>}, {transform_indices = @transform_16, window_bounds = array<i64: 1, 32, 64>}, {transform_indices = @transform_17, window_bounds = array<i64: 1, 1, 64>}, {transform_indices = @transform_18, window_bounds = array<i64: 1, 32, 32>}, {transform_indices = @transform_19, window_bounds = array<i64: 1, 1, 32>}, {transform_indices = @transform_20, window_bounds = array<i64: 1, 32, 64>}, {transform_indices = @transform_21, window_bounds = array<i64: 1, 1, 64>}, {transform_indices = @transform_22, window_bounds = array<i64: 1, 64, 32>}, {transform_indices = @transform_23, window_bounds = array<i64: 1, 1, 32>}, {pipeline_mode = #tpu.pipeline_mode<synchronous>, transform_indices = @transform_24, window_bounds = array<i64: 1, 32>}, {pipeline_mode = #tpu.pipeline_mode<synchronous>, transform_indices = @transform_25, window_bounds = array<i64: 1, 32>}, {transform_indices = @transform_26, window_bounds = array<i64: 2, 8, 32>}]} {
    %c0_i32 = arith.constant 0 : i32
    %0 = arith.cmpi eq, %arg1, %c0_i32 : i32
    %1 = arith.extui %0 : i1 to i32
    %c0_i32_0 = arith.constant 0 : i32
    %2 = arith.cmpi ne, %1, %c0_i32_0 : i32
    scf.if %2 {
      %c0_191 = arith.constant 0 : index
      %c0_192 = arith.constant 0 : index
      %459 = vector.load %arg2[%c0_191, %c0_192] : memref<16x1xi32, #tpu.memory_space<vmem>>, vector<16x1xi32>
      %460 = tpu.iota {dimensions = array<i32: 1>} : vector<16x10xi32>
      %461 = vector.broadcast %459 : vector<16x1xi32> to vector<16x10xi32>
      %462 = arith.cmpi eq, %461, %460 : vector<16x10xi32>
      %463 = arith.extui %462 : vector<16x10xi1> to vector<16x10xi32>
      %464 = arith.sitofp %463 : vector<16x10xi32> to vector<16x10xf32>
      %c0_193 = arith.constant 0 : index
      %c0_194 = arith.constant 0 : index
      %465 = vector.load %arg4[%c0_193, %c0_194] : memref<10x32xf32, #tpu.memory_space<vmem>>, vector<10x32xf32>
      %cst_195 = arith.constant dense<0.000000e+00> : vector<16x32xf32>
      %466 = tpu.matmul %464, %465, %cst_195 {dimension_numbers = #tpu.dot_dimension_numbers<[1], [0], [0], [1], [0, 0, 1, 1], [], []>} : vector<16x10xf32>, vector<10x32xf32>, vector<16x32xf32> -> vector<16x32xf32>
      %467 = vector.shape_cast %466 : vector<16x32xf32> to vector<2x8x32xf32>
      %c0_196 = arith.constant 0 : index
      %c0_197 = arith.constant 0 : index
      %468 = vector.load %arg5[%c0_196, %c0_197] : memref<8x32xf32, #tpu.memory_space<vmem>>, vector<8x32xf32>
      %469 = vector.shape_cast %468 : vector<8x32xf32> to vector<1x8x32xf32>
      %470 = vector.broadcast %469 : vector<1x8x32xf32> to vector<2x8x32xf32>
      %471 = arith.addf %467, %470 : vector<2x8x32xf32>
      %472 = vector.shape_cast %471 : vector<2x8x32xf32> to vector<16x32xf32>
      %c0_198 = arith.constant 0 : index
      %c0_199 = arith.constant 0 : index
      %473 = vector.load %arg29[%c0_198, %c0_199] : memref<16x32xf32, #tpu.memory_space<vmem>>, vector<16x32xf32>
      tpu.vector_store %arg29[%c0_198, %c0_199], %472 {strides = array<i32>} : memref<16x32xf32, #tpu.memory_space<vmem>>, vector<16x32xf32>,
      %474 = tpu.iota {dimensions = array<i32: 0>} : vector<8x8xi32>
      %475 = tpu.iota {dimensions = array<i32: 1>} : vector<8x8xi32>
      %476 = arith.cmpi sgt, %475, %474 : vector<8x8xi32>
      %cst_200 = arith.constant -1.000000e+30 : f32
      %cst_201 = arith.constant 0.000000e+00 : f32
      %477 = vector.broadcast %cst_200 : f32 to vector<8x8xf32>
      %478 = vector.broadcast %cst_201 : f32 to vector<8x8xf32>
      %479 = arith.select %476, %477, %478 : vector<8x8xi1>, vector<8x8xf32>
      %c0_202 = arith.constant 0 : index
      %c0_203 = arith.constant 0 : index
      %480 = vector.load %arg31[%c0_202, %c0_203] : memref<8x8xf32, #tpu.memory_space<vmem>>, vector<8x8xf32>
      tpu.vector_store %arg31[%c0_202, %c0_203], %479 {strides = array<i32>} : memref<8x8xf32, #tpu.memory_space<vmem>>, vector<8x8xf32>,
    } else {
    }
    %c0 = arith.constant 0 : index
    %c0_1 = arith.constant 0 : index
    %3 = vector.load %arg29[%c0, %c0_1] : memref<16x32xf32, #tpu.memory_space<vmem>>, vector<16x32xf32>
    %c0_2 = arith.constant 0 : index
    %c0_3 = arith.constant 0 : index
    %4 = vector.load %arg31[%c0_2, %c0_3] : memref<8x8xf32, #tpu.memory_space<vmem>>, vector<8x8xf32>
    %c0_4 = arith.constant 0 : index
    %c0_5 = arith.constant 0 : index
    %c0_6 = arith.constant 0 : index
    %5 = vector.load %arg3[%c0_4, %c0_5, %c0_6] : memref<2x16x32xf32, #tpu.memory_space<vmem>>, vector<2x16x32xf32>
    %6 = vector.shape_cast %5 : vector<2x16x32xf32> to vector<32x32xf32>
    %c0_7 = arith.constant 0 : index
    %c0_8 = arith.constant 0 : index
    %c0_9 = arith.constant 0 : index
    %7 = vector.load %arg6[%c0_7, %c0_8, %c0_9] : memref<1x1x32xf32, #tpu.memory_space<vmem>>, vector<1x1x32xf32>
    %8 = vector.shape_cast %7 : vector<1x1x32xf32> to vector<1x32xf32>
    %c0_10 = arith.constant 0 : index
    %c0_11 = arith.constant 0 : index
    %c0_12 = arith.constant 0 : index
    %9 = vector.load %arg7[%c0_10, %c0_11, %c0_12] : memref<1x1x32xf32, #tpu.memory_space<vmem>>, vector<1x1x32xf32>
    %10 = vector.shape_cast %9 : vector<1x1x32xf32> to vector<1x32xf32>
    %cst = arith.constant dense<0.000000e+00> : vector<16xf32>
    %11 = vector.multi_reduction <add>, %3, %cst [1] : vector<16x32xf32> to vector<16xf32>
    %12 = vector.shape_cast %11 : vector<16xf32> to vector<16x1xf32>
    %cst_13 = arith.constant 3.200000e+01 : f32
    %13 = vector.broadcast %cst_13 : f32 to vector<16x1xf32>
    %14 = arith.divf %12, %13 : vector<16x1xf32>
    %15 = vector.broadcast %14 : vector<16x1xf32> to vector<16x32xf32>
    %16 = arith.subf %3, %15 : vector<16x32xf32>
    %17 = arith.mulf %16, %16 : vector<16x32xf32>
    %cst_14 = arith.constant dense<0.000000e+00> : vector<16xf32>
    %18 = vector.multi_reduction <add>, %17, %cst_14 [1] : vector<16x32xf32> to vector<16xf32>
    %19 = vector.shape_cast %18 : vector<16xf32> to vector<16x1xf32>
    %cst_15 = arith.constant 3.200000e+01 : f32
    %20 = vector.broadcast %cst_15 : f32 to vector<16x1xf32>
    %21 = arith.divf %19, %20 : vector<16x1xf32>
    %22 = vector.broadcast %14 : vector<16x1xf32> to vector<16x32xf32>
    %23 = arith.subf %3, %22 : vector<16x32xf32>
    %cst_16 = arith.constant 9.99999974E-6 : f32
    %24 = vector.broadcast %cst_16 : f32 to vector<16x1xf32>
    %25 = arith.addf %21, %24 : vector<16x1xf32>
    %26 = math.rsqrt %25 : vector<16x1xf32>
    %27 = vector.broadcast %26 : vector<16x1xf32> to vector<16x32xf32>
    %28 = arith.mulf %23, %27 : vector<16x32xf32>
    %29 = vector.broadcast %8 : vector<1x32xf32> to vector<16x32xf32>
    %30 = arith.mulf %28, %29 : vector<16x32xf32>
    %31 = vector.broadcast %10 : vector<1x32xf32> to vector<16x32xf32>
    %32 = arith.addf %30, %31 : vector<16x32xf32>
    %c0_17 = arith.constant 0 : index
    %c0_18 = arith.constant 0 : index
    %c0_19 = arith.constant 0 : index
    %33 = vector.load %arg12[%c0_17, %c0_18, %c0_19] : memref<1x32x96xbf16, #tpu.memory_space<vmem>>, vector<1x32x96xbf16>
    %34 = vector.shape_cast %33 : vector<1x32x96xbf16> to vector<32x96xbf16>
    %35 = arith.truncf %32 : vector<16x32xf32> to vector<16x32xbf16>
    %cst_20 = arith.constant dense<0.000000e+00> : vector<16x96xf32>
    %36 = tpu.matmul %35, %34, %cst_20 {dimension_numbers = #tpu.dot_dimension_numbers<[1], [0], [0], [1], [0, 0, 1, 1], [], []>} : vector<16x32xbf16>, vector<32x96xbf16>, vector<16x96xf32> -> vector<16x96xf32>
    %c0_21 = arith.constant 0 : index
    %c0_22 = arith.constant 0 : index
    %c0_23 = arith.constant 0 : index
    %37 = vector.load %arg13[%c0_21, %c0_22, %c0_23] : memref<1x1x96xf32, #tpu.memory_space<vmem>>, vector<1x1x96xf32>
    %38 = vector.shape_cast %37 : vector<1x1x96xf32> to vector<1x96xf32>
    %39 = vector.broadcast %38 : vector<1x96xf32> to vector<16x96xf32>
    %40 = arith.addf %36, %39 : vector<16x96xf32>
    %41 = vector.extract_strided_slice %40 {offsets = [0, 0], sizes = [16, 32], strides = [1, 1]} : vector<16x96xf32> to vector<16x32xf32>
    %42 = vector.extract_strided_slice %40 {offsets = [0, 32], sizes = [16, 32], strides = [1, 1]} : vector<16x96xf32> to vector<16x32xf32>
    %43 = vector.extract_strided_slice %40 {offsets = [0, 64], sizes = [16, 32], strides = [1, 1]} : vector<16x96xf32> to vector<16x32xf32>
    %cst_24 = arith.constant 0.353553385 : f32
    %44 = vector.broadcast %cst_24 : f32 to vector<16x32xf32>
    %45 = arith.mulf %41, %44 : vector<16x32xf32>
    %46 = arith.truncf %45 : vector<16x32xf32> to vector<16x32xbf16>
    %47 = arith.truncf %42 : vector<16x32xf32> to vector<16x32xbf16>
    %48 = arith.truncf %43 : vector<16x32xf32> to vector<16x32xbf16>
    %49 = vector.extract_strided_slice %46 {offsets = [0, 0], sizes = [8, 32], strides = [1, 1]} : vector<16x32xbf16> to vector<8x32xbf16>
    %50 = vector.extract_strided_slice %47 {offsets = [0, 0], sizes = [8, 32], strides = [1, 1]} : vector<16x32xbf16> to vector<8x32xbf16>
    %51 = vector.extract_strided_slice %48 {offsets = [0, 0], sizes = [8, 32], strides = [1, 1]} : vector<16x32xbf16> to vector<8x32xbf16>
    %52 = vector.extract_strided_slice %49 {offsets = [0, 0], sizes = [8, 8], strides = [1, 1]} : vector<8x32xbf16> to vector<8x8xbf16>
    %53 = vector.extract_strided_slice %50 {offsets = [0, 0], sizes = [8, 8], strides = [1, 1]} : vector<8x32xbf16> to vector<8x8xbf16>
    %cst_25 = arith.constant dense<0.000000e+00> : vector<8x8xf32>
    %54 = tpu.matmul %52, %53, %cst_25 {dimension_numbers = #tpu.dot_dimension_numbers<[1], [1], [0], [0], [0, 0, 1, 0], [], []>} : vector<8x8xbf16>, vector<8x8xbf16>, vector<8x8xf32> -> vector<8x8xf32>
    %55 = arith.addf %54, %4 : vector<8x8xf32>
    %cst_26 = arith.constant dense<0xFF800000> : vector<8xf32>
    %56 = vector.multi_reduction <maximumf>, %55, %cst_26 [1] : vector<8x8xf32> to vector<8xf32>
    %57 = vector.shape_cast %56 : vector<8xf32> to vector<8x1xf32>
    %58 = vector.broadcast %57 : vector<8x1xf32> to vector<8x8xf32>
    %59 = arith.subf %55, %58 : vector<8x8xf32>
    %60 = math.exp %59 : vector<8x8xf32>
    %cst_27 = arith.constant dense<0.000000e+00> : vector<8xf32>
    %61 = vector.multi_reduction <add>, %60, %cst_27 [1] : vector<8x8xf32> to vector<8xf32>
    %62 = vector.shape_cast %61 : vector<8xf32> to vector<8x1xf32>
    %63 = tpu.reciprocal %62 {approx = true} : vector<8x1xf32> -> vector<8x1xf32>
    %64 = vector.broadcast %63 : vector<8x1xf32> to vector<8x8xf32>
    %65 = arith.mulf %60, %64 : vector<8x8xf32>
    %66 = arith.truncf %65 : vector<8x8xf32> to vector<8x8xbf16>
    %67 = vector.extract_strided_slice %51 {offsets = [0, 0], sizes = [8, 8], strides = [1, 1]} : vector<8x32xbf16> to vector<8x8xbf16>
    %cst_28 = arith.constant dense<0.000000e+00> : vector<8x8xf32>
    %68 = tpu.matmul %66, %67, %cst_28 {dimension_numbers = #tpu.dot_dimension_numbers<[1], [0], [0], [1], [0, 0, 1, 1], [], []>} : vector<8x8xbf16>, vector<8x8xbf16>, vector<8x8xf32> -> vector<8x8xf32>
    %c0_29 = arith.constant 0 : index
    %c0_30 = arith.constant 0 : index
    %69 = vector.load %arg30[%c0_29, %c0_30] : memref<16x32xf32, #tpu.memory_space<vmem>>, vector<8x8xf32>
    tpu.vector_store %arg30[%c0_29, %c0_30], %68 {strides = array<i32>} : memref<16x32xf32, #tpu.memory_space<vmem>>, vector<8x8xf32>,
    %70 = vector.extract_strided_slice %49 {offsets = [0, 8], sizes = [8, 8], strides = [1, 1]} : vector<8x32xbf16> to vector<8x8xbf16>
    %71 = vector.extract_strided_slice %50 {offsets = [0, 8], sizes = [8, 8], strides = [1, 1]} : vector<8x32xbf16> to vector<8x8xbf16>
    %cst_31 = arith.constant dense<0.000000e+00> : vector<8x8xf32>
    %72 = tpu.matmul %70, %71, %cst_31 {dimension_numbers = #tpu.dot_dimension_numbers<[1], [1], [0], [0], [0, 0, 1, 0], [], []>} : vector<8x8xbf16>, vector<8x8xbf16>, vector<8x8xf32> -> vector<8x8xf32>
    %73 = arith.addf %72, %4 : vector<8x8xf32>
    %cst_32 = arith.constant dense<0xFF800000> : vector<8xf32>
    %74 = vector.multi_reduction <maximumf>, %73, %cst_32 [1] : vector<8x8xf32> to vector<8xf32>
    %75 = vector.shape_cast %74 : vector<8xf32> to vector<8x1xf32>
    %76 = vector.broadcast %75 : vector<8x1xf32> to vector<8x8xf32>
    %77 = arith.subf %73, %76 : vector<8x8xf32>
    %78 = math.exp %77 : vector<8x8xf32>
    %cst_33 = arith.constant dense<0.000000e+00> : vector<8xf32>
    %79 = vector.multi_reduction <add>, %78, %cst_33 [1] : vector<8x8xf32> to vector<8xf32>
    %80 = vector.shape_cast %79 : vector<8xf32> to vector<8x1xf32>
    %81 = tpu.reciprocal %80 {approx = true} : vector<8x1xf32> -> vector<8x1xf32>
    %82 = vector.broadcast %81 : vector<8x1xf32> to vector<8x8xf32>
    %83 = arith.mulf %78, %82 : vector<8x8xf32>
    %84 = arith.truncf %83 : vector<8x8xf32> to vector<8x8xbf16>
    %85 = vector.extract_strided_slice %51 {offsets = [0, 8], sizes = [8, 8], strides = [1, 1]} : vector<8x32xbf16> to vector<8x8xbf16>
    %cst_34 = arith.constant dense<0.000000e+00> : vector<8x8xf32>
    %86 = tpu.matmul %84, %85, %cst_34 {dimension_numbers = #tpu.dot_dimension_numbers<[1], [0], [0], [1], [0, 0, 1, 1], [], []>} : vector<8x8xbf16>, vector<8x8xbf16>, vector<8x8xf32> -> vector<8x8xf32>
    %c0_35 = arith.constant 0 : index
    %c8 = arith.constant 8 : index
    %87 = vector.load %arg30[%c0_35, %c8] : memref<16x32xf32, #tpu.memory_space<vmem>>, vector<8x8xf32>
    tpu.vector_store %arg30[%c0_35, %c8], %86 {strides = array<i32>} : memref<16x32xf32, #tpu.memory_space<vmem>>, vector<8x8xf32>,
    %88 = vector.extract_strided_slice %49 {offsets = [0, 16], sizes = [8, 8], strides = [1, 1]} : vector<8x32xbf16> to vector<8x8xbf16>
    %89 = vector.extract_strided_slice %50 {offsets = [0, 16], sizes = [8, 8], strides = [1, 1]} : vector<8x32xbf16> to vector<8x8xbf16>
    %cst_36 = arith.constant dense<0.000000e+00> : vector<8x8xf32>
    %90 = tpu.matmul %88, %89, %cst_36 {dimension_numbers = #tpu.dot_dimension_numbers<[1], [1], [0], [0], [0, 0, 1, 0], [], []>} : vector<8x8xbf16>, vector<8x8xbf16>, vector<8x8xf32> -> vector<8x8xf32>
    %91 = arith.addf %90, %4 : vector<8x8xf32>
    %cst_37 = arith.constant dense<0xFF800000> : vector<8xf32>
    %92 = vector.multi_reduction <maximumf>, %91, %cst_37 [1] : vector<8x8xf32> to vector<8xf32>
    %93 = vector.shape_cast %92 : vector<8xf32> to vector<8x1xf32>
    %94 = vector.broadcast %93 : vector<8x1xf32> to vector<8x8xf32>
    %95 = arith.subf %91, %94 : vector<8x8xf32>
    %96 = math.exp %95 : vector<8x8xf32>
    %cst_38 = arith.constant dense<0.000000e+00> : vector<8xf32>
    %97 = vector.multi_reduction <add>, %96, %cst_38 [1] : vector<8x8xf32> to vector<8xf32>
    %98 = vector.shape_cast %97 : vector<8xf32> to vector<8x1xf32>
    %99 = tpu.reciprocal %98 {approx = true} : vector<8x1xf32> -> vector<8x1xf32>
    %100 = vector.broadcast %99 : vector<8x1xf32> to vector<8x8xf32>
    %101 = arith.mulf %96, %100 : vector<8x8xf32>
    %102 = arith.truncf %101 : vector<8x8xf32> to vector<8x8xbf16>
    %103 = vector.extract_strided_slice %51 {offsets = [0, 16], sizes = [8, 8], strides = [1, 1]} : vector<8x32xbf16> to vector<8x8xbf16>
    %cst_39 = arith.constant dense<0.000000e+00> : vector<8x8xf32>
    %104 = tpu.matmul %102, %103, %cst_39 {dimension_numbers = #tpu.dot_dimension_numbers<[1], [0], [0], [1], [0, 0, 1, 1], [], []>} : vector<8x8xbf16>, vector<8x8xbf16>, vector<8x8xf32> -> vector<8x8xf32>
    %c0_40 = arith.constant 0 : index
    %c16 = arith.constant 16 : index
    %105 = vector.load %arg30[%c0_40, %c16] : memref<16x32xf32, #tpu.memory_space<vmem>>, vector<8x8xf32>
    tpu.vector_store %arg30[%c0_40, %c16], %104 {strides = array<i32>} : memref<16x32xf32, #tpu.memory_space<vmem>>, vector<8x8xf32>,
    %106 = vector.extract_strided_slice %49 {offsets = [0, 24], sizes = [8, 8], strides = [1, 1]} : vector<8x32xbf16> to vector<8x8xbf16>
    %107 = vector.extract_strided_slice %50 {offsets = [0, 24], sizes = [8, 8], strides = [1, 1]} : vector<8x32xbf16> to vector<8x8xbf16>
    %cst_41 = arith.constant dense<0.000000e+00> : vector<8x8xf32>
    %108 = tpu.matmul %106, %107, %cst_41 {dimension_numbers = #tpu.dot_dimension_numbers<[1], [1], [0], [0], [0, 0, 1, 0], [], []>} : vector<8x8xbf16>, vector<8x8xbf16>, vector<8x8xf32> -> vector<8x8xf32>
    %109 = arith.addf %108, %4 : vector<8x8xf32>
    %cst_42 = arith.constant dense<0xFF800000> : vector<8xf32>
    %110 = vector.multi_reduction <maximumf>, %109, %cst_42 [1] : vector<8x8xf32> to vector<8xf32>
    %111 = vector.shape_cast %110 : vector<8xf32> to vector<8x1xf32>
    %112 = vector.broadcast %111 : vector<8x1xf32> to vector<8x8xf32>
    %113 = arith.subf %109, %112 : vector<8x8xf32>
    %114 = math.exp %113 : vector<8x8xf32>
    %cst_43 = arith.constant dense<0.000000e+00> : vector<8xf32>
    %115 = vector.multi_reduction <add>, %114, %cst_43 [1] : vector<8x8xf32> to vector<8xf32>
    %116 = vector.shape_cast %115 : vector<8xf32> to vector<8x1xf32>
    %117 = tpu.reciprocal %116 {approx = true} : vector<8x1xf32> -> vector<8x1xf32>
    %118 = vector.broadcast %117 : vector<8x1xf32> to vector<8x8xf32>
    %119 = arith.mulf %114, %118 : vector<8x8xf32>
    %120 = arith.truncf %119 : vector<8x8xf32> to vector<8x8xbf16>
    %121 = vector.extract_strided_slice %51 {offsets = [0, 24], sizes = [8, 8], strides = [1, 1]} : vector<8x32xbf16> to vector<8x8xbf16>
    %cst_44 = arith.constant dense<0.000000e+00> : vector<8x8xf32>
    %122 = tpu.matmul %120, %121, %cst_44 {dimension_numbers = #tpu.dot_dimension_numbers<[1], [0], [0], [1], [0, 0, 1, 1], [], []>} : vector<8x8xbf16>, vector<8x8xbf16>, vector<8x8xf32> -> vector<8x8xf32>
    %c0_45 = arith.constant 0 : index
    %c24 = arith.constant 24 : index
    %123 = vector.load %arg30[%c0_45, %c24] : memref<16x32xf32, #tpu.memory_space<vmem>>, vector<8x8xf32>
    tpu.vector_store %arg30[%c0_45, %c24], %122 {strides = array<i32>} : memref<16x32xf32, #tpu.memory_space<vmem>>, vector<8x8xf32>,
    %124 = vector.extract_strided_slice %46 {offsets = [8, 0], sizes = [8, 32], strides = [1, 1]} : vector<16x32xbf16> to vector<8x32xbf16>
    %125 = vector.extract_strided_slice %47 {offsets = [8, 0], sizes = [8, 32], strides = [1, 1]} : vector<16x32xbf16> to vector<8x32xbf16>
    %126 = vector.extract_strided_slice %48 {offsets = [8, 0], sizes = [8, 32], strides = [1, 1]} : vector<16x32xbf16> to vector<8x32xbf16>
    %127 = vector.extract_strided_slice %124 {offsets = [0, 0], sizes = [8, 8], strides = [1, 1]} : vector<8x32xbf16> to vector<8x8xbf16>
    %128 = vector.extract_strided_slice %125 {offsets = [0, 0], sizes = [8, 8], strides = [1, 1]} : vector<8x32xbf16> to vector<8x8xbf16>
    %cst_46 = arith.constant dense<0.000000e+00> : vector<8x8xf32>
    %129 = tpu.matmul %127, %128, %cst_46 {dimension_numbers = #tpu.dot_dimension_numbers<[1], [1], [0], [0], [0, 0, 1, 0], [], []>} : vector<8x8xbf16>, vector<8x8xbf16>, vector<8x8xf32> -> vector<8x8xf32>
    %130 = arith.addf %129, %4 : vector<8x8xf32>
    %cst_47 = arith.constant dense<0xFF800000> : vector<8xf32>
    %131 = vector.multi_reduction <maximumf>, %130, %cst_47 [1] : vector<8x8xf32> to vector<8xf32>
    %132 = vector.shape_cast %131 : vector<8xf32> to vector<8x1xf32>
    %133 = vector.broadcast %132 : vector<8x1xf32> to vector<8x8xf32>
    %134 = arith.subf %130, %133 : vector<8x8xf32>
    %135 = math.exp %134 : vector<8x8xf32>
    %cst_48 = arith.constant dense<0.000000e+00> : vector<8xf32>
    %136 = vector.multi_reduction <add>, %135, %cst_48 [1] : vector<8x8xf32> to vector<8xf32>
    %137 = vector.shape_cast %136 : vector<8xf32> to vector<8x1xf32>
    %138 = tpu.reciprocal %137 {approx = true} : vector<8x1xf32> -> vector<8x1xf32>
    %139 = vector.broadcast %138 : vector<8x1xf32> to vector<8x8xf32>
    %140 = arith.mulf %135, %139 : vector<8x8xf32>
    %141 = arith.truncf %140 : vector<8x8xf32> to vector<8x8xbf16>
    %142 = vector.extract_strided_slice %126 {offsets = [0, 0], sizes = [8, 8], strides = [1, 1]} : vector<8x32xbf16> to vector<8x8xbf16>
    %cst_49 = arith.constant dense<0.000000e+00> : vector<8x8xf32>
    %143 = tpu.matmul %141, %142, %cst_49 {dimension_numbers = #tpu.dot_dimension_numbers<[1], [0], [0], [1], [0, 0, 1, 1], [], []>} : vector<8x8xbf16>, vector<8x8xbf16>, vector<8x8xf32> -> vector<8x8xf32>
    %c8_50 = arith.constant 8 : index
    %c0_51 = arith.constant 0 : index
    %144 = vector.load %arg30[%c8_50, %c0_51] : memref<16x32xf32, #tpu.memory_space<vmem>>, vector<8x8xf32>
    tpu.vector_store %arg30[%c8_50, %c0_51], %143 {strides = array<i32>} : memref<16x32xf32, #tpu.memory_space<vmem>>, vector<8x8xf32>,
    %145 = vector.extract_strided_slice %124 {offsets = [0, 8], sizes = [8, 8], strides = [1, 1]} : vector<8x32xbf16> to vector<8x8xbf16>
    %146 = vector.extract_strided_slice %125 {offsets = [0, 8], sizes = [8, 8], strides = [1, 1]} : vector<8x32xbf16> to vector<8x8xbf16>
    %cst_52 = arith.constant dense<0.000000e+00> : vector<8x8xf32>
    %147 = tpu.matmul %145, %146, %cst_52 {dimension_numbers = #tpu.dot_dimension_numbers<[1], [1], [0], [0], [0, 0, 1, 0], [], []>} : vector<8x8xbf16>, vector<8x8xbf16>, vector<8x8xf32> -> vector<8x8xf32>
    %148 = arith.addf %147, %4 : vector<8x8xf32>
    %cst_53 = arith.constant dense<0xFF800000> : vector<8xf32>
    %149 = vector.multi_reduction <maximumf>, %148, %cst_53 [1] : vector<8x8xf32> to vector<8xf32>
    %150 = vector.shape_cast %149 : vector<8xf32> to vector<8x1xf32>
    %151 = vector.broadcast %150 : vector<8x1xf32> to vector<8x8xf32>
    %152 = arith.subf %148, %151 : vector<8x8xf32>
    %153 = math.exp %152 : vector<8x8xf32>
    %cst_54 = arith.constant dense<0.000000e+00> : vector<8xf32>
    %154 = vector.multi_reduction <add>, %153, %cst_54 [1] : vector<8x8xf32> to vector<8xf32>
    %155 = vector.shape_cast %154 : vector<8xf32> to vector<8x1xf32>
    %156 = tpu.reciprocal %155 {approx = true} : vector<8x1xf32> -> vector<8x1xf32>
    %157 = vector.broadcast %156 : vector<8x1xf32> to vector<8x8xf32>
    %158 = arith.mulf %153, %157 : vector<8x8xf32>
    %159 = arith.truncf %158 : vector<8x8xf32> to vector<8x8xbf16>
    %160 = vector.extract_strided_slice %126 {offsets = [0, 8], sizes = [8, 8], strides = [1, 1]} : vector<8x32xbf16> to vector<8x8xbf16>
    %cst_55 = arith.constant dense<0.000000e+00> : vector<8x8xf32>
    %161 = tpu.matmul %159, %160, %cst_55 {dimension_numbers = #tpu.dot_dimension_numbers<[1], [0], [0], [1], [0, 0, 1, 1], [], []>} : vector<8x8xbf16>, vector<8x8xbf16>, vector<8x8xf32> -> vector<8x8xf32>
    %c8_56 = arith.constant 8 : index
    %c8_57 = arith.constant 8 : index
    %162 = vector.load %arg30[%c8_56, %c8_57] : memref<16x32xf32, #tpu.memory_space<vmem>>, vector<8x8xf32>
    tpu.vector_store %arg30[%c8_56, %c8_57], %161 {strides = array<i32>} : memref<16x32xf32, #tpu.memory_space<vmem>>, vector<8x8xf32>,
    %163 = vector.extract_strided_slice %124 {offsets = [0, 16], sizes = [8, 8], strides = [1, 1]} : vector<8x32xbf16> to vector<8x8xbf16>
    %164 = vector.extract_strided_slice %125 {offsets = [0, 16], sizes = [8, 8], strides = [1, 1]} : vector<8x32xbf16> to vector<8x8xbf16>
    %cst_58 = arith.constant dense<0.000000e+00> : vector<8x8xf32>
    %165 = tpu.matmul %163, %164, %cst_58 {dimension_numbers = #tpu.dot_dimension_numbers<[1], [1], [0], [0], [0, 0, 1, 0], [], []>} : vector<8x8xbf16>, vector<8x8xbf16>, vector<8x8xf32> -> vector<8x8xf32>
    %166 = arith.addf %165, %4 : vector<8x8xf32>
    %cst_59 = arith.constant dense<0xFF800000> : vector<8xf32>
    %167 = vector.multi_reduction <maximumf>, %166, %cst_59 [1] : vector<8x8xf32> to vector<8xf32>
    %168 = vector.shape_cast %167 : vector<8xf32> to vector<8x1xf32>
    %169 = vector.broadcast %168 : vector<8x1xf32> to vector<8x8xf32>
    %170 = arith.subf %166, %169 : vector<8x8xf32>
    %171 = math.exp %170 : vector<8x8xf32>
    %cst_60 = arith.constant dense<0.000000e+00> : vector<8xf32>
    %172 = vector.multi_reduction <add>, %171, %cst_60 [1] : vector<8x8xf32> to vector<8xf32>
    %173 = vector.shape_cast %172 : vector<8xf32> to vector<8x1xf32>
    %174 = tpu.reciprocal %173 {approx = true} : vector<8x1xf32> -> vector<8x1xf32>
    %175 = vector.broadcast %174 : vector<8x1xf32> to vector<8x8xf32>
    %176 = arith.mulf %171, %175 : vector<8x8xf32>
    %177 = arith.truncf %176 : vector<8x8xf32> to vector<8x8xbf16>
    %178 = vector.extract_strided_slice %126 {offsets = [0, 16], sizes = [8, 8], strides = [1, 1]} : vector<8x32xbf16> to vector<8x8xbf16>
    %cst_61 = arith.constant dense<0.000000e+00> : vector<8x8xf32>
    %179 = tpu.matmul %177, %178, %cst_61 {dimension_numbers = #tpu.dot_dimension_numbers<[1], [0], [0], [1], [0, 0, 1, 1], [], []>} : vector<8x8xbf16>, vector<8x8xbf16>, vector<8x8xf32> -> vector<8x8xf32>
    %c8_62 = arith.constant 8 : index
    %c16_63 = arith.constant 16 : index
    %180 = vector.load %arg30[%c8_62, %c16_63] : memref<16x32xf32, #tpu.memory_space<vmem>>, vector<8x8xf32>
    tpu.vector_store %arg30[%c8_62, %c16_63], %179 {strides = array<i32>} : memref<16x32xf32, #tpu.memory_space<vmem>>, vector<8x8xf32>,
    %181 = vector.extract_strided_slice %124 {offsets = [0, 24], sizes = [8, 8], strides = [1, 1]} : vector<8x32xbf16> to vector<8x8xbf16>
    %182 = vector.extract_strided_slice %125 {offsets = [0, 24], sizes = [8, 8], strides = [1, 1]} : vector<8x32xbf16> to vector<8x8xbf16>
    %cst_64 = arith.constant dense<0.000000e+00> : vector<8x8xf32>
    %183 = tpu.matmul %181, %182, %cst_64 {dimension_numbers = #tpu.dot_dimension_numbers<[1], [1], [0], [0], [0, 0, 1, 0], [], []>} : vector<8x8xbf16>, vector<8x8xbf16>, vector<8x8xf32> -> vector<8x8xf32>
    %184 = arith.addf %183, %4 : vector<8x8xf32>
    %cst_65 = arith.constant dense<0xFF800000> : vector<8xf32>
    %185 = vector.multi_reduction <maximumf>, %184, %cst_65 [1] : vector<8x8xf32> to vector<8xf32>
    %186 = vector.shape_cast %185 : vector<8xf32> to vector<8x1xf32>
    %187 = vector.broadcast %186 : vector<8x1xf32> to vector<8x8xf32>
    %188 = arith.subf %184, %187 : vector<8x8xf32>
    %189 = math.exp %188 : vector<8x8xf32>
    %cst_66 = arith.constant dense<0.000000e+00> : vector<8xf32>
    %190 = vector.multi_reduction <add>, %189, %cst_66 [1] : vector<8x8xf32> to vector<8xf32>
    %191 = vector.shape_cast %190 : vector<8xf32> to vector<8x1xf32>
    %192 = tpu.reciprocal %191 {approx = true} : vector<8x1xf32> -> vector<8x1xf32>
    %193 = vector.broadcast %192 : vector<8x1xf32> to vector<8x8xf32>
    %194 = arith.mulf %189, %193 : vector<8x8xf32>
    %195 = arith.truncf %194 : vector<8x8xf32> to vector<8x8xbf16>
    %196 = vector.extract_strided_slice %126 {offsets = [0, 24], sizes = [8, 8], strides = [1, 1]} : vector<8x32xbf16> to vector<8x8xbf16>
    %cst_67 = arith.constant dense<0.000000e+00> : vector<8x8xf32>
    %197 = tpu.matmul %195, %196, %cst_67 {dimension_numbers = #tpu.dot_dimension_numbers<[1], [0], [0], [1], [0, 0, 1, 1], [], []>} : vector<8x8xbf16>, vector<8x8xbf16>, vector<8x8xf32> -> vector<8x8xf32>
    %c8_68 = arith.constant 8 : index
    %c24_69 = arith.constant 24 : index
    %198 = vector.load %arg30[%c8_68, %c24_69] : memref<16x32xf32, #tpu.memory_space<vmem>>, vector<8x8xf32>
    tpu.vector_store %arg30[%c8_68, %c24_69], %197 {strides = array<i32>} : memref<16x32xf32, #tpu.memory_space<vmem>>, vector<8x8xf32>,
    %c0_70 = arith.constant 0 : index
    %c0_71 = arith.constant 0 : index
    %199 = vector.load %arg30[%c0_70, %c0_71] : memref<16x32xf32, #tpu.memory_space<vmem>>, vector<16x32xf32>
    %c0_72 = arith.constant 0 : index
    %c0_73 = arith.constant 0 : index
    %c0_74 = arith.constant 0 : index
    %200 = vector.load %arg14[%c0_72, %c0_73, %c0_74] : memref<1x32x32xbf16, #tpu.memory_space<vmem>>, vector<1x32x32xbf16>
    %201 = vector.shape_cast %200 : vector<1x32x32xbf16> to vector<32x32xbf16>
    %202 = arith.truncf %199 : vector<16x32xf32> to vector<16x32xbf16>
    %cst_75 = arith.constant dense<0.000000e+00> : vector<16x32xf32>
    %203 = tpu.matmul %202, %201, %cst_75 {dimension_numbers = #tpu.dot_dimension_numbers<[1], [0], [0], [1], [0, 0, 1, 1], [], []>} : vector<16x32xbf16>, vector<32x32xbf16>, vector<16x32xf32> -> vector<16x32xf32>
    %204 = arith.addf %3, %203 : vector<16x32xf32>
    %c0_76 = arith.constant 0 : index
    %c0_77 = arith.constant 0 : index
    %c0_78 = arith.constant 0 : index
    %205 = vector.load %arg15[%c0_76, %c0_77, %c0_78] : memref<1x1x32xf32, #tpu.memory_space<vmem>>, vector<1x1x32xf32>
    %206 = vector.shape_cast %205 : vector<1x1x32xf32> to vector<1x32xf32>
    %207 = vector.broadcast %206 : vector<1x32xf32> to vector<16x32xf32>
    %208 = arith.addf %204, %207 : vector<16x32xf32>
    %c0_79 = arith.constant 0 : index
    %c0_80 = arith.constant 0 : index
    %c0_81 = arith.constant 0 : index
    %209 = vector.load %arg8[%c0_79, %c0_80, %c0_81] : memref<1x1x32xf32, #tpu.memory_space<vmem>>, vector<1x1x32xf32>
    %210 = vector.shape_cast %209 : vector<1x1x32xf32> to vector<1x32xf32>
    %c0_82 = arith.constant 0 : index
    %c0_83 = arith.constant 0 : index
    %c0_84 = arith.constant 0 : index
    %211 = vector.load %arg9[%c0_82, %c0_83, %c0_84] : memref<1x1x32xf32, #tpu.memory_space<vmem>>, vector<1x1x32xf32>
    %212 = vector.shape_cast %211 : vector<1x1x32xf32> to vector<1x32xf32>
    %cst_85 = arith.constant dense<0.000000e+00> : vector<16xf32>
    %213 = vector.multi_reduction <add>, %208, %cst_85 [1] : vector<16x32xf32> to vector<16xf32>
    %214 = vector.shape_cast %213 : vector<16xf32> to vector<16x1xf32>
    %cst_86 = arith.constant 3.200000e+01 : f32
    %215 = vector.broadcast %cst_86 : f32 to vector<16x1xf32>
    %216 = arith.divf %214, %215 : vector<16x1xf32>
    %217 = vector.broadcast %216 : vector<16x1xf32> to vector<16x32xf32>
    %218 = arith.subf %208, %217 : vector<16x32xf32>
    %219 = arith.mulf %218, %218 : vector<16x32xf32>
    %cst_87 = arith.constant dense<0.000000e+00> : vector<16xf32>
    %220 = vector.multi_reduction <add>, %219, %cst_87 [1] : vector<16x32xf32> to vector<16xf32>
    %221 = vector.shape_cast %220 : vector<16xf32> to vector<16x1xf32>
    %cst_88 = arith.constant 3.200000e+01 : f32
    %222 = vector.broadcast %cst_88 : f32 to vector<16x1xf32>
    %223 = arith.divf %221, %222 : vector<16x1xf32>
    %224 = vector.broadcast %216 : vector<16x1xf32> to vector<16x32xf32>
    %225 = arith.subf %208, %224 : vector<16x32xf32>
    %cst_89 = arith.constant 9.99999974E-6 : f32
    %226 = vector.broadcast %cst_89 : f32 to vector<16x1xf32>
    %227 = arith.addf %223, %226 : vector<16x1xf32>
    %228 = math.rsqrt %227 : vector<16x1xf32>
    %229 = vector.broadcast %228 : vector<16x1xf32> to vector<16x32xf32>
    %230 = arith.mulf %225, %229 : vector<16x32xf32>
    %231 = vector.broadcast %210 : vector<1x32xf32> to vector<16x32xf32>
    %232 = arith.mulf %230, %231 : vector<16x32xf32>
    %233 = vector.broadcast %212 : vector<1x32xf32> to vector<16x32xf32>
    %234 = arith.addf %232, %233 : vector<16x32xf32>
    %c0_90 = arith.constant 0 : index
    %c0_91 = arith.constant 0 : index
    %c0_92 = arith.constant 0 : index
    %235 = vector.load %arg16[%c0_90, %c0_91, %c0_92] : memref<1x32x32xbf16, #tpu.memory_space<vmem>>, vector<1x32x32xbf16>
    %236 = vector.shape_cast %235 : vector<1x32x32xbf16> to vector<32x32xbf16>
    %237 = arith.truncf %234 : vector<16x32xf32> to vector<16x32xbf16>
    %cst_93 = arith.constant dense<0.000000e+00> : vector<16x32xf32>
    %238 = tpu.matmul %237, %236, %cst_93 {dimension_numbers = #tpu.dot_dimension_numbers<[1], [0], [0], [1], [0, 0, 1, 1], [], []>} : vector<16x32xbf16>, vector<32x32xbf16>, vector<16x32xf32> -> vector<16x32xf32>
    %c0_94 = arith.constant 0 : index
    %c0_95 = arith.constant 0 : index
    %c0_96 = arith.constant 0 : index
    %239 = vector.load %arg17[%c0_94, %c0_95, %c0_96] : memref<1x1x32xf32, #tpu.memory_space<vmem>>, vector<1x1x32xf32>
    %240 = vector.shape_cast %239 : vector<1x1x32xf32> to vector<1x32xf32>
    %241 = vector.broadcast %240 : vector<1x32xf32> to vector<16x32xf32>
    %242 = arith.addf %238, %241 : vector<16x32xf32>
    %c0_97 = arith.constant 0 : index
    %c0_98 = arith.constant 0 : index
    %c0_99 = arith.constant 0 : index
    %243 = vector.load %arg18[%c0_97, %c0_98, %c0_99] : memref<1x32x64xbf16, #tpu.memory_space<vmem>>, vector<1x32x64xbf16>
    %244 = vector.shape_cast %243 : vector<1x32x64xbf16> to vector<32x64xbf16>
    %245 = arith.truncf %6 : vector<32x32xf32> to vector<32x32xbf16>
    %cst_100 = arith.constant dense<0.000000e+00> : vector<32x64xf32>
    %246 = tpu.matmul %245, %244, %cst_100 {dimension_numbers = #tpu.dot_dimension_numbers<[1], [0], [0], [1], [0, 0, 1, 1], [], []>} : vector<32x32xbf16>, vector<32x64xbf16>, vector<32x64xf32> -> vector<32x64xf32>
    %c0_101 = arith.constant 0 : index
    %c0_102 = arith.constant 0 : index
    %c0_103 = arith.constant 0 : index
    %247 = vector.load %arg19[%c0_101, %c0_102, %c0_103] : memref<1x1x64xf32, #tpu.memory_space<vmem>>, vector<1x1x64xf32>
    %248 = vector.shape_cast %247 : vector<1x1x64xf32> to vector<1x64xf32>
    %249 = vector.broadcast %248 : vector<1x64xf32> to vector<32x64xf32>
    %250 = arith.addf %246, %249 : vector<32x64xf32>
    %251 = vector.extract_strided_slice %250 {offsets = [0, 0], sizes = [32, 32], strides = [1, 1]} : vector<32x64xf32> to vector<32x32xf32>
    %252 = vector.extract_strided_slice %250 {offsets = [0, 32], sizes = [32, 32], strides = [1, 1]} : vector<32x64xf32> to vector<32x32xf32>
    %cst_104 = arith.constant 0.353553385 : f32
    %253 = vector.broadcast %cst_104 : f32 to vector<16x32xf32>
    %254 = arith.mulf %242, %253 : vector<16x32xf32>
    %255 = arith.truncf %254 : vector<16x32xf32> to vector<16x32xbf16>
    %256 = arith.truncf %251 : vector<32x32xf32> to vector<32x32xbf16>
    %257 = arith.truncf %252 : vector<32x32xf32> to vector<32x32xbf16>
    %258 = vector.extract_strided_slice %255 {offsets = [0, 0], sizes = [8, 32], strides = [1, 1]} : vector<16x32xbf16> to vector<8x32xbf16>
    %259 = vector.extract_strided_slice %256 {offsets = [0, 0], sizes = [16, 32], strides = [1, 1]} : vector<32x32xbf16> to vector<16x32xbf16>
    %260 = vector.extract_strided_slice %257 {offsets = [0, 0], sizes = [16, 32], strides = [1, 1]} : vector<32x32xbf16> to vector<16x32xbf16>
    %261 = vector.extract_strided_slice %258 {offsets = [0, 0], sizes = [8, 8], strides = [1, 1]} : vector<8x32xbf16> to vector<8x8xbf16>
    %262 = vector.extract_strided_slice %259 {offsets = [0, 0], sizes = [16, 8], strides = [1, 1]} : vector<16x32xbf16> to vector<16x8xbf16>
    %cst_105 = arith.constant dense<0.000000e+00> : vector<8x16xf32>
    %263 = tpu.matmul %261, %262, %cst_105 {dimension_numbers = #tpu.dot_dimension_numbers<[1], [1], [0], [0], [0, 0, 1, 0], [], []>} : vector<8x8xbf16>, vector<16x8xbf16>, vector<8x16xf32> -> vector<8x16xf32>
    %cst_106 = arith.constant dense<0xFF800000> : vector<8xf32>
    %264 = vector.multi_reduction <maximumf>, %263, %cst_106 [1] : vector<8x16xf32> to vector<8xf32>
    %265 = vector.shape_cast %264 : vector<8xf32> to vector<8x1xf32>
    %266 = vector.broadcast %265 : vector<8x1xf32> to vector<8x16xf32>
    %267 = arith.subf %263, %266 : vector<8x16xf32>
    %268 = math.exp %267 : vector<8x16xf32>
    %cst_107 = arith.constant dense<0.000000e+00> : vector<8xf32>
    %269 = vector.multi_reduction <add>, %268, %cst_107 [1] : vector<8x16xf32> to vector<8xf32>
    %270 = vector.shape_cast %269 : vector<8xf32> to vector<8x1xf32>
    %271 = tpu.reciprocal %270 {approx = true} : vector<8x1xf32> -> vector<8x1xf32>
    %272 = vector.broadcast %271 : vector<8x1xf32> to vector<8x16xf32>
    %273 = arith.mulf %268, %272 : vector<8x16xf32>
    %274 = arith.truncf %273 : vector<8x16xf32> to vector<8x16xbf16>
    %275 = vector.extract_strided_slice %260 {offsets = [0, 0], sizes = [16, 8], strides = [1, 1]} : vector<16x32xbf16> to vector<16x8xbf16>
    %cst_108 = arith.constant dense<0.000000e+00> : vector<8x8xf32>
    %276 = tpu.matmul %274, %275, %cst_108 {dimension_numbers = #tpu.dot_dimension_numbers<[1], [0], [0], [1], [0, 0, 1, 1], [], []>} : vector<8x16xbf16>, vector<16x8xbf16>, vector<8x8xf32> -> vector<8x8xf32>
    %c0_109 = arith.constant 0 : index
    %c0_110 = arith.constant 0 : index
    %277 = vector.load %arg30[%c0_109, %c0_110] : memref<16x32xf32, #tpu.memory_space<vmem>>, vector<8x8xf32>
    tpu.vector_store %arg30[%c0_109, %c0_110], %276 {strides = array<i32>} : memref<16x32xf32, #tpu.memory_space<vmem>>, vector<8x8xf32>,
    %278 = vector.extract_strided_slice %258 {offsets = [0, 8], sizes = [8, 8], strides = [1, 1]} : vector<8x32xbf16> to vector<8x8xbf16>
    %279 = vector.extract_strided_slice %259 {offsets = [0, 8], sizes = [16, 8], strides = [1, 1]} : vector<16x32xbf16> to vector<16x8xbf16>
    %cst_111 = arith.constant dense<0.000000e+00> : vector<8x16xf32>
    %280 = tpu.matmul %278, %279, %cst_111 {dimension_numbers = #tpu.dot_dimension_numbers<[1], [1], [0], [0], [0, 0, 1, 0], [], []>} : vector<8x8xbf16>, vector<16x8xbf16>, vector<8x16xf32> -> vector<8x16xf32>
    %cst_112 = arith.constant dense<0xFF800000> : vector<8xf32>
    %281 = vector.multi_reduction <maximumf>, %280, %cst_112 [1] : vector<8x16xf32> to vector<8xf32>
    %282 = vector.shape_cast %281 : vector<8xf32> to vector<8x1xf32>
    %283 = vector.broadcast %282 : vector<8x1xf32> to vector<8x16xf32>
    %284 = arith.subf %280, %283 : vector<8x16xf32>
    %285 = math.exp %284 : vector<8x16xf32>
    %cst_113 = arith.constant dense<0.000000e+00> : vector<8xf32>
    %286 = vector.multi_reduction <add>, %285, %cst_113 [1] : vector<8x16xf32> to vector<8xf32>
    %287 = vector.shape_cast %286 : vector<8xf32> to vector<8x1xf32>
    %288 = tpu.reciprocal %287 {approx = true} : vector<8x1xf32> -> vector<8x1xf32>
    %289 = vector.broadcast %288 : vector<8x1xf32> to vector<8x16xf32>
    %290 = arith.mulf %285, %289 : vector<8x16xf32>
    %291 = arith.truncf %290 : vector<8x16xf32> to vector<8x16xbf16>
    %292 = vector.extract_strided_slice %260 {offsets = [0, 8], sizes = [16, 8], strides = [1, 1]} : vector<16x32xbf16> to vector<16x8xbf16>
    %cst_114 = arith.constant dense<0.000000e+00> : vector<8x8xf32>
    %293 = tpu.matmul %291, %292, %cst_114 {dimension_numbers = #tpu.dot_dimension_numbers<[1], [0], [0], [1], [0, 0, 1, 1], [], []>} : vector<8x16xbf16>, vector<16x8xbf16>, vector<8x8xf32> -> vector<8x8xf32>
    %c0_115 = arith.constant 0 : index
    %c8_116 = arith.constant 8 : index
    %294 = vector.load %arg30[%c0_115, %c8_116] : memref<16x32xf32, #tpu.memory_space<vmem>>, vector<8x8xf32>
    tpu.vector_store %arg30[%c0_115, %c8_116], %293 {strides = array<i32>} : memref<16x32xf32, #tpu.memory_space<vmem>>, vector<8x8xf32>,
    %295 = vector.extract_strided_slice %258 {offsets = [0, 16], sizes = [8, 8], strides = [1, 1]} : vector<8x32xbf16> to vector<8x8xbf16>
    %296 = vector.extract_strided_slice %259 {offsets = [0, 16], sizes = [16, 8], strides = [1, 1]} : vector<16x32xbf16> to vector<16x8xbf16>
    %cst_117 = arith.constant dense<0.000000e+00> : vector<8x16xf32>
    %297 = tpu.matmul %295, %296, %cst_117 {dimension_numbers = #tpu.dot_dimension_numbers<[1], [1], [0], [0], [0, 0, 1, 0], [], []>} : vector<8x8xbf16>, vector<16x8xbf16>, vector<8x16xf32> -> vector<8x16xf32>
    %cst_118 = arith.constant dense<0xFF800000> : vector<8xf32>
    %298 = vector.multi_reduction <maximumf>, %297, %cst_118 [1] : vector<8x16xf32> to vector<8xf32>
    %299 = vector.shape_cast %298 : vector<8xf32> to vector<8x1xf32>
    %300 = vector.broadcast %299 : vector<8x1xf32> to vector<8x16xf32>
    %301 = arith.subf %297, %300 : vector<8x16xf32>
    %302 = math.exp %301 : vector<8x16xf32>
    %cst_119 = arith.constant dense<0.000000e+00> : vector<8xf32>
    %303 = vector.multi_reduction <add>, %302, %cst_119 [1] : vector<8x16xf32> to vector<8xf32>
    %304 = vector.shape_cast %303 : vector<8xf32> to vector<8x1xf32>
    %305 = tpu.reciprocal %304 {approx = true} : vector<8x1xf32> -> vector<8x1xf32>
    %306 = vector.broadcast %305 : vector<8x1xf32> to vector<8x16xf32>
    %307 = arith.mulf %302, %306 : vector<8x16xf32>
    %308 = arith.truncf %307 : vector<8x16xf32> to vector<8x16xbf16>
    %309 = vector.extract_strided_slice %260 {offsets = [0, 16], sizes = [16, 8], strides = [1, 1]} : vector<16x32xbf16> to vector<16x8xbf16>
    %cst_120 = arith.constant dense<0.000000e+00> : vector<8x8xf32>
    %310 = tpu.matmul %308, %309, %cst_120 {dimension_numbers = #tpu.dot_dimension_numbers<[1], [0], [0], [1], [0, 0, 1, 1], [], []>} : vector<8x16xbf16>, vector<16x8xbf16>, vector<8x8xf32> -> vector<8x8xf32>
    %c0_121 = arith.constant 0 : index
    %c16_122 = arith.constant 16 : index
    %311 = vector.load %arg30[%c0_121, %c16_122] : memref<16x32xf32, #tpu.memory_space<vmem>>, vector<8x8xf32>
    tpu.vector_store %arg30[%c0_121, %c16_122], %310 {strides = array<i32>} : memref<16x32xf32, #tpu.memory_space<vmem>>, vector<8x8xf32>,
    %312 = vector.extract_strided_slice %258 {offsets = [0, 24], sizes = [8, 8], strides = [1, 1]} : vector<8x32xbf16> to vector<8x8xbf16>
    %313 = vector.extract_strided_slice %259 {offsets = [0, 24], sizes = [16, 8], strides = [1, 1]} : vector<16x32xbf16> to vector<16x8xbf16>
    %cst_123 = arith.constant dense<0.000000e+00> : vector<8x16xf32>
    %314 = tpu.matmul %312, %313, %cst_123 {dimension_numbers = #tpu.dot_dimension_numbers<[1], [1], [0], [0], [0, 0, 1, 0], [], []>} : vector<8x8xbf16>, vector<16x8xbf16>, vector<8x16xf32> -> vector<8x16xf32>
    %cst_124 = arith.constant dense<0xFF800000> : vector<8xf32>
    %315 = vector.multi_reduction <maximumf>, %314, %cst_124 [1] : vector<8x16xf32> to vector<8xf32>
    %316 = vector.shape_cast %315 : vector<8xf32> to vector<8x1xf32>
    %317 = vector.broadcast %316 : vector<8x1xf32> to vector<8x16xf32>
    %318 = arith.subf %314, %317 : vector<8x16xf32>
    %319 = math.exp %318 : vector<8x16xf32>
    %cst_125 = arith.constant dense<0.000000e+00> : vector<8xf32>
    %320 = vector.multi_reduction <add>, %319, %cst_125 [1] : vector<8x16xf32> to vector<8xf32>
    %321 = vector.shape_cast %320 : vector<8xf32> to vector<8x1xf32>
    %322 = tpu.reciprocal %321 {approx = true} : vector<8x1xf32> -> vector<8x1xf32>
    %323 = vector.broadcast %322 : vector<8x1xf32> to vector<8x16xf32>
    %324 = arith.mulf %319, %323 : vector<8x16xf32>
    %325 = arith.truncf %324 : vector<8x16xf32> to vector<8x16xbf16>
    %326 = vector.extract_strided_slice %260 {offsets = [0, 24], sizes = [16, 8], strides = [1, 1]} : vector<16x32xbf16> to vector<16x8xbf16>
    %cst_126 = arith.constant dense<0.000000e+00> : vector<8x8xf32>
    %327 = tpu.matmul %325, %326, %cst_126 {dimension_numbers = #tpu.dot_dimension_numbers<[1], [0], [0], [1], [0, 0, 1, 1], [], []>} : vector<8x16xbf16>, vector<16x8xbf16>, vector<8x8xf32> -> vector<8x8xf32>
    %c0_127 = arith.constant 0 : index
    %c24_128 = arith.constant 24 : index
    %328 = vector.load %arg30[%c0_127, %c24_128] : memref<16x32xf32, #tpu.memory_space<vmem>>, vector<8x8xf32>
    tpu.vector_store %arg30[%c0_127, %c24_128], %327 {strides = array<i32>} : memref<16x32xf32, #tpu.memory_space<vmem>>, vector<8x8xf32>,
    %329 = vector.extract_strided_slice %255 {offsets = [8, 0], sizes = [8, 32], strides = [1, 1]} : vector<16x32xbf16> to vector<8x32xbf16>
    %330 = vector.extract_strided_slice %256 {offsets = [16, 0], sizes = [16, 32], strides = [1, 1]} : vector<32x32xbf16> to vector<16x32xbf16>
    %331 = vector.extract_strided_slice %257 {offsets = [16, 0], sizes = [16, 32], strides = [1, 1]} : vector<32x32xbf16> to vector<16x32xbf16>
    %332 = vector.extract_strided_slice %329 {offsets = [0, 0], sizes = [8, 8], strides = [1, 1]} : vector<8x32xbf16> to vector<8x8xbf16>
    %333 = vector.extract_strided_slice %330 {offsets = [0, 0], sizes = [16, 8], strides = [1, 1]} : vector<16x32xbf16> to vector<16x8xbf16>
    %cst_129 = arith.constant dense<0.000000e+00> : vector<8x16xf32>
    %334 = tpu.matmul %332, %333, %cst_129 {dimension_numbers = #tpu.dot_dimension_numbers<[1], [1], [0], [0], [0, 0, 1, 0], [], []>} : vector<8x8xbf16>, vector<16x8xbf16>, vector<8x16xf32> -> vector<8x16xf32>
    %cst_130 = arith.constant dense<0xFF800000> : vector<8xf32>
    %335 = vector.multi_reduction <maximumf>, %334, %cst_130 [1] : vector<8x16xf32> to vector<8xf32>
    %336 = vector.shape_cast %335 : vector<8xf32> to vector<8x1xf32>
    %337 = vector.broadcast %336 : vector<8x1xf32> to vector<8x16xf32>
    %338 = arith.subf %334, %337 : vector<8x16xf32>
    %339 = math.exp %338 : vector<8x16xf32>
    %cst_131 = arith.constant dense<0.000000e+00> : vector<8xf32>
    %340 = vector.multi_reduction <add>, %339, %cst_131 [1] : vector<8x16xf32> to vector<8xf32>
    %341 = vector.shape_cast %340 : vector<8xf32> to vector<8x1xf32>
    %342 = tpu.reciprocal %341 {approx = true} : vector<8x1xf32> -> vector<8x1xf32>
    %343 = vector.broadcast %342 : vector<8x1xf32> to vector<8x16xf32>
    %344 = arith.mulf %339, %343 : vector<8x16xf32>
    %345 = arith.truncf %344 : vector<8x16xf32> to vector<8x16xbf16>
    %346 = vector.extract_strided_slice %331 {offsets = [0, 0], sizes = [16, 8], strides = [1, 1]} : vector<16x32xbf16> to vector<16x8xbf16>
    %cst_132 = arith.constant dense<0.000000e+00> : vector<8x8xf32>
    %347 = tpu.matmul %345, %346, %cst_132 {dimension_numbers = #tpu.dot_dimension_numbers<[1], [0], [0], [1], [0, 0, 1, 1], [], []>} : vector<8x16xbf16>, vector<16x8xbf16>, vector<8x8xf32> -> vector<8x8xf32>
    %c8_133 = arith.constant 8 : index
    %c0_134 = arith.constant 0 : index
    %348 = vector.load %arg30[%c8_133, %c0_134] : memref<16x32xf32, #tpu.memory_space<vmem>>, vector<8x8xf32>
    tpu.vector_store %arg30[%c8_133, %c0_134], %347 {strides = array<i32>} : memref<16x32xf32, #tpu.memory_space<vmem>>, vector<8x8xf32>,
    %349 = vector.extract_strided_slice %329 {offsets = [0, 8], sizes = [8, 8], strides = [1, 1]} : vector<8x32xbf16> to vector<8x8xbf16>
    %350 = vector.extract_strided_slice %330 {offsets = [0, 8], sizes = [16, 8], strides = [1, 1]} : vector<16x32xbf16> to vector<16x8xbf16>
    %cst_135 = arith.constant dense<0.000000e+00> : vector<8x16xf32>
    %351 = tpu.matmul %349, %350, %cst_135 {dimension_numbers = #tpu.dot_dimension_numbers<[1], [1], [0], [0], [0, 0, 1, 0], [], []>} : vector<8x8xbf16>, vector<16x8xbf16>, vector<8x16xf32> -> vector<8x16xf32>
    %cst_136 = arith.constant dense<0xFF800000> : vector<8xf32>
    %352 = vector.multi_reduction <maximumf>, %351, %cst_136 [1] : vector<8x16xf32> to vector<8xf32>
    %353 = vector.shape_cast %352 : vector<8xf32> to vector<8x1xf32>
    %354 = vector.broadcast %353 : vector<8x1xf32> to vector<8x16xf32>
    %355 = arith.subf %351, %354 : vector<8x16xf32>
    %356 = math.exp %355 : vector<8x16xf32>
    %cst_137 = arith.constant dense<0.000000e+00> : vector<8xf32>
    %357 = vector.multi_reduction <add>, %356, %cst_137 [1] : vector<8x16xf32> to vector<8xf32>
    %358 = vector.shape_cast %357 : vector<8xf32> to vector<8x1xf32>
    %359 = tpu.reciprocal %358 {approx = true} : vector<8x1xf32> -> vector<8x1xf32>
    %360 = vector.broadcast %359 : vector<8x1xf32> to vector<8x16xf32>
    %361 = arith.mulf %356, %360 : vector<8x16xf32>
    %362 = arith.truncf %361 : vector<8x16xf32> to vector<8x16xbf16>
    %363 = vector.extract_strided_slice %331 {offsets = [0, 8], sizes = [16, 8], strides = [1, 1]} : vector<16x32xbf16> to vector<16x8xbf16>
    %cst_138 = arith.constant dense<0.000000e+00> : vector<8x8xf32>
    %364 = tpu.matmul %362, %363, %cst_138 {dimension_numbers = #tpu.dot_dimension_numbers<[1], [0], [0], [1], [0, 0, 1, 1], [], []>} : vector<8x16xbf16>, vector<16x8xbf16>, vector<8x8xf32> -> vector<8x8xf32>
    %c8_139 = arith.constant 8 : index
    %c8_140 = arith.constant 8 : index
    %365 = vector.load %arg30[%c8_139, %c8_140] : memref<16x32xf32, #tpu.memory_space<vmem>>, vector<8x8xf32>
    tpu.vector_store %arg30[%c8_139, %c8_140], %364 {strides = array<i32>} : memref<16x32xf32, #tpu.memory_space<vmem>>, vector<8x8xf32>,
    %366 = vector.extract_strided_slice %329 {offsets = [0, 16], sizes = [8, 8], strides = [1, 1]} : vector<8x32xbf16> to vector<8x8xbf16>
    %367 = vector.extract_strided_slice %330 {offsets = [0, 16], sizes = [16, 8], strides = [1, 1]} : vector<16x32xbf16> to vector<16x8xbf16>
    %cst_141 = arith.constant dense<0.000000e+00> : vector<8x16xf32>
    %368 = tpu.matmul %366, %367, %cst_141 {dimension_numbers = #tpu.dot_dimension_numbers<[1], [1], [0], [0], [0, 0, 1, 0], [], []>} : vector<8x8xbf16>, vector<16x8xbf16>, vector<8x16xf32> -> vector<8x16xf32>
    %cst_142 = arith.constant dense<0xFF800000> : vector<8xf32>
    %369 = vector.multi_reduction <maximumf>, %368, %cst_142 [1] : vector<8x16xf32> to vector<8xf32>
    %370 = vector.shape_cast %369 : vector<8xf32> to vector<8x1xf32>
    %371 = vector.broadcast %370 : vector<8x1xf32> to vector<8x16xf32>
    %372 = arith.subf %368, %371 : vector<8x16xf32>
    %373 = math.exp %372 : vector<8x16xf32>
    %cst_143 = arith.constant dense<0.000000e+00> : vector<8xf32>
    %374 = vector.multi_reduction <add>, %373, %cst_143 [1] : vector<8x16xf32> to vector<8xf32>
    %375 = vector.shape_cast %374 : vector<8xf32> to vector<8x1xf32>
    %376 = tpu.reciprocal %375 {approx = true} : vector<8x1xf32> -> vector<8x1xf32>
    %377 = vector.broadcast %376 : vector<8x1xf32> to vector<8x16xf32>
    %378 = arith.mulf %373, %377 : vector<8x16xf32>
    %379 = arith.truncf %378 : vector<8x16xf32> to vector<8x16xbf16>
    %380 = vector.extract_strided_slice %331 {offsets = [0, 16], sizes = [16, 8], strides = [1, 1]} : vector<16x32xbf16> to vector<16x8xbf16>
    %cst_144 = arith.constant dense<0.000000e+00> : vector<8x8xf32>
    %381 = tpu.matmul %379, %380, %cst_144 {dimension_numbers = #tpu.dot_dimension_numbers<[1], [0], [0], [1], [0, 0, 1, 1], [], []>} : vector<8x16xbf16>, vector<16x8xbf16>, vector<8x8xf32> -> vector<8x8xf32>
    %c8_145 = arith.constant 8 : index
    %c16_146 = arith.constant 16 : index
    %382 = vector.load %arg30[%c8_145, %c16_146] : memref<16x32xf32, #tpu.memory_space<vmem>>, vector<8x8xf32>
    tpu.vector_store %arg30[%c8_145, %c16_146], %381 {strides = array<i32>} : memref<16x32xf32, #tpu.memory_space<vmem>>, vector<8x8xf32>,
    %383 = vector.extract_strided_slice %329 {offsets = [0, 24], sizes = [8, 8], strides = [1, 1]} : vector<8x32xbf16> to vector<8x8xbf16>
    %384 = vector.extract_strided_slice %330 {offsets = [0, 24], sizes = [16, 8], strides = [1, 1]} : vector<16x32xbf16> to vector<16x8xbf16>
    %cst_147 = arith.constant dense<0.000000e+00> : vector<8x16xf32>
    %385 = tpu.matmul %383, %384, %cst_147 {dimension_numbers = #tpu.dot_dimension_numbers<[1], [1], [0], [0], [0, 0, 1, 0], [], []>} : vector<8x8xbf16>, vector<16x8xbf16>, vector<8x16xf32> -> vector<8x16xf32>
    %cst_148 = arith.constant dense<0xFF800000> : vector<8xf32>
    %386 = vector.multi_reduction <maximumf>, %385, %cst_148 [1] : vector<8x16xf32> to vector<8xf32>
    %387 = vector.shape_cast %386 : vector<8xf32> to vector<8x1xf32>
    %388 = vector.broadcast %387 : vector<8x1xf32> to vector<8x16xf32>
    %389 = arith.subf %385, %388 : vector<8x16xf32>
    %390 = math.exp %389 : vector<8x16xf32>
    %cst_149 = arith.constant dense<0.000000e+00> : vector<8xf32>
    %391 = vector.multi_reduction <add>, %390, %cst_149 [1] : vector<8x16xf32> to vector<8xf32>
    %392 = vector.shape_cast %391 : vector<8xf32> to vector<8x1xf32>
    %393 = tpu.reciprocal %392 {approx = true} : vector<8x1xf32> -> vector<8x1xf32>
    %394 = vector.broadcast %393 : vector<8x1xf32> to vector<8x16xf32>
    %395 = arith.mulf %390, %394 : vector<8x16xf32>
    %396 = arith.truncf %395 : vector<8x16xf32> to vector<8x16xbf16>
    %397 = vector.extract_strided_slice %331 {offsets = [0, 24], sizes = [16, 8], strides = [1, 1]} : vector<16x32xbf16> to vector<16x8xbf16>
    %cst_150 = arith.constant dense<0.000000e+00> : vector<8x8xf32>
    %398 = tpu.matmul %396, %397, %cst_150 {dimension_numbers = #tpu.dot_dimension_numbers<[1], [0], [0], [1], [0, 0, 1, 1], [], []>} : vector<8x16xbf16>, vector<16x8xbf16>, vector<8x8xf32> -> vector<8x8xf32>
    %c8_151 = arith.constant 8 : index
    %c24_152 = arith.constant 24 : index
    %399 = vector.load %arg30[%c8_151, %c24_152] : memref<16x32xf32, #tpu.memory_space<vmem>>, vector<8x8xf32>
    tpu.vector_store %arg30[%c8_151, %c24_152], %398 {strides = array<i32>} : memref<16x32xf32, #tpu.memory_space<vmem>>, vector<8x8xf32>,
    %c0_153 = arith.constant 0 : index
    %c0_154 = arith.constant 0 : index
    %400 = vector.load %arg30[%c0_153, %c0_154] : memref<16x32xf32, #tpu.memory_space<vmem>>, vector<16x32xf32>
    %c0_155 = arith.constant 0 : index
    %c0_156 = arith.constant 0 : index
    %c0_157 = arith.constant 0 : index
    %401 = vector.load %arg20[%c0_155, %c0_156, %c0_157] : memref<1x32x32xbf16, #tpu.memory_space<vmem>>, vector<1x32x32xbf16>
    %402 = vector.shape_cast %401 : vector<1x32x32xbf16> to vector<32x32xbf16>
    %403 = arith.truncf %400 : vector<16x32xf32> to vector<16x32xbf16>
    %cst_158 = arith.constant dense<0.000000e+00> : vector<16x32xf32>
    %404 = tpu.matmul %403, %402, %cst_158 {dimension_numbers = #tpu.dot_dimension_numbers<[1], [0], [0], [1], [0, 0, 1, 1], [], []>} : vector<16x32xbf16>, vector<32x32xbf16>, vector<16x32xf32> -> vector<16x32xf32>
    %405 = arith.addf %208, %404 : vector<16x32xf32>
    %c0_159 = arith.constant 0 : index
    %c0_160 = arith.constant 0 : index
    %c0_161 = arith.constant 0 : index
    %406 = vector.load %arg21[%c0_159, %c0_160, %c0_161] : memref<1x1x32xf32, #tpu.memory_space<vmem>>, vector<1x1x32xf32>
    %407 = vector.shape_cast %406 : vector<1x1x32xf32> to vector<1x32xf32>
    %408 = vector.broadcast %407 : vector<1x32xf32> to vector<16x32xf32>
    %409 = arith.addf %405, %408 : vector<16x32xf32>
    %c0_162 = arith.constant 0 : index
    %c0_163 = arith.constant 0 : index
    %c0_164 = arith.constant 0 : index
    %410 = vector.load %arg10[%c0_162, %c0_163, %c0_164] : memref<1x1x32xf32, #tpu.memory_space<vmem>>, vector<1x1x32xf32>
    %411 = vector.shape_cast %410 : vector<1x1x32xf32> to vector<1x32xf32>
    %c0_165 = arith.constant 0 : index
    %c0_166 = arith.constant 0 : index
    %c0_167 = arith.constant 0 : index
    %412 = vector.load %arg11[%c0_165, %c0_166, %c0_167] : memref<1x1x32xf32, #tpu.memory_space<vmem>>, vector<1x1x32xf32>
    %413 = vector.shape_cast %412 : vector<1x1x32xf32> to vector<1x32xf32>
    %cst_168 = arith.constant dense<0.000000e+00> : vector<16xf32>
    %414 = vector.multi_reduction <add>, %409, %cst_168 [1] : vector<16x32xf32> to vector<16xf32>
    %415 = vector.shape_cast %414 : vector<16xf32> to vector<16x1xf32>
    %cst_169 = arith.constant 3.200000e+01 : f32
    %416 = vector.broadcast %cst_169 : f32 to vector<16x1xf32>
    %417 = arith.divf %415, %416 : vector<16x1xf32>
    %418 = vector.broadcast %417 : vector<16x1xf32> to vector<16x32xf32>
    %419 = arith.subf %409, %418 : vector<16x32xf32>
    %420 = arith.mulf %419, %419 : vector<16x32xf32>
    %cst_170 = arith.constant dense<0.000000e+00> : vector<16xf32>
    %421 = vector.multi_reduction <add>, %420, %cst_170 [1] : vector<16x32xf32> to vector<16xf32>
    %422 = vector.shape_cast %421 : vector<16xf32> to vector<16x1xf32>
    %cst_171 = arith.constant 3.200000e+01 : f32
    %423 = vector.broadcast %cst_171 : f32 to vector<16x1xf32>
    %424 = arith.divf %422, %423 : vector<16x1xf32>
    %425 = vector.broadcast %417 : vector<16x1xf32> to vector<16x32xf32>
    %426 = arith.subf %409, %425 : vector<16x32xf32>
    %cst_172 = arith.constant 9.99999974E-6 : f32
    %427 = vector.broadcast %cst_172 : f32 to vector<16x1xf32>
    %428 = arith.addf %424, %427 : vector<16x1xf32>
    %429 = math.rsqrt %428 : vector<16x1xf32>
    %430 = vector.broadcast %429 : vector<16x1xf32> to vector<16x32xf32>
    %431 = arith.mulf %426, %430 : vector<16x32xf32>
    %432 = vector.broadcast %411 : vector<1x32xf32> to vector<16x32xf32>
    %433 = arith.mulf %431, %432 : vector<16x32xf32>
    %434 = vector.broadcast %413 : vector<1x32xf32> to vector<16x32xf32>
    %435 = arith.addf %433, %434 : vector<16x32xf32>
    %c0_173 = arith.constant 0 : index
    %c0_174 = arith.constant 0 : index
    %c0_175 = arith.constant 0 : index
    %436 = vector.load %arg22[%c0_173, %c0_174, %c0_175] : memref<1x32x64xbf16, #tpu.memory_space<vmem>>, vector<1x32x64xbf16>
    %437 = vector.shape_cast %436 : vector<1x32x64xbf16> to vector<32x64xbf16>
    %438 = arith.truncf %435 : vector<16x32xf32> to vector<16x32xbf16>
    %cst_176 = arith.constant dense<0.000000e+00> : vector<16x64xf32>
    %439 = tpu.matmul %438, %437, %cst_176 {dimension_numbers = #tpu.dot_dimension_numbers<[1], [0], [0], [1], [0, 0, 1, 1], [], []>} : vector<16x32xbf16>, vector<32x64xbf16>, vector<16x64xf32> -> vector<16x64xf32>
    %c0_177 = arith.constant 0 : index
    %c0_178 = arith.constant 0 : index
    %c0_179 = arith.constant 0 : index
    %440 = vector.load %arg23[%c0_177, %c0_178, %c0_179] : memref<1x1x64xf32, #tpu.memory_space<vmem>>, vector<1x1x64xf32>
    %441 = vector.shape_cast %440 : vector<1x1x64xf32> to vector<1x64xf32>
    %442 = vector.broadcast %441 : vector<1x64xf32> to vector<16x64xf32>
    %443 = arith.addf %439, %442 : vector<16x64xf32>
    %cst_180 = arith.constant 0.000000e+00 : f32
    %444 = vector.broadcast %cst_180 : f32 to vector<16x64xf32>
    %445 = arith.maximumf %443, %444 : vector<16x64xf32>
    %c0_181 = arith.constant 0 : index
    %c0_182 = arith.constant 0 : index
    %c0_183 = arith.constant 0 : index
    %446 = vector.load %arg24[%c0_181, %c0_182, %c0_183] : memref<1x64x32xbf16, #tpu.memory_space<vmem>>, vector<1x64x32xbf16>
    %447 = vector.shape_cast %446 : vector<1x64x32xbf16> to vector<64x32xbf16>
    %448 = arith.truncf %445 : vector<16x64xf32> to vector<16x64xbf16>
    %cst_184 = arith.constant dense<0.000000e+00> : vector<16x32xf32>
    %449 = tpu.matmul %448, %447, %cst_184 {dimension_numbers = #tpu.dot_dimension_numbers<[1], [0], [0], [1], [0, 0, 1, 1], [], []>} : vector<16x64xbf16>, vector<64x32xbf16>, vector<16x32xf32> -> vector<16x32xf32>
    %450 = arith.addf %409, %449 : vector<16x32xf32>
    %c0_185 = arith.constant 0 : index
    %c0_186 = arith.constant 0 : index
    %c0_187 = arith.constant 0 : index
    %451 = vector.load %arg25[%c0_185, %c0_186, %c0_187] : memref<1x1x32xf32, #tpu.memory_space<vmem>>, vector<1x1x32xf32>
    %452 = vector.shape_cast %451 : vector<1x1x32xf32> to vector<1x32xf32>
    %453 = vector.broadcast %452 : vector<1x32xf32> to vector<16x32xf32>
    %454 = arith.addf %450, %453 : vector<16x32xf32>
    %c0_188 = arith.constant 0 : index
    %c0_189 = arith.constant 0 : index
    %455 = vector.load %arg29[%c0_188, %c0_189] : memref<16x32xf32, #tpu.memory_space<vmem>>, vector<16x32xf32>
    tpu.vector_store %arg29[%c0_188, %c0_189], %454 {strides = array<i32>} : memref<16x32xf32, #tpu.memory_space<vmem>>, vector<16x32xf32>,
    %c1_i32 = arith.constant 1 : i32
    %456 = arith.cmpi eq, %arg1, %c1_i32 : i32
    %457 = arith.extui %456 : i1 to i32
    %c0_i32_190 = arith.constant 0 : i32
    %458 = arith.cmpi ne, %457, %c0_i32_190 : i32
    scf.if %458 {
      %c0_191 = arith.constant 0 : index
      %c0_192 = arith.constant 0 : index
      %459 = vector.load %arg26[%c0_191, %c0_192] : memref<1x32xf32, #tpu.memory_space<vmem>>, vector<1x32xf32>
      %c0_193 = arith.constant 0 : index
      %c0_194 = arith.constant 0 : index
      %460 = vector.load %arg27[%c0_193, %c0_194] : memref<1x32xf32, #tpu.memory_space<vmem>>, vector<1x32xf32>
      %cst_195 = arith.constant dense<0.000000e+00> : vector<16xf32>
      %461 = vector.multi_reduction <add>, %454, %cst_195 [1] : vector<16x32xf32> to vector<16xf32>
      %462 = vector.shape_cast %461 : vector<16xf32> to vector<16x1xf32>
      %cst_196 = arith.constant 3.200000e+01 : f32
      %463 = vector.broadcast %cst_196 : f32 to vector<16x1xf32>
      %464 = arith.divf %462, %463 : vector<16x1xf32>
      %465 = vector.broadcast %464 : vector<16x1xf32> to vector<16x32xf32>
      %466 = arith.subf %454, %465 : vector<16x32xf32>
      %467 = arith.mulf %466, %466 : vector<16x32xf32>
      %cst_197 = arith.constant dense<0.000000e+00> : vector<16xf32>
      %468 = vector.multi_reduction <add>, %467, %cst_197 [1] : vector<16x32xf32> to vector<16xf32>
      %469 = vector.shape_cast %468 : vector<16xf32> to vector<16x1xf32>
      %cst_198 = arith.constant 3.200000e+01 : f32
      %470 = vector.broadcast %cst_198 : f32 to vector<16x1xf32>
      %471 = arith.divf %469, %470 : vector<16x1xf32>
      %472 = vector.broadcast %464 : vector<16x1xf32> to vector<16x32xf32>
      %473 = arith.subf %454, %472 : vector<16x32xf32>
      %cst_199 = arith.constant 9.99999974E-6 : f32
      %474 = vector.broadcast %cst_199 : f32 to vector<16x1xf32>
      %475 = arith.addf %471, %474 : vector<16x1xf32>
      %476 = math.rsqrt %475 : vector<16x1xf32>
      %477 = vector.broadcast %476 : vector<16x1xf32> to vector<16x32xf32>
      %478 = arith.mulf %473, %477 : vector<16x32xf32>
      %479 = vector.broadcast %459 : vector<1x32xf32> to vector<16x32xf32>
      %480 = arith.mulf %478, %479 : vector<16x32xf32>
      %481 = vector.broadcast %460 : vector<1x32xf32> to vector<16x32xf32>
      %482 = arith.addf %480, %481 : vector<16x32xf32>
      %483 = vector.shape_cast %482 : vector<16x32xf32> to vector<2x8x32xf32>
      %c0_200 = arith.constant 0 : index
      %c0_201 = arith.constant 0 : index
      %c0_202 = arith.constant 0 : index
      %484 = vector.load %arg28[%c0_200, %c0_201, %c0_202] : memref<2x8x32xf32, #tpu.memory_space<vmem>>, vector<2x8x32xf32>
      tpu.vector_store %arg28[%c0_200, %c0_201, %c0_202], %483 {strides = array<i32>} : memref<2x8x32xf32, #tpu.memory_space<vmem>>, vector<2x8x32xf32>,
    } else {
    }
    return
  }
  func.func @transform_0(%arg0: i32, %arg1: i32) -> (i32, i32) {
    %c0_i32 = arith.constant 0 : i32
    %c0_i32_0 = arith.constant 0 : i32
    return %arg0, %c0_i32 : i32, i32
  }
  func.func @transform_1(%arg0: i32, %arg1: i32) -> (i32, i32, i32) {
    %c0_i32 = arith.constant 0 : i32
    %c0_i32_0 = arith.constant 0 : i32
    %c0_i32_1 = arith.constant 0 : i32
    return %arg0, %c0_i32, %c0_i32_0 : i32, i32, i32
  }
  func.func @transform_2(%arg0: i32, %arg1: i32) -> (i32, i32) {
    %c0_i32 = arith.constant 0 : i32
    %c0_i32_0 = arith.constant 0 : i32
    %c0_i32_1 = arith.constant 0 : i32
    return %c0_i32, %c0_i32_0 : i32, i32
  }
  func.func @transform_3(%arg0: i32, %arg1: i32) -> (i32, i32) {
    %c0_i32 = arith.constant 0 : i32
    %c0_i32_0 = arith.constant 0 : i32
    %c0_i32_1 = arith.constant 0 : i32
    return %c0_i32, %c0_i32_0 : i32, i32
  }
  func.func @transform_4(%arg0: i32, %arg1: i32) -> (i32, i32, i32) {
    %c0_i32 = arith.constant 0 : i32
    %c0_i32_0 = arith.constant 0 : i32
    %c0_i32_1 = arith.constant 0 : i32
    return %arg1, %c0_i32, %c0_i32_0 : i32, i32, i32
  }
  func.func @transform_5(%arg0: i32, %arg1: i32) -> (i32, i32, i32) {
    %c0_i32 = arith.constant 0 : i32
    %c0_i32_0 = arith.constant 0 : i32
    %c0_i32_1 = arith.constant 0 : i32
    return %arg1, %c0_i32, %c0_i32_0 : i32, i32, i32
  }
  func.func @transform_6(%arg0: i32, %arg1: i32) -> (i32, i32, i32) {
    %c0_i32 = arith.constant 0 : i32
    %c0_i32_0 = arith.constant 0 : i32
    %c0_i32_1 = arith.constant 0 : i32
    return %arg1, %c0_i32, %c0_i32_0 : i32, i32, i32
  }
  func.func @transform_7(%arg0: i32, %arg1: i32) -> (i32, i32, i32) {
    %c0_i32 = arith.constant 0 : i32
    %c0_i32_0 = arith.constant 0 : i32
    %c0_i32_1 = arith.constant 0 : i32
    return %arg1, %c0_i32, %c0_i32_0 : i32, i32, i32
  }
  func.func @transform_8(%arg0: i32, %arg1: i32) -> (i32, i32, i32) {
    %c0_i32 = arith.constant 0 : i32
    %c0_i32_0 = arith.constant 0 : i32
    %c0_i32_1 = arith.constant 0 : i32
    return %arg1, %c0_i32, %c0_i32_0 : i32, i32, i32
  }
  func.func @transform_9(%arg0: i32, %arg1: i32) -> (i32, i32, i32) {
    %c0_i32 = arith.constant 0 : i32
    %c0_i32_0 = arith.constant 0 : i32
    %c0_i32_1 = arith.constant 0 : i32
    return %arg1, %c0_i32, %c0_i32_0 : i32, i32, i32
  }
  func.func @transform_10(%arg0: i32, %arg1: i32) -> (i32, i32, i32) {
    %c0_i32 = arith.constant 0 : i32
    %c0_i32_0 = arith.constant 0 : i32
    %c0_i32_1 = arith.constant 0 : i32
    return %arg1, %c0_i32, %c0_i32_0 : i32, i32, i32
  }
  func.func @transform_11(%arg0: i32, %arg1: i32) -> (i32, i32, i32) {
    %c0_i32 = arith.constant 0 : i32
    %c0_i32_0 = arith.constant 0 : i32
    %c0_i32_1 = arith.constant 0 : i32
    return %arg1, %c0_i32, %c0_i32_0 : i32, i32, i32
  }
  func.func @transform_12(%arg0: i32, %arg1: i32) -> (i32, i32, i32) {
    %c0_i32 = arith.constant 0 : i32
    %c0_i32_0 = arith.constant 0 : i32
    %c0_i32_1 = arith.constant 0 : i32
    return %arg1, %c0_i32, %c0_i32_0 : i32, i32, i32
  }
  func.func @transform_13(%arg0: i32, %arg1: i32) -> (i32, i32, i32) {
    %c0_i32 = arith.constant 0 : i32
    %c0_i32_0 = arith.constant 0 : i32
    %c0_i32_1 = arith.constant 0 : i32
    return %arg1, %c0_i32, %c0_i32_0 : i32, i32, i32
  }
  func.func @transform_14(%arg0: i32, %arg1: i32) -> (i32, i32, i32) {
    %c0_i32 = arith.constant 0 : i32
    %c0_i32_0 = arith.constant 0 : i32
    %c0_i32_1 = arith.constant 0 : i32
    return %arg1, %c0_i32, %c0_i32_0 : i32, i32, i32
  }
  func.func @transform_15(%arg0: i32, %arg1: i32) -> (i32, i32, i32) {
    %c0_i32 = arith.constant 0 : i32
    %c0_i32_0 = arith.constant 0 : i32
    %c0_i32_1 = arith.constant 0 : i32
    return %arg1, %c0_i32, %c0_i32_0 : i32, i32, i32
  }
  func.func @transform_16(%arg0: i32, %arg1: i32) -> (i32, i32, i32) {
    %c0_i32 = arith.constant 0 : i32
    %c0_i32_0 = arith.constant 0 : i32
    %c0_i32_1 = arith.constant 0 : i32
    return %arg1, %c0_i32, %c0_i32_0 : i32, i32, i32
  }
  func.func @transform_17(%arg0: i32, %arg1: i32) -> (i32, i32, i32) {
    %c0_i32 = arith.constant 0 : i32
    %c0_i32_0 = arith.constant 0 : i32
    %c0_i32_1 = arith.constant 0 : i32
    return %arg1, %c0_i32, %c0_i32_0 : i32, i32, i32
  }
  func.func @transform_18(%arg0: i32, %arg1: i32) -> (i32, i32, i32) {
    %c0_i32 = arith.constant 0 : i32
    %c0_i32_0 = arith.constant 0 : i32
    %c0_i32_1 = arith.constant 0 : i32
    return %arg1, %c0_i32, %c0_i32_0 : i32, i32, i32
  }
  func.func @transform_19(%arg0: i32, %arg1: i32) -> (i32, i32, i32) {
    %c0_i32 = arith.constant 0 : i32
    %c0_i32_0 = arith.constant 0 : i32
    %c0_i32_1 = arith.constant 0 : i32
    return %arg1, %c0_i32, %c0_i32_0 : i32, i32, i32
  }
  func.func @transform_20(%arg0: i32, %arg1: i32) -> (i32, i32, i32) {
    %c0_i32 = arith.constant 0 : i32
    %c0_i32_0 = arith.constant 0 : i32
    %c0_i32_1 = arith.constant 0 : i32
    return %arg1, %c0_i32, %c0_i32_0 : i32, i32, i32
  }
  func.func @transform_21(%arg0: i32, %arg1: i32) -> (i32, i32, i32) {
    %c0_i32 = arith.constant 0 : i32
    %c0_i32_0 = arith.constant 0 : i32
    %c0_i32_1 = arith.constant 0 : i32
    return %arg1, %c0_i32, %c0_i32_0 : i32, i32, i32
  }
  func.func @transform_22(%arg0: i32, %arg1: i32) -> (i32, i32, i32) {
    %c0_i32 = arith.constant 0 : i32
    %c0_i32_0 = arith.constant 0 : i32
    %c0_i32_1 = arith.constant 0 : i32
    return %arg1, %c0_i32, %c0_i32_0 : i32, i32, i32
  }
  func.func @transform_23(%arg0: i32, %arg1: i32) -> (i32, i32, i32) {
    %c0_i32 = arith.constant 0 : i32
    %c0_i32_0 = arith.constant 0 : i32
    %c0_i32_1 = arith.constant 0 : i32
    return %arg1, %c0_i32, %c0_i32_0 : i32, i32, i32
  }
  func.func @transform_24(%arg0: i32, %arg1: i32) -> (i32, i32) {
    %c0_i32 = arith.constant 0 : i32
    %c0_i32_0 = arith.constant 0 : i32
    %c0_i32_1 = arith.constant 0 : i32
    return %c0_i32, %c0_i32_0 : i32, i32
  }
  func.func @transform_25(%arg0: i32, %arg1: i32) -> (i32, i32) {
    %c0_i32 = arith.constant 0 : i32
    %c0_i32_0 = arith.constant 0 : i32
    %c0_i32_1 = arith.constant 0 : i32
    return %c0_i32, %c0_i32_0 : i32, i32
  }
  func.func @transform_26(%arg0: i32, %arg1: i32) -> (i32, i32, i32) {
    %c0_i32 = arith.constant 0 : i32
    %c0_i32_0 = arith.constant 0 : i32
    %c0_i32_1 = arith.constant 0 : i32
    return %arg0, %c0_i32, %c0_i32_0 : i32, i32, i32
  }
}

</mosaic_0001>

<bundles_post_ra>
// kernel: tpu_custom_call.1
= control target key start
LH: loop header
LB: loop body
LE: loop exit
PB: predicated region body
PF: predicated region fallthrough
CT: control target
= control target key end

     0   :  { %s5239_s0 = inlined_call_operand.vmem [shape: s32[16,1], index: 0, kind: input, shape index: {}]   ;;  %s5240_s1 = inlined_call_operand.vmem [shape: f32[2,16,32], index: 1, kind: input, shape index: {}]   ;;  %s5241_s2 = inlined_call_operand.hbm [shape: f32[10,32], index: 2, kind: input, shape index: {}]   ;;  %s5242_s3 = inlined_call_operand.hbm [shape: f32[8,32], index: 3, kind: input, shape index: {}]   ;;  %s5243_s4 = inlined_call_operand.vmem [shape: f32[2,1,32], index: 4, kind: input, shape index: {}]   ;;  %s5244_s5 = inlined_call_operand.vmem [shape: f32[2,1,32], index: 5, kind: input, shape index: {}]   ;;  %s5245_s6 = inlined_call_operand.vmem [shape: f32[2,1,32], index: 6, kind: input, shape index: {}]   ;;  %s5246_s7 = inlined_call_operand.hbm [shape: f32[2,1,32], index: 7, kind: input, shape index: {}]   ;;  %s5247_s8 = inlined_call_operand.hbm [shape: f32[2,1,32], index: 8, kind: input, shape index: {}]   ;;  %s5248_s9 = inlined_call_operand.hbm [shape: f32[2,1,32], index: 9, kind: input, shape index: {}]   ;;  %s5249_s10 = inlined_call_operand.vmem [shape: bf16[2,32,96], index: 10, kind: input, shape index: {}]   ;;  %s5250_s11 = inlined_call_operand.hbm [shape: f32[2,1,96], index: 11, kind: input, shape index: {}]   ;;  %s5251_s12 = inlined_call_operand.vmem [shape: bf16[2,32,32], index: 12, kind: input, shape index: {}]   ;;  %s5252_s13 = inlined_call_operand.hbm [shape: f32[2,1,32], index: 13, kind: input, shape index: {}]   ;;  %s5253_s14 = inlined_call_operand.hbm [shape: bf16[2,32,32], index: 14, kind: input, shape index: {}]   ;;  %s5254_s15 = inlined_call_operand.hbm [shape: f32[2,1,32], index: 15, kind: input, shape index: {}]   ;;  %s5255_s16 = inlined_call_operand.hbm [shape: bf16[2,32,64], index: 16, kind: input, shape index: {}]   ;;  %s5256_s17 = inlined_call_operand.hbm [shape: f32[2,1,64], index: 17, kind: input, shape index: {}]   ;;  %s5257_s18 = inlined_call_operand.hbm [shape: bf16[2,32,32], index: 18, kind: input, shape index: {}]   ;;  %s5258_s19 = inlined_call_operand.hbm [shape: f32[2,1,32], index: 19, kind: input, shape index: {}]   ;;  %s5259_s20 = inlined_call_operand.hbm [shape: bf16[2,32,64], index: 20, kind: input, shape index: {}]   ;;  %s5260_s21 = inlined_call_operand.hbm [shape: f32[2,1,64], index: 21, kind: input, shape index: {}]   ;;  %s5261_s22 = inlined_call_operand.vmem [shape: bf16[2,64,32], index: 22, kind: input, shape index: {}]   ;;  %s5262_s23 = inlined_call_operand.hbm [shape: f32[2,1,32], index: 23, kind: input, shape index: {}]   ;;  %s5263_s24 = inlined_call_operand.vmem [shape: f32[1,32], index: 24, kind: input, shape index: {}]   ;;  %s5264_s25 = inlined_call_operand.vmem [shape: f32[1,32], index: 25, kind: input, shape index: {}]   ;;  %s5265_s26 = inlined_call_operand.hbm [shape: f32[2,8,32], index: 26, kind: output, shape index: {}]  }
   0x1   :  { %5278 = sst [smem:[#allocation35_spill]] %s5239_s0 }
   0x2   :  { %5279 = sst [smem:[#allocation36_spill]] %s5240_s1 }
   0x3   :  { %5280 = sst [smem:[#allocation37_spill]] %s5241_s2 }
   0x4   :  { %5281 = sst [smem:[#allocation38_spill]] %s5242_s3 }
   0x5   :  { %5282 = sst [smem:[#allocation39_spill]] %s5243_s4 }
   0x6   :  { %5283 = sst [smem:[#allocation40_spill]] %s5244_s5 }
   0x7   :  { %5284 = sst [smem:[#allocation41_spill]] %s5245_s6 }
   0x8   :  { %5285 = sst [smem:[#allocation42_spill]] %s5246_s7 }
   0x9   :  { %5286 = sst [smem:[#allocation43_spill]] %s5247_s8 }
   0xa   :  { %5287 = sst [smem:[#allocation44_spill]] %s5248_s9 }
   0xb   :  { %5288 = sst [smem:[#allocation45_spill]] %s5249_s10 }
   0xc   :  { %5289 = sst [smem:[#allocation46_spill]] %s5250_s11 }
   0xd   :  { %5290 = sst [smem:[#allocation47_spill]] %s5251_s12 }
   0xe   :  { %5291 = sst [smem:[#allocation48_spill]] %s5252_s13 }
   0xf   :  { %5292 = sst [smem:[#allocation49_spill]] %s5253_s14 }
  0x10   :  { %5293 = sst [smem:[#allocation50_spill]] %s5254_s15 }
  0x11   :  { %5294 = sst [smem:[#allocation51_spill]] %s5255_s16 }
  0x12   :  { %5295 = sst [smem:[#allocation52_spill]] %s5256_s17 }
  0x13   :  { %5296 = sst [smem:[#allocation53_spill]] %s5257_s18 }
  0x14   :  { %5297 = sst [smem:[#allocation54_spill]] %s5258_s19 }
  0x15   :  { %5298 = sst [smem:[#allocation55_spill]] %s5261_s22 }
  0x16   :  { %5299 = sst [smem:[#allocation56_spill]] %s5263_s24 }
  0x17   :  { %5300 = sst [smem:[#allocation57_spill]] %s5264_s25 }
  0x18   :  { %5301 = sst [smem:[#allocation58_spill]] %s5265_s26 }
  0x19   :  { %31 = vsyncpa [#allocation6], 0 }
  0x1a   :  { %32 = vsyncpa [#allocation9], 0 }
  0x1b   :  { %33 = vsyncpa [#allocation7], 0  ;;  %s4546_s27 = smov 0   ;;  %s4548_s3 = smov 0  }
  0x1c   :  { %s4550_s7 = smov 0   ;;  %s4552_s28 = smov 0  }
  0x1d   :  { %s4554_s8 = smov 0   ;;  %s4556_s4 = smov 0  }
  0x1e LB: > { %5302 = sst [smem:[#allocation29_spill]] %s4372_s7  ;;  %s4575_s29 = sadd.s32 4294967295, %s4384_s4   ;;  %s4384_s4 = sphi %s4556_s4, %s39_s4   ;;  %s4380_s8 = sphi %s4554_s8, %s5362_s8   ;;  %s4376_s28 = sphi %s4552_s28, %s5361_s28   ;;  %s4372_s7 = sphi %s4550_s7, %s5357_s7   ;;  %s4368_s3 = sphi %s4548_s3, %s5360_s3   ;;  %s4364_s27 = sphi %s4546_s27, %s5359_s27  }
  0x1f   : > { %5303 = sst [smem:[#allocation30_spill]] %s4376_s28  ;;  %s48_s0 = sadd.s32 1, %s4380_s8 }
  0x20   : > { %5304 = sst [smem:[#allocation31_spill]] %s4384_s4  ;;  %p49_p0 = scmp.ge.s32.totalorder %s48_s0, 2 }
  0x21   : > { %s230_s9 = sadd.s32 1, %s4372_s7  ;;  %p237_p1 = scmp.ne.s32.totalorder %s4372_s7, %s4368_s3 }
  0x22   : > { %p238_p2 = scmp.eq.s32.totalorder %s4384_s4, 0  ;;  %s5364_s0 = smov (%p49_p0, %s48_s0), 0 }
  0x23   : > { %5305 = sst [smem:[#allocation32_spill]] %s5364_s0  ;;  %p243_p4 = scmp.ne.s32.totalorder %s4368_s3, %s4364_s27 }
  0x24   : > { %p4584_p3 = por %p238_p2, %p237_p1  ;;  %s227_s2 = ssub.s32 %s4380_s8, %s5364_s0 }
  0x25   : > { %p244_p5 = scmp.eq.s32.totalorder %s4575_s29, 0  ;;  %p228_p6 = scmp.eq.s32.totalorder %s227_s2, 0 }
  0x26   : > { %p3447_p7 = scmp.ge.s32.totalorder %s4384_s4, 1  ;;  %p738_p9 = scmp.lt.s32.totalorder %s4384_s4, 3 }
  0x27   : > { %p4595_p8 = por %p244_p5, %p243_p4  ;;  %s5311_s25 = sld [smem:[#allocation37_spill]] }
  0x28   : > { %s4601_s10 = scalar_select %p228_p6, %s4372_s7, %s230_s9  }
  0x29   : > { %s5307_s5 = scalar_select %p4595_p8, 1, 0 }
  0x2a   : > { %5309 = sst [smem:[#allocation34_spill]] %s4601_s10  ;;  %p4603_p10 = pnand %p3447_p7, %p738_p9 }
  0x2b   : > { %5308 = sst [smem:[#allocation33_spill]] %s5307_s5  ;;  %s4386_s2 = smov [#allocation5]  }
  0x2c   : > { %p3658_p11 = pneg %p4603_p10  ;;  %s770_s0 = sshll.u32 %s4386_s2, 4  ;;  %s771_s0 = int_to_ptr.vmem [resolvable:$true] %s770_s0 }
  0x2d   : > { %s768_s27 = sshll.u32 %s5311_s25, 4  ;;  %s5312_s10 = sld [smem:[#allocation38_spill]]  ;;  %s769_s27 = int_to_ptr.hbm [resolvable:$true] %s768_s27 }
  0x2e   : > { %p3659_p12 = pnand %p3658_p11, %p244_p5  ;;  %s4387_s12 = smov 128  }
  0x2f   : > { %s4388_s28 = smov 8   ;;  %s4389_s5 = smov [#allocation8]  }
  0x30   : > { %3661 = dma.hbm_to_vmem [thread:$0]  (!%p3659_p12), %s769_s27, 256, %s771_s0, [#allocation6], %s4387_s12, %s4387_s12, %s4388_s28  }
  0x31   : > { %s785_s26 = sshll.u32 %s4389_s5, 4  ;;  %p3452_p13 = scmp.ge.s32.totalorder %s4384_s4, 2  ;;  %s786_s26 = int_to_ptr.vmem [resolvable:$true] %s785_s26 }
  0x32   : > { %s820_s25 = sand.u32 (!%p3452_p13), 1, %s4384_s4   ;;  %s4620_s24 = sand.u32 (!%p3452_p13), 1, %s4372_s7  }
  0x33   : > { %s783_s22 = sshll.u32 %s5312_s10, 4  ;;  %798 = sbr.rel (%p3452_p13) target bundleno = 105 (0x69), region = 40  ;;  %s784_s22 = int_to_ptr.hbm [resolvable:$true] %s783_s22 }
  0x34   : > { %3664 = dma.hbm_to_vmem [thread:$0]  (!%p3659_p12), %s784_s22, 128, %s786_s26, [#allocation9]  }
  0x35   : > { %s5313_s12 = sld [smem:[#allocation42_spill]] (!%p3452_p13)  ;;  %s823_s22 = scalar_lea.vmem (!%p3452_p13), [#allocation10], %s4620_s24 }
  0x36   : > { %s830_s0 = sshll.u32 (!%p3452_p13), %s823_s22, 4  ;;  %s4627_s27 = scalar_lea.sflag (!%p3452_p13), [#allocation6], %s820_s25  ;;  %s831_s0 = int_to_ptr.vmem [resolvable:$true] %s830_s0 }
  0x37   : > { %s5314_s26 = sld [smem:[#allocation43_spill]] (!%p3452_p13)  ;;  %s840_s1 = scalar_lea.vmem (!%p3452_p13), [#allocation11], %s4620_s24 }
  0x38   : > { %s5315_s7 = sld [smem:[#allocation44_spill]]  ;;  %s4668_s9 = sshll.u32 %s4380_s8, 4 }
  0x39   : > { %s5316_s11 = sld [smem:[#allocation46_spill]]  ;;  %s5274_s25 = smov 64  }
  0x3a   : > { %s5317_s13 = sld [smem:[#allocation48_spill]] }
  0x3b   : > { %s826_s28 = scalar_lea.hbm %s5313_s12, %s4380_s8  ;;  %s847_s12 = sshll.u32 %s840_s1, 4  ;;  %s848_s12 = int_to_ptr.vmem [resolvable:$true] %s847_s12 }
  0x3c   : > { %s828_s5 = sshll.u32 %s826_s28, 4  ;;  %s882_s1 = scalar_lea.vmem [#allocation13], %s4620_s24  ;;  %s829_s5 = int_to_ptr.hbm [resolvable:$true] %s828_s5 }
  0x3d   : > { %3622 = dma.hbm_to_vmem [thread:$0]  (%p4584_p3), %s829_s5, 16, %s831_s0, %s4627_s27  }
  0x3e   : > { %s843_s10 = scalar_lea.hbm %s5314_s26, %s4380_s8  ;;  %s860_s0 = scalar_lea.hbm %s5315_s7, %s4380_s8 }
  0x3f   : > { %s845_s22 = sshll.u32 %s843_s10, 4  ;;  %s857_s5 = scalar_lea.vmem [#allocation12], %s4620_s24  ;;  %s846_s22 = int_to_ptr.hbm [resolvable:$true] %s845_s22 }
  0x40   : > { %3623 = dma.hbm_to_vmem [thread:$0]  (%p4584_p3), %s846_s22, 16, %s848_s12, %s4627_s27  }
  0x41   : > { %s864_s4 = sshll.u32 %s857_s5, 4  ;;  %s862_s2 = sshll.u32 %s860_s0, 4  ;;  %s865_s4 = int_to_ptr.vmem [resolvable:$true] %s864_s4  ;;  %s863_s2 = int_to_ptr.hbm [resolvable:$true] %s862_s2 }
  0x42   : > { %3624 = dma.hbm_to_vmem [thread:$0]  (%p4584_p3), %s863_s2, 16, %s865_s4, %s4627_s27  }
  0x43   : > { %s885_s10 = scalar_lea.hbm %s5316_s11, %s4380_s8  ;;  %s889_s12 = sshll.u32 %s882_s1, 4  ;;  %s890_s12 = int_to_ptr.vmem [resolvable:$true] %s889_s12 }
  0x44   : > { %s887_s22 = sshll.u32 %s885_s10, 4  ;;  %s910_s28 = scalar_lea.hbm %s5317_s13, %s4380_s8  ;;  %s888_s22 = int_to_ptr.hbm [resolvable:$true] %s887_s22 }
  0x45   : > { %3625 = dma.hbm_to_vmem [thread:$0]  (%p4584_p3), %s888_s22, 16, %s890_s12, %s4627_s27  }
  0x46   : > { %s907_s0 = scalar_lea.vmem [#allocation14], %s4620_s24  ;;  %s912_s5 = sshll.u32 %s910_s28, 4  ;;  %s913_s5 = int_to_ptr.hbm [resolvable:$true] %s912_s5 }
  0x47   : > { %s914_s4 = sshll.u32 %s907_s0, 4  ;;  %s4662_s2 = sshll.u32 %s4620_s24, 4  ;;  %s915_s4 = int_to_ptr.vmem [resolvable:$true] %s914_s4 }
  0x48   : > { %3626 = dma.hbm_to_vmem [thread:$0]  (%p4584_p3), %s913_s5, 16, %s915_s4, %s4627_s27  }
  0x49   : > { %s5318_s14 = sld [smem:[#allocation49_spill]]  ;;  %s925_s12 = scalar_lea.vmem [#allocation15], %s4662_s2 }
  0x4a   : > { %s933_s22 = sshll.u32 %s925_s12, 4  ;;  %s5276_s28 = smov 4   ;;  %s934_s22 = int_to_ptr.vmem [resolvable:$true] %s933_s22 }
  0x4b   : > { %s5319_s15 = sld [smem:[#allocation50_spill]]  ;;  %s946_s26 = scalar_lea.vmem [#allocation16], %s4620_s24 }
  0x4c   : > { %s953_s10 = sshll.u32 %s946_s26, 4  ;;  %s5320_s16 = sld [smem:[#allocation51_spill]]  ;;  %s954_s10 = int_to_ptr.vmem [resolvable:$true] %s953_s10 }
  0x4d   : > { %s5321_s4 = smov 64   ;;  %s5322_s17 = sld [smem:[#allocation52_spill]] }
  0x4e   : > { %s5323_s18 = sld [smem:[#allocation53_spill]]  ;;  %s5324_s26 = smov 4  }
  0x4f   : > { %s930_s1 = scalar_lea.hbm %s5318_s14, %s4668_s9  ;;  %s5325_s19 = sld [smem:[#allocation54_spill]] }
  0x50   : > { %s931_s7 = sshll.u32 %s930_s1, 4  ;;  %s932_s7 = int_to_ptr.hbm [resolvable:$true] %s931_s7 }
  0x51   : > { %3627 = dma.hbm_to_vmem [thread:$0]  (%p4584_p3), %s932_s7, 256, %s934_s22, %s4627_s27, %s5274_s25, %s5274_s25, %s5276_s28  }
  0x52   : > { %s949_s5 = scalar_lea.hbm %s5319_s15, %s4380_s8  ;;  %s969_s22 = scalar_lea.hbm %s5320_s16, %s4668_s9 }
  0x53   : > { %s951_s1 = sshll.u32 %s949_s5, 4  ;;  %s964_s7 = scalar_lea.vmem [#allocation17], %s4662_s2  ;;  %s952_s1 = int_to_ptr.hbm [resolvable:$true] %s951_s1 }
  0x54   : > { %3628 = dma.hbm_to_vmem [thread:$0]  (%p4584_p3), %s952_s1, 16, %s954_s10, %s4627_s27  }
  0x55   : > { %s972_s25 = sshll.u32 %s964_s7, 4  ;;  %s970_s0 = sshll.u32 %s969_s22, 4  ;;  %s973_s25 = int_to_ptr.vmem [resolvable:$true] %s972_s25  ;;  %s971_s0 = int_to_ptr.hbm [resolvable:$true] %s970_s0 }
  0x56   : > { %3629 = dma.hbm_to_vmem [thread:$0]  (%p4584_p3), %s971_s0, 256, %s973_s25, %s4627_s27, %s5321_s4, %s5321_s4, %s5276_s28  }
  0x57   : > { %s988_s11 = scalar_lea.hbm %s5322_s17, %s4380_s8  ;;  %s985_s10 = scalar_lea.vmem [#allocation18], %s4620_s24 }
  0x58   : > { %s992_s1 = sshll.u32 %s985_s10, 4  ;;  %s990_s12 = sshll.u32 %s988_s11, 4  ;;  %s993_s1 = int_to_ptr.vmem [resolvable:$true] %s992_s1  ;;  %s991_s12 = int_to_ptr.hbm [resolvable:$true] %s990_s12 }
  0x59   : > { %3630 = dma.hbm_to_vmem [thread:$0]  (%p4584_p3), %s991_s12, 16, %s993_s1, %s4627_s27  }
  0x5a   : > { %s1008_s25 = scalar_lea.hbm %s5323_s18, %s4668_s9  ;;  %s1003_s0 = scalar_lea.vmem [#allocation19], %s4662_s2 }
  0x5b   : > { %s1011_s28 = sshll.u32 %s1003_s0, 4  ;;  %s1009_s5 = sshll.u32 %s1008_s25, 4  ;;  %s1012_s28 = int_to_ptr.vmem [resolvable:$true] %s1011_s28  ;;  %s1010_s5 = int_to_ptr.hbm [resolvable:$true] %s1009_s5 }
  0x5c   : > { %3631 = dma.hbm_to_vmem [thread:$0]  (%p4584_p3), %s1010_s5, 256, %s1012_s28, %s4627_s27, %s5321_s4, %s5321_s4, %s5324_s26  }
  0x5d   : > { %s1027_s1 = scalar_lea.hbm %s5325_s19, %s4380_s8  ;;  %s1024_s12 = scalar_lea.vmem [#allocation20], %s4620_s24 }
  0x5e   : > { %s1031_s22 = sshll.u32 %s1024_s12, 4  ;;  %s1029_s7 = sshll.u32 %s1027_s1, 4  ;;  %s1032_s22 = int_to_ptr.vmem [resolvable:$true] %s1031_s22  ;;  %s1030_s7 = int_to_ptr.hbm [resolvable:$true] %s1029_s7 }
  0x5f   : > { %3632 = dma.hbm_to_vmem [thread:$0]  (%p4584_p3), %s1030_s7, 16, %s1032_s22, %s4627_s27  }
  0x60   : > { %s1047_s28 = scalar_lea.hbm %s5259_s20, %s4668_s9  ;;  %s1042_s5 = scalar_lea.vmem [#allocation21], %s4662_s2 }
  0x61   : > { %s1050_s13 = sshll.u32 %s1042_s5, 4  ;;  %s1048_s11 = sshll.u32 %s1047_s28, 4  ;;  %s1051_s13 = int_to_ptr.vmem [resolvable:$true] %s1050_s13  ;;  %s1049_s11 = int_to_ptr.hbm [resolvable:$true] %s1048_s11 }
  0x62   : > { %3633 = dma.hbm_to_vmem [thread:$0]  (%p4584_p3), %s1049_s11, 256, %s1051_s13, %s4627_s27, %s5321_s4, %s5321_s4, %s5324_s26  }
  0x63   : > { %s1066_s12 = scalar_lea.hbm %s5260_s21, %s4380_s8  ;;  %s1063_s22 = scalar_lea.vmem [#allocation22], %s4620_s24 }
  0x64   : > { %s1070_s7 = sshll.u32 %s1063_s22, 4  ;;  %s1068_s25 = sshll.u32 %s1066_s12, 4  ;;  %s1071_s7 = int_to_ptr.vmem [resolvable:$true] %s1070_s7  ;;  %s1069_s25 = int_to_ptr.hbm [resolvable:$true] %s1068_s25 }
  0x65   : > { %3634 = dma.hbm_to_vmem [thread:$0]  (%p4584_p3), %s1069_s25, 16, %s1071_s7, %s4627_s27  }
  0x66   : > { %s1091_s0 = scalar_lea.hbm %s5262_s23, %s4380_s8  ;;  %s1088_s28 = scalar_lea.vmem [#allocation23], %s4620_s24 }
  0x67   : > { %s1095_s5 = sshll.u32 %s1088_s28, 4  ;;  %s1093_s14 = sshll.u32 %s1091_s0, 4  ;;  %s1096_s5 = int_to_ptr.vmem [resolvable:$true] %s1095_s5  ;;  %s1094_s14 = int_to_ptr.hbm [resolvable:$true] %s1093_s14 }
  0x68   : > { %3635 = dma.hbm_to_vmem [thread:$0]  (%p4584_p3), %s1094_s14, 16, %s1096_s5, %s4627_s27  }
  0x69 PF: > { %1104 = sbr.rel (%p4603_p10) target bundleno = 4294 (0x10c6), region = 124 }
  0x6e   : > { %4347 = dma.done.wait (%p244_p5), [#allocation6], 256  }
  0x6f   : > { %4349 = vsyncadd (%p244_p5), [#allocation6], 4294967040 }
  0x70   : > { %4351 = dma.done.wait (%p244_p5), [#allocation9], 128  }
  0x71   : > { %4353 = vsyncadd (%p244_p5), [#allocation9], 4294967168  ;;  %s1116_s14 = sand.u32 1, %s4575_s29   ;;  %s4766_s30 = sand.u32 1, %s4368_s3  }
  0x72   : > { %s1117_s6 = scalar_lea.sflag [#allocation6], %s1116_s14 }
  0x73   : > { %4355 = dma.done.wait (%p4595_p8), %s1117_s6, 1184  }
  0x74   : > { %4357 = vsyncadd (%p4595_p8), %s1117_s6, 4294966112  ;;  %s5327_s27 = sld [smem:[#allocation30_spill]]  ;;  %s4774_s4 = sshll.u32 %s4766_s30, 4 }
  0x75   : > { %s5331_s11 = sld [smem:[#allocation45_spill]]  ;;  %s1146_s15 = scalar_lea.vmem [#allocation13], %s4766_s30 }
  0x76   : > { %s5332_s12 = sld [smem:[#allocation47_spill]]  ;;  %s1155_s16 = scalar_lea.vmem [#allocation14], %s4766_s30 }
  0x77   : > { %s5333_s9 = sld [smem:[#allocation55_spill]]  ;;  %s1165_s14 = scalar_lea.vmem [#allocation15], %s4774_s4 }
  0x78   : > { %s1174_s6 = scalar_lea.vmem [#allocation16], %s4766_s30  ;;  %s1193_s17 = scalar_lea.vmem [#allocation18], %s4766_s30 }
  0x79   : > { %s1203_s18 = scalar_lea.vmem [#allocation19], %s4774_s4 }
  0x7a   : > { %p1408_p0 = scmp.lt.s32.totalorder %s5327_s27, 1  ;;  %p3478_p1 = scmp.ne.s32.totalorder %s5327_s27, 0 }
  0x7c   : > { %s4778_s26 = scalar_select %p1408_p0, %s5327_s27, 1 }
  0x7d   : > { %1437 = sbr.rel (%p3478_p1) target bundleno = 390 (0x186), region = 192 }
  0x7e   : > { %s3597_s13 = sshll.u32 %s4778_s26, 4  ;;  %s3599_s7 = sshll.u32 %s4778_s26, 5 }
  0x7f   : > { %s4796_s10 = scalar_lea.vmem %s5331_s11, %s3597_s13  ;;  %s4801_s22 = scalar_lea.vmem %s5332_s12, %s3597_s13 }
  0x80   : > { %s4807_s0 = scalar_lea.vmem %s5333_s9, %s3599_s7  ;;  %s1184_s11 = scalar_lea.vmem [#allocation17], %s4774_s4 }
  0x81   : > { %s5334_s7 = sld [smem:[#allocation35_spill]] (!%p3478_p1) }
  0x82   : > { %v1455_v1 = vld [vmem:[#allocation5 + $0x8] sm:$0x3]  ;;  %vm1463_vm0 = vcmask 1041408   ;;  %v1440_v2 = vlaneseq  ;;  %v4392_v3 = vmov 0   ;;  %vm1500_vm1 = vcmask 64512   ;;  %v1454_v9 = vld [vmem:[#allocation5] sm:$0xff] }
  0x83   : > { %3744 = vset.pattern.permute.xlu0 %v4392_v3  ;;  %3481 = vmatpush.msk.msra.mxu0 %vm1463_vm0, %v1455_v1  ;;  %v4393_v6 = vmov 0.0   ;;  %vm1456_vm3 = vcmask 80896   ;;  %v1490_v14 = vld [vmem:[#allocation8] sm:$0xff]  ;;  %vm1493_vm6 = vcmask 261120  }
  0x84   : > { %v1441_v4 = vand.u32 127, %v1440_v2  ;;  %v1497_v5 = vshrl.u32 %v1440_v2, 7  ;;  %3616 = vmatpush.msk.msra.mxu1 %vm1463_vm0, %v1455_v1 }
  0x85   : > { %1482 = vmatpush.msra.mxu0 %v1454_v9 }
  0x86   : > { %vm1498_vm2 = vcmp.gt.s32.totalorder %v1441_v4, %v1497_v5  ;;  %3617 = vmatpush.msra.mxu1 %v1454_v9 }
  0x87   : > { %s5335_s25 = smov %s5334_s7  ;;  %v1438_v0 = vld [vmem:[%s5334_s7] sm:$0xff]  ;;  %v1499_v7 = vsel %vm1498_vm2, -1e+30, %v4393_v6 }
  0x88   : > { %1443 = vperm.xlu0 %3744, %v1438_v0   ;;  %1501 = vst.msk [vmem:[#allocation4] sm:$0xff] %vm1500_vm1, %v1499_v7  ;;  %v1439_v8 = vld [vmem:[%s5335_s25 + $0x8] sm:$0xff] }
  0x90   : > { %1446 = vperm.xlu0 %3744, %v1439_v8  }
  0xfa   : > { %v1444_v10 = vpop.permute.xlu0 %1443 }
  0xfb   : > { %vm1448_vm4 = vcmp.eq.s32.totalorder %v1444_v10, %v1441_v4 }
  0xfc   : > { %v3479_v11 = vsel %vm1448_vm4, 1.0, %v4393_v6 }
  0xfd   : > { %3482 = vmatmul.msk.f32.vlgmr.msra.gmra.mxu0 %vm1456_vm3, %v3479_v11 }
 0x102   : > { %v1447_v12 = vpop.permute.xlu0 %1446 }
 0x103   : > { %vm1449_vm5 = vcmp.eq.s32.totalorder %v1447_v12, %v1441_v4 }
 0x104   : > { %v3480_v13 = vsel %vm1449_vm5, 1.0, %v4393_v6 }
 0x105   : > { %3483 = vmatmul.msk.f32.vlgmr.msra.gmra.mxu1 %vm1456_vm3, %v3480_v13 }
 0x17a   : > { %v1484_v15 = vpop.f32.mrf.mxu0 }
 0x17b   : > { %v1491_v16 = vadd.f32 %v1490_v14, %v1484_v15 }
 0x17d   : > { %1494 = vst.msk [vmem:[#allocation2] sm:$0xff] %vm1493_vm6, %v1491_v16 }
 0x182   : > { %v1487_v17 = vpop.f32.mrf.mxu1 }
 0x183   : > { %v1492_v18 = vadd.f32 %v1490_v14, %v1487_v17 }
 0x185   : > { %1495 = vst.msk [vmem:[#allocation2 + $0x8] sm:$0xff] %vm1493_vm6, %v1492_v18 }
 0x186 PF: > { %v4829_v19 = vld [vmem:[#allocation2] sm:$0xff]  ;;  %vm1511_vm7 = vcmask 261120   ;;  %v4394_v23 = vmov 32.0   ;;  %v3601_v40 = vld [vmem:[%s4796_s10 + $0x8] sm:$0xff]  ;;  %s5336_s2 = sld [smem:[#allocation39_spill]]  ;;  %s4399_s13 = smov 112  }
 0x187   : > { %v1512_v20 = vsel %vm1511_vm7, %v4829_v19, 0.0  ;;  %3758 = vrcp.f32 %v4394_v23  ;;  %1603 = vmatpush.bf16.msra.mxu0 %v3601_v40  ;;  %v3600_v42 = vld [vmem:[%s4796_s10] sm:$0xff]  ;;  %s5338_s12 = sld [smem:[#allocation40_spill]]  ;;  %s4398_s10 = smov 88   ;;  %vm1622_vm15 = vcmask 64512   ;;  %vm1659_vm0 = vcmask 1043456  }
 0x188   : > { %1513 = vadd.xlane.f32.xlu0 %v1512_v20  ;;  %v3747_v7 = vld [vmem:[%s1146_s15] ss:$0 sm:$0xff]  ;;  %s4397_s15 = smov 120   ;;  %s4402_s27 = smov 64   ;;  %vm1740_vm1 = vcmask 130112   ;;  %vm1802_vm2 = vcmask 195712  }
 0x189   : > { %s4403_s9 = smov 56   ;;  %s4404_s5 = smov 48   ;;  %vm1864_vm3 = vcmask 261312  }
 0x18a   : > { %s4405_s28 = smov 40  }
 0x18b   : > { %1604 = vmatpush.bf16.msra.mxu0 %v3600_v42 }
 0x18c   : > { %v4833_v21 = vld [vmem:[#allocation2 + $0x8] sm:$0xff]  ;;  %s5337_s7 = scalar_lea.vmem %s5336_s2, %s4778_s26  ;;  %s4400_s2 = smov 80  }
 0x18d   : > { %v1515_v22 = vsel %vm1511_vm7, %v4833_v21, 0.0  ;;  %v3759_v24 = vpop.eup %3758  ;;  %v3745_v61 = vld [vmem:[%s5337_s7] ss:$0 sm:$0xff]  ;;  %s5339_s1 = scalar_lea.vmem %s5338_s12, %s4778_s26  ;;  %s4396_s12 = smov 96  }
 0x18e   : > { %v1519_v25 = vmul.f32 32.0, %v3759_v24  ;;  %vm1523_vm8 = vweird.f32 %v3759_v24  ;;  %v3746_v2 = vld [vmem:[%s5339_s1] ss:$0 sm:$0xff]  ;;  %s4395_s1 = smov 72   ;;  %s4401_s7 = smov 104  }
 0x190   : > { %1516 = vadd.xlane.f32.xlu0 %v1515_v22  ;;  %v1520_v26 = vsub.f32 1.0, %v1519_v25 }
 0x192   : > { %v1521_v27 = vmul.f32 %v3759_v24, %v1520_v26 }
 0x194   : > { %v1522_v28 = vadd.f32 %v3759_v24, %v1521_v27 }
 0x196   : > { %v4837_v29 = vsel %vm1523_vm8, %v3759_v24, %v1522_v28 }
 0x1fb   : > { %v1514_v30 = vpop.xlane.xlu0 %1513 }
 0x1fc   : > { %v1525_v31 = vmul.f32 %v4837_v29, %v1514_v30 }
 0x1fe   : > { %v1527_v32 = vsub.f32 %v4829_v19, %v1525_v31 }
 0x200   : > { %v1529_v33 = vmul.f32 %v1527_v32, %v1527_v32 }
 0x202   : > { %v1531_v34 = vsel %vm1511_vm7, %v1529_v33, 0.0 }
 0x203   : > { %1532 = vadd.xlane.f32.xlu1 %v1531_v34  ;;  %v1517_v35 = vpop.xlane.xlu0 %1516 }
 0x204   : > { %v1526_v36 = vmul.f32 %v4837_v29, %v1517_v35 }
 0x206   : > { %v1528_v37 = vsub.f32 %v4833_v21, %v1526_v36 }
 0x208   : > { %v1530_v38 = vmul.f32 %v1528_v37, %v1528_v37 }
 0x20a   : > { %v1534_v39 = vsel %vm1511_vm7, %v1530_v38, 0.0 }
 0x20b   : > { %1535 = vadd.xlane.f32.xlu1 %v1534_v39 }
 0x276   : > { %v1533_v41 = vpop.xlane.xlu1 %1532 }
 0x277   : > { %v1537_v43 = vmul.f32 %v1533_v41, %v4837_v29 }
 0x279   : > { %v1539_v44 = vadd.f32 1e-05, %v1537_v43 }
 0x27b   : > { %3760 = vrsqrt.f32 %v1539_v44  ;;  %vm1547_vm10 = vweird.f32 %v1539_v44 }
 0x27e   : > { %v1536_v45 = vpop.xlane.xlu1 %1535 }
 0x27f   : > { %v1538_v46 = vmul.f32 %v1536_v45, %v4837_v29 }
 0x281   : > { %v3761_v47 = vpop.eup %3760  ;;  %v1540_v48 = vadd.f32 1e-05, %v1538_v46 }
 0x282   : > { %v1542_v49 = vmul.f32 %v3761_v47, %v1539_v44  ;;  %vm1548_vm9 = vweird.f32 %v3761_v47 }
 0x283   : > { %3762 = vrsqrt.f32 %v1540_v48  ;;  %vm1549_vm11 = vmor %vm1547_vm10, %vm1548_vm9  ;;  %vm1557_vm13 = vweird.f32 %v1540_v48 }
 0x284   : > { %v1543_v50 = vmul.f32 %v3761_v47, %v1542_v49 }
 0x286   : > { %v1544_v51 = vmul.f32 0.5, %v1543_v50 }
 0x288   : > { %v1545_v52 = vsub.f32 1.5, %v1544_v51  ;;  %v1504_v51 = vld [vmem:[#allocation4] sm:$0xff] }
 0x289   : > { %v3763_v53 = vpop.eup %3762 }
 0x28a   : > { %v1546_v54 = vmul.f32 %v3761_v47, %v1545_v52  ;;  %v1552_v55 = vmul.f32 %v3763_v53, %v1540_v48  ;;  %vm1558_vm12 = vweird.f32 %v3763_v53 }
 0x28b   : > { %vm1559_vm14 = vmor %vm1557_vm13, %vm1558_vm12 }
 0x28c   : > { %v1553_v56 = vmul.f32 %v3763_v53, %v1552_v55  ;;  %v1550_v57 = vsel %vm1549_vm11, %v3761_v47, %v1546_v54  ;;  %vm2327_vm11 = vcmask 130048  }
 0x28d   : > { %v1561_v60 = vmul.f32 %v1550_v57, %v1527_v32 }
 0x28e   : > { %v1554_v58 = vmul.f32 0.5, %v1553_v56 }
 0x28f   : > { %v1566_v1 = vmul.f32 %v3745_v61, %v1561_v60 }
 0x290   : > { %v1555_v59 = vsub.f32 1.5, %v1554_v58 }
 0x291   : > { %v1571_v4 = vadd.f32 %v3746_v2, %v1566_v1 }
 0x292   : > { %v1556_v62 = vmul.f32 %v3763_v53, %v1555_v59 }
 0x294   : > { %v1560_v63 = vsel %vm1559_vm14, %v3763_v53, %v1556_v62 }
 0x295   : > { %v1562_v0 = vmul.f32 %v1560_v63, %v1528_v37 }
 0x297   : > { %v1567_v3 = vmul.f32 %v3745_v61, %v1562_v0 }
 0x299   : > { %v1572_v5 = vadd.f32 %v3746_v2, %v1567_v3 }
 0x29b   : > { %v1577_v6 = vpack.c.bf16 %v1572_v5, %v1571_v4 }
 0x29d   : > { %3492 = vmatmul.msk.bf16.vlgmr.msra.gmra.mxu0 %vm1511_vm7, %v1577_v6 }
 0x31a   : > { %v1606_v8 = vpop.f32.mrf.mxu0 }
 0x31b   : > { %v1607_v9 = vadd.f32 %v3747_v7, %v1606_v8 }
 0x31d   : > { %v1611_v10 = vmul.f32 0.35355338, %v1607_v9  ;;  %v1615_v11 = vpack.c.bf16 %v1607_v9, %v1607_v9 }
 0x31f   : > { %v1613_v12 = vpack.c.bf16 %v1611_v10, %v1611_v10  ;;  %v1618_v13 = vunpack.c.l.b16 %v1615_v11 }
 0x321   : > { %v4862_v14 = vpack.c.b16 %v1618_v13, %v1618_v13  ;;  %v1678_v15 = vunpack.c.l.b16 %v1613_v12 }
 0x322   : > { %v1608_v16 = vpop.f32.mrf.mxu0 }
 0x323   : > { %v1609_v17 = vadd.f32 %v3747_v7, %v1608_v16  ;;  %1806 = vrot.lane.b32.xlu1 %v4862_v14, %s4395_s1  ;;  %1620 = vrot.lane.b32.xlu2 %v4862_v14, %s4396_s12  ;;  %v1679_v18 = vpack.c.b16 %v1678_v15, %v1678_v15 }
 0x325   : > { %v1616_v20 = vpack.c.bf16 %v1609_v17, %v1609_v17  ;;  %1680 = vrot.lane.b32.xlu0 %v1679_v18, %s4397_s15  ;;  %v1612_v24 = vmul.f32 0.35355338, %v1609_v17 }
 0x327   : > { %v1867_v22 = vunpack.c.l.b16 %v1616_v20  ;;  %v1614_v25 = vpack.c.bf16 %v1612_v24, %v1612_v24 }
 0x329   : > { %v4869_v23 = vpack.c.b16 %v1867_v22, %v1867_v22  ;;  %v1925_v26 = vunpack.c.l.b16 %v1614_v25 }
 0x32b   : > { %1869 = vrot.lane.b32.xlu1 %v4869_v23, %s4396_s12  ;;  %1682 = vrot.lane.b32.xlu2 %v4862_v14, %s4398_s10  ;;  %v1926_v27 = vpack.c.b16 %v1925_v26, %v1925_v26 }
 0x32d   : > { %1742 = vrot.lane.b32.xlu0 %v1679_v18, %s4399_s13 }
 0x333   : > { %1990 = vrot.lane.b32.xlu1 %v4869_v23, %s4400_s2  ;;  %1744 = vrot.lane.b32.xlu2 %v4862_v14, %s4400_s2 }
 0x335   : > { %2051 = vrot.lane.b32.xlu0 %v4869_v23, %s4395_s1 }
 0x33b   : > { %1804 = vrot.lane.b32.xlu2 %v1679_v18, %s4401_s7 }
 0x33d   : > { %1988 = vrot.lane.b32.xlu0 %v1926_v27, %s4399_s13 }
 0x343   : > { %1929 = vrot.lane.b32.xlu2 %v4869_v23, %s4398_s10 }
 0x34b   : > { %1927 = vrot.lane.b32.xlu2 %v1926_v27, %s4397_s15 }
 0x353   : > { %2049 = vrot.lane.b32.xlu2 %v1926_v27, %s4401_s7 }
 0x37d   : > { %v1621_v28 = vpop.permute.xlu2 %1620 }
 0x37e   : > { %v1627_v30 = vsel %vm1622_vm15, %v1621_v28, 0 }
 0x37f   : > { %1636 = vmatpush.bf16.xpose.msra.mxu1 %v1627_v30 }
 0x385   : > { %v1683_v31 = vpop.permute.xlu2 %1682 }
 0x386   : > { %3493 = vmatmul.msk.bf16.vlgmr.msra.gmra.mxu1 %vm1622_vm15, %v1613_v12  ;;  %v1688_v32 = vsel %vm1622_vm15, %v1683_v31, 0 }
 0x387   : > { %1697 = vmatpush.bf16.xpose.msra.mxu3 %v1688_v32 }
 0x38d   : > { %v1745_v33 = vpop.permute.xlu2 %1744 }
 0x38e   : > { %v1750_v34 = vsel %vm1622_vm15, %v1745_v33, 0 }
 0x38f   : > { %1759 = vmatpush.bf16.xpose.msrb.mxu0 %v1750_v34 }
 0x395   : > { %v1807_v35 = vpop.permute.xlu1 %1806  ;;  %v1805_v36 = vpop.permute.xlu2 %1804 }
 0x396   : > { %v1812_v37 = vsel %vm1622_vm15, %v1807_v35, 0 }
 0x397   : > { %1821 = vmatpush.bf16.xpose.msrb.mxu3 %v1812_v37  ;;  %v1681_v38 = vpop.permute.xlu0 %1680 }
 0x398   : > { %3495 = vmatmul.msk.bf16.vlgmr.msra.gmra.mxu3 %vm1622_vm15, %v1681_v38 }
 0x39d   : > { %v1870_v39 = vpop.permute.xlu1 %1869  ;;  %v1930_v40 = vpop.permute.xlu2 %1929 }
 0x39e   : > { %v1875_v41 = vsel %vm1622_vm15, %v1870_v39, 0  ;;  %v1935_v42 = vsel %vm1622_vm15, %v1930_v40, 0 }
 0x39f   : > { %1884 = vmatpush.bf16.xpose.msra.mxu0 %v1875_v41  ;;  %1944 = vmatpush.bf16.xpose.msra.mxu3 %v1935_v42  ;;  %v1743_v43 = vpop.permute.xlu0 %1742 }
 0x3a0   : > { %3497 = vmatmul.msk.bf16.vlgmr.msrb.gmra.mxu0 %vm1622_vm15, %v1743_v43 }
 0x3a5   : > { %v1991_v44 = vpop.permute.xlu1 %1990  ;;  %v1928_v48 = vpop.permute.xlu2 %1927 }
 0x3a6   : > { %v1996_v45 = vsel %vm1622_vm15, %v1991_v44, 0 }
 0x3a7   : > { %2005 = vmatpush.bf16.xpose.msrb.mxu0 %v1996_v45  ;;  %v2052_v46 = vpop.permute.xlu0 %2051 }
 0x3a8   : > { %v2057_v47 = vsel %vm1622_vm15, %v2052_v46, 0  ;;  %3499 = vmatmul.msk.bf16.vlgmr.msrb.gmra.mxu3 %vm1622_vm15, %v1805_v36 }
 0x3a9   : > { %2066 = vmatpush.bf16.xpose.msrb.mxu3 %v2057_v47 }
 0x3ad   : > { %v2050_v50 = vpop.permute.xlu2 %2049 }
 0x3af   : > { %v1989_v49 = vpop.permute.xlu0 %1988 }
 0x3b0   : > { %3501 = vmatmul.msk.bf16.vlgmr.msra.gmra.mxu0 %vm1622_vm15, %v1614_v25 }
 0x3b8   : > { %3503 = vmatmul.msk.bf16.vlgmr.msra.gmra.mxu3 %vm1622_vm15, %v1928_v48 }
 0x3c0   : > { %3505 = vmatmul.msk.bf16.vlgmr.msrb.gmra.mxu0 %vm1622_vm15, %v1989_v49 }
 0x3c8   : > { %3507 = vmatmul.msk.bf16.vlgmr.msrb.gmra.mxu3 %vm1622_vm15, %v2050_v50 }
 0x403   : > { %v1638_v52 = vpop.f32.mrf.mxu1 }
 0x404   : > { %v1639_v53 = vadd.f32 %v1638_v52, %v1504_v51 }
 0x406   : > { %v1642_v54 = vsel %vm1622_vm15, %v1639_v53, -inf }
 0x407   : > { %1643 = vmax.xlane.f32.xlu2 %v1642_v54 }
 0x40b   : > { %v1640_v55 = vpop.f32.mrf.mxu1 }
 0x41b   : > { %v1699_v56 = vpop.f32.mrf.mxu3 }
 0x41c   : > { %v1700_v57 = vadd.f32 %v1699_v56, %v1504_v51 }
 0x41d   : > { %v1761_v58 = vpop.f32.mrf.mxu0 }
 0x41e   : > { %v1762_v59 = vadd.f32 %v1761_v58, %v1504_v51  ;;  %v1703_v60 = vsel %vm1622_vm15, %v1700_v57, -inf }
 0x41f   : > { %1704 = vmax.xlane.f32.xlu1 %v1703_v60 }
 0x420   : > { %v1765_v61 = vsel %vm1622_vm15, %v1762_v59, -inf }
 0x421   : > { %1766 = vmax.xlane.f32.xlu2 %v1765_v61 }
 0x423   : > { %v1701_v62 = vpop.f32.mrf.mxu3 }
 0x425   : > { %v1763_v63 = vpop.f32.mrf.mxu0 }
 0x42b   : > { %v1823_v0 = vpop.f32.mrf.mxu3 }
 0x42c   : > { %v4907_v1 = vadd.f32 %v1823_v0, %v1504_v51 }
 0x42d   : > { %v1886_v2 = vpop.f32.mrf.mxu0 }
 0x42e   : > { %v1827_v3 = vsel %vm1622_vm15, %v4907_v1, -inf  ;;  %v1887_v17 = vadd.f32 %v1886_v2, %v1504_v51 }
 0x42f   : > { %1828 = vmax.xlane.f32.xlu0 %v1827_v3 }
 0x430   : > { %v1890_v22 = vsel %vm1622_vm15, %v1887_v17, -inf }
 0x433   : > { %v1825_v4 = vpop.f32.mrf.mxu3 }
 0x435   : > { %v1888_v5 = vpop.f32.mrf.mxu0 }
 0x438   : > { %1654 = vrot.lane.b32.xlu1 %v4862_v14, %s4402_s27 }
 0x439   : > { %1715 = vrot.lane.b32.xlu2 %v4862_v14, %s4403_s9 }
 0x43b   : > { %v1946_v6 = vpop.f32.mrf.mxu3 }
 0x43c   : > { %v1947_v18 = vadd.f32 %v1946_v6, %v1504_v51 }
 0x43d   : > { %v2007_v7 = vpop.f32.mrf.mxu0 }
 0x43e   : > { %v2008_v8 = vadd.f32 %v2007_v7, %v1504_v51  ;;  %v1950_v20 = vsel %vm1622_vm15, %v1947_v18, -inf }
 0x440   : > { %v2011_v9 = vsel %vm1622_vm15, %v2008_v8, -inf }
 0x441   : > { %2012 = vmax.xlane.f32.xlu0 %v2011_v9 }
 0x443   : > { %v1948_v10 = vpop.f32.mrf.mxu3 }
 0x445   : > { %v2009_v11 = vpop.f32.mrf.mxu0 }
 0x44b   : > { %v2068_v12 = vpop.f32.mrf.mxu3 }
 0x44c   : > { %v4916_v13 = vadd.f32 %v2068_v12, %v1504_v51 }
 0x44e   : > { %v2072_v15 = vsel %vm1622_vm15, %v4916_v13, -inf }
 0x44f   : > { %2073 = vmax.xlane.f32.xlu0 %v2072_v15 }
 0x453   : > { %v2070_v16 = vpop.f32.mrf.mxu3 }
 0x462   : > { %1951 = vmax.xlane.f32.xlu1 %v1950_v20  ;;  %1891 = vmax.xlane.f32.xlu2 %v1890_v22 }
 0x47a   : > { %1777 = vrot.lane.b32.xlu2 %v4862_v14, %s4404_s5  ;;  %v1644_v24 = vpop.xlane.xlu2 %1643 }
 0x47b   : > { %v1645_v25 = vsub.f32 %v1639_v53, %v1644_v24 }
 0x47d   : > { %v1646_v26 = vmul.f32 1.442695, %v1645_v25 }
 0x47f   : > { %3764 = vpow2.f32 %v1646_v26 }
 0x485   : > { %v4924_v27 = vpop.eup %3764 }
 0x486   : > { %v1648_v28 = vsel %vm1622_vm15, %v4924_v27, 0.0 }
 0x487   : > { %1649 = vadd.xlane.f32.xlu0 %v1648_v28 }
 0x492   : > { %v1705_v30 = vpop.xlane.xlu1 %1704 }
 0x493   : > { %v1706_v31 = vsub.f32 %v1700_v57, %v1705_v30 }
 0x494   : > { %v1767_v32 = vpop.xlane.xlu2 %1766 }
 0x495   : > { %v1707_v33 = vmul.f32 1.442695, %v1706_v31  ;;  %v1768_v34 = vsub.f32 %v1762_v59, %v1767_v32 }
 0x497   : > { %v1769_v35 = vmul.f32 1.442695, %v1768_v34  ;;  %3766 = vpow2.f32 %v1707_v33 }
 0x499   : > { %3768 = vpow2.f32 %v1769_v35 }
 0x49b   : > { %1839 = vrot.lane.b32.xlu0 %v4862_v14, %s4405_s28 }
 0x49c   : > { %v1716_v40 = vpop.permute.xlu2 %1715 }
 0x49d   : > { %v4930_v36 = vpop.eup %3766  ;;  %v1721_v14 = vsel %vm1659_vm0, %v1716_v40, 0 }
 0x49e   : > { %v1709_v39 = vsel %vm1622_vm15, %v4930_v36, 0.0 }
 0x49f   : > { %v4932_v37 = vpop.eup %3768 }
 0x4a0   : > { %v1771_v38 = vsel %vm1622_vm15, %v4932_v37, 0.0 }
 0x4a1   : > { %1772 = vadd.xlane.f32.xlu1 %v1771_v38 }
 0x4a2   : > { %v1829_v43 = vpop.xlane.xlu0 %1828 }
 0x4a3   : > { %1710 = vadd.xlane.f32.xlu2 %v1709_v39  ;;  %v1830_v53 = vsub.f32 %v4907_v1, %v1829_v43 }
 0x4a5   : > { %v1831_v54 = vmul.f32 1.442695, %v1830_v53 }
 0x4aa   : > { %v1655_v41 = vpop.permute.xlu1 %1654 }
 0x4ab   : > { %v1661_v42 = vsel %vm1659_vm0, %v1655_v41, 0 }
 0x4ac   : > { %1670 = vmatpush.bf16.msra.mxu2 %v1661_v42 }
 0x4b0   : > { %1730 = vmatpush.bf16.msrb.mxu2 %v1721_v14 }
 0x4b4   : > { %v2013_v44 = vpop.xlane.xlu0 %2012 }
 0x4b5   : > { %v2014_v45 = vsub.f32 %v2008_v8, %v2013_v44 }
 0x4b7   : > { %v2015_v46 = vmul.f32 1.442695, %v2014_v45 }
 0x4b9   : > { %3770 = vpow2.f32 %v2015_v46 }
 0x4ba   : > { %1962 = vrot.lane.b32.xlu1 %v4869_v23, %s4403_s9  ;;  %s5340_s9 = sld [smem:[#allocation36_spill]] }
 0x4bb   : > { %1902 = vrot.lane.b32.xlu2 %v4869_v23, %s4402_s27  ;;  %s4408_s27 = smov 24  }
 0x4bf   : > { %v4946_v58 = vpop.eup %3770 }
 0x4c0   : > { %v2017_v0 = vsel %vm1622_vm15, %v4946_v58, 0.0 }
 0x4c2   : > { %v2074_v56 = vpop.xlane.xlu0 %2073 }
 0x4c3   : > { %v2075_v61 = vsub.f32 %v4916_v13, %v2074_v56 }
 0x4c5   : > { %v2076_v1 = vmul.f32 1.442695, %v2075_v61 }
 0x4d5   : > { %v1952_v47 = vpop.xlane.xlu1 %1951  ;;  %v1892_v48 = vpop.xlane.xlu2 %1891 }
 0x4d6   : > { %v1953_v49 = vsub.f32 %v1947_v18, %v1952_v47  ;;  %v1893_v50 = vsub.f32 %v1887_v17, %v1892_v48 }
 0x4d8   : > { %v1954_v51 = vmul.f32 1.442695, %v1953_v49  ;;  %v1894_v52 = vmul.f32 1.442695, %v1893_v50 }
 0x4da   : > { %3772 = vpow2.f32 %v1954_v51 }
 0x4db   : > { %3774 = vpow2.f32 %v1894_v52 }
 0x4dc   : > { %3776 = vpow2.f32 %v1831_v54 }
 0x4dd   : > { %v1778_v55 = vpop.permute.xlu2 %1777  ;;  %3778 = vpow2.f32 %v2076_v1 }
 0x4de   : > { %v1783_v57 = vsel %vm1659_vm0, %v1778_v55, 0 }
 0x4df   : > { %1792 = vmatpush.bf16.msrb.mxu1 %v1783_v57 }
 0x4e0   : > { %v4948_v59 = vpop.eup %3772 }
 0x4e1   : > { %v3775_v60 = vpop.eup %3774  ;;  %v1956_v63 = vsel %vm1622_vm15, %v4948_v59, 0.0 }
 0x4e2   : > { %v1896_v62 = vsel %vm1622_vm15, %v3775_v60, 0.0  ;;  %v3777_v2 = vpop.eup %3776 }
 0x4e3   : > { %1897 = vadd.xlane.f32.xlu0 %v1896_v62  ;;  %v1833_v3 = vsel %vm1622_vm15, %v3777_v2, 0.0  ;;  %v4957_v4 = vpop.eup %3778 }
 0x4e4   : > { %1957 = vadd.xlane.f32.xlu2 %v1956_v63  ;;  %2018 = vadd.xlane.f32.xlu1 %v2017_v0  ;;  %v2078_v5 = vsel %vm1622_vm15, %v4957_v4, 0.0 }
 0x4eb   : > { %1834 = vadd.xlane.f32.xlu0 %v1833_v3 }
 0x4f3   : > { %2079 = vadd.xlane.f32.xlu0 %v2078_v5  ;;  %v3603_v5 = vld [vmem:[%s4801_s22 + $0x8] sm:$0xff] }
 0x4f4   : > { %2138 = vmatpush.bf16.msra.mxu0 %v3603_v5 }
 0x4fa   : > { %v1650_v6 = vpop.xlane.xlu0 %1649 }
 0x4fb   : > { %3780 = vrcp.f32 %v1650_v6 }
 0x4fc   : > { %2023 = vrot.lane.b32.xlu2 %v4869_v23, %s4404_s5  ;;  %s4406_s5 = smov 16  }
 0x501   : > { %v3781_v7 = vpop.eup %3780 }
 0x502   : > { %v1652_v8 = vmul.f32 %v3781_v7, %v4924_v27 }
 0x504   : > { %v1653_v9 = vpack.c.bf16 %v1652_v8, %v1652_v8 }
 0x506   : > { %3494 = vmatmul.msk.bf16.vlgmr.msra.gmra.mxu2 %vm1622_vm15, %v1653_v9  ;;  %v3602_v9 = vld [vmem:[%s4801_s22] sm:$0xff]  ;;  %s5341_s22 = sld [smem:[#allocation41_spill]] }
 0x507   : > { %2084 = vrot.lane.b32.xlu0 %v4869_v23, %s4405_s28  ;;  %s4407_s28 = smov 8   ;;  %2139 = vmatpush.bf16.msra.mxu0 %v3602_v9 }
 0x50c   : > { %s5342_s19 = scalar_lea.vmem %s5341_s22, %s4778_s26  ;;  %s5344_s26 = scalar_lea.vmem [#allocation20], %s4766_s30 }
 0x50d   : > { %v1840_v10 = vpop.permute.xlu0 %1839  ;;  %v3749_v9 = vld [vmem:[%s5342_s19] ss:$0 sm:$0xff] }
 0x50e   : > { %v1845_v11 = vsel %vm1659_vm0, %v1840_v10, 0 }
 0x50f   : > { %1854 = vmatpush.bf16.msra.mxu2 %v1845_v11 }
 0x514   : > { %v1773_v12 = vpop.xlane.xlu1 %1772 }
 0x515   : > { %3782 = vrcp.f32 %v1773_v12 }
 0x516   : > { %v1711_v13 = vpop.xlane.xlu2 %1710 }
 0x517   : > { %3784 = vrcp.f32 %v1711_v13 }
 0x51b   : > { %v3783_v15 = vpop.eup %3782 }
 0x51c   : > { %v1775_v16 = vmul.f32 %v3783_v15, %v4932_v37  ;;  %v3748_v15 = vld [vmem:[%s1155_s16] ss:$0 sm:$0xff] }
 0x51d   : > { %v3785_v17 = vpop.eup %3784 }
 0x51e   : > { %v1713_v18 = vmul.f32 %v3785_v17, %v4930_v36  ;;  %v1903_v20 = vpop.permute.xlu2 %1902  ;;  %v1776_v22 = vpack.c.bf16 %v1775_v16, %v1775_v16 }
 0x51f   : > { %v1908_v24 = vsel %vm1659_vm0, %v1903_v20, 0 }
 0x520   : > { %3498 = vmatmul.msk.bf16.vlgmr.msrb.gmra.mxu1 %vm1622_vm15, %v1776_v22  ;;  %v1714_v23 = vpack.c.bf16 %v1713_v18, %v1713_v18 }
 0x521   : > { %1917 = vmatpush.bf16.msra.mxu1 %v1908_v24 }
 0x522   : > { %3496 = vmatmul.msk.bf16.vlgmr.msrb.gmra.mxu2 %vm1622_vm15, %v1714_v23 }
 0x52c   : > { %v1963_v25 = vpop.permute.xlu1 %1962 }
 0x52d   : > { %v1968_v26 = vsel %vm1659_vm0, %v1963_v25, 0 }
 0x52e   : > { %1977 = vmatpush.bf16.msrb.mxu2 %v1968_v26  ;;  %v3607_v26 = vld [vmem:[%s1184_s11 + $0x8] sm:$0xff] }
 0x52f   : > { %2282 = vmatpush.bf16.msra.mxu3 %v3607_v26  ;;  %v3752_v26 = vld [vmem:[%s1174_s6] ss:$0 sm:$0xff] }
 0x556   : > { %v1898_v27 = vpop.xlane.xlu0 %1897 }
 0x557   : > { %3786 = vrcp.f32 %v1898_v27  ;;  %v1958_v28 = vpop.xlane.xlu2 %1957  ;;  %v2019_v35 = vpop.xlane.xlu1 %2018  ;;  %v1505_v27 = vld [vmem:[%s5340_s9] sm:$0xff] }
 0x55d   : > { %v3787_v30 = vpop.eup %3786 }
 0x55e   : > { %v1900_v31 = vmul.f32 %v3787_v30, %v3775_v60  ;;  %v1835_v32 = vpop.xlane.xlu0 %1834 }
 0x55f   : > { %3788 = vrcp.f32 %v1835_v32  ;;  %v2024_v33 = vpop.permute.xlu2 %2023 }
 0x560   : > { %v1901_v34 = vpack.c.bf16 %v1900_v31, %v1900_v31  ;;  %v2029_v36 = vsel %vm1659_vm0, %v2024_v33, 0  ;;  %3790 = vrcp.f32 %v2019_v35 }
 0x561   : > { %2038 = vmatpush.bf16.msrb.mxu1 %v2029_v36  ;;  %3792 = vrcp.f32 %v1958_v28  ;;  %v1506_v28 = vld [vmem:[%s5340_s9 + $0x8] sm:$0xff] }
 0x562   : > { %3502 = vmatmul.msk.bf16.vlgmr.msra.gmra.mxu1 %vm1622_vm15, %v1901_v34 }
 0x565   : > { %v3789_v37 = vpop.eup %3788 }
 0x566   : > { %v1837_v38 = vmul.f32 %v3789_v37, %v3777_v2  ;;  %v3791_v40 = vpop.eup %3790  ;;  %v2080_v43 = vpop.xlane.xlu0 %2079 }
 0x567   : > { %v2021_v41 = vmul.f32 %v3791_v40, %v4946_v58  ;;  %v3793_v14 = vpop.eup %3792  ;;  %3794 = vrcp.f32 %v2080_v43  ;;  %v3605_v40 = vld [vmem:[%s1165_s14 + $0x8] sm:$0xff] }
 0x568   : > { %v1838_v39 = vpack.c.bf16 %v1837_v38, %v1837_v38  ;;  %v1960_v44 = vmul.f32 %v3793_v14, %v4948_v59  ;;  %2240 = vmatpush.bf16.msra.mxu1 %v3605_v40  ;;  %v1507_v14 = vld [vmem:[%s5340_s9 + $0x10] sm:$0xff]  ;;  %v1508_v43 = vld [vmem:[%s5340_s9 + $0x18] sm:$0xff] }
 0x569   : > { %v2022_v42 = vpack.c.bf16 %v2021_v41, %v2021_v41 }
 0x56a   : > { %3500 = vmatmul.msk.bf16.vlgmr.msra.gmra.mxu2 %vm1622_vm15, %v1838_v39  ;;  %v1961_v45 = vpack.c.bf16 %v1960_v44, %v1960_v44  ;;  %v2253_v44 = vpack.c.bf16 %v1508_v43, %v1507_v14 }
 0x56d   : > { %v3795_v48 = vpop.eup %3794 }
 0x56e   : > { %v2082_v49 = vmul.f32 %v3795_v48, %v4957_v4 }
 0x570   : > { %v2083_v50 = vpack.c.bf16 %v2082_v49, %v2082_v49 }
 0x572   : > { %3506 = vmatmul.msk.bf16.vlgmr.msrb.gmra.mxu1 %vm1622_vm15, %v2022_v42 }
 0x579   : > { %v2085_v46 = vpop.permute.xlu0 %2084 }
 0x57a   : > { %v2090_v47 = vsel %vm1659_vm0, %v2085_v46, 0  ;;  %3504 = vmatmul.msk.bf16.vlgmr.msrb.gmra.mxu2 %vm1622_vm15, %v1961_v45  ;;  %v3604_v46 = vld [vmem:[%s1165_s14] sm:$0xff] }
 0x57b   : > { %2099 = vmatpush.bf16.msra.mxu2 %v2090_v47  ;;  %2241 = vmatpush.bf16.msra.mxu1 %v3604_v46  ;;  %v3751_v47 = vld [vmem:[%s1193_s17] ss:$0 sm:$0xff] }
 0x589   : > { %v1672_v51 = vpop.f32.mrf.mxu2 }
 0x58a   : > { %1676 = vst.msk [vmem:[#allocation3] sm:$0xff] %vm1622_vm15, %v1672_v51  ;;  %3508 = vmatmul.msk.bf16.vlgmr.msra.gmra.mxu2 %vm1622_vm15, %v2083_v50 }
 0x591   : > { %v1674_v52 = vpop.f32.mrf.mxu2 }
 0x59d   : > { %v1794_v53 = vpop.f32.mrf.mxu1 }
 0x59e   : > { %1799 = vrot.lane.b32.xlu0 %v1794_v53, %s4406_s5 }
 0x5a5   : > { %v1732_v54 = vpop.f32.mrf.mxu2  ;;  %v1796_v55 = vpop.f32.mrf.mxu1 }
 0x5a6   : > { %1737 = vrot.lane.b32.xlu0 %v1732_v54, %s4407_s28 }
 0x5ad   : > { %v1734_v56 = vpop.f32.mrf.mxu2 }
 0x5df   : > { %v1919_v57 = vpop.f32.mrf.mxu1 }
 0x5e0   : > { %1923 = vst.msk [vmem:[#allocation3 + $0x8] sm:$0xff] %vm1622_vm15, %v1919_v57 }
 0x5e7   : > { %v1921_v58 = vpop.f32.mrf.mxu1 }
 0x5ed   : > { %v1856_v59 = vpop.f32.mrf.mxu2 }
 0x5ee   : > { %1861 = vrot.lane.b32.xlu0 %v1856_v59, %s4408_s27 }
 0x5ef   : > { %v2040_v60 = vpop.f32.mrf.mxu1 }
 0x5f5   : > { %v1858_v61 = vpop.f32.mrf.mxu2 }
 0x5f7   : > { %v2042_v62 = vpop.f32.mrf.mxu1 }
 0x5fd   : > { %v1979_v63 = vpop.f32.mrf.mxu2 }
 0x5fe   : > { %1984 = vrot.lane.b32.xlu2 %v1979_v63, %s4407_s28 }
 0x605   : > { %v1981_v0 = vpop.f32.mrf.mxu2 }
 0x606   : > { %2045 = vrot.lane.b32.xlu2 %v2040_v60, %s4406_s5 }
 0x60d   : > { %v2101_v1 = vpop.f32.mrf.mxu2 }
 0x60e   : > { %2106 = vrot.lane.b32.xlu1 %v2101_v1, %s4408_s27 }
 0x610   : > { %v1800_v2 = vpop.permute.xlu0 %1799 }
 0x615   : > { %v2103_v3 = vpop.f32.mrf.mxu2 }
 0x618   : > { %v1738_v4 = vpop.permute.xlu0 %1737 }
 0x619   : > { %1741 = vst.msk [vmem:[#allocation3] sm:$0xff] %vm1740_vm1, %v1738_v4 }
 0x61a   : > { %1803 = vst.msk [vmem:[#allocation3] sm:$0xff] %vm1802_vm2, %v1800_v2 }
 0x658   : > { %v1985_v6 = vpop.permute.xlu2 %1984 }
 0x659   : > { %1987 = vst.msk [vmem:[#allocation3 + $0x8] sm:$0xff] %vm1740_vm1, %v1985_v6 }
 0x660   : > { %v1862_v7 = vpop.permute.xlu0 %1861  ;;  %v2046_v8 = vpop.permute.xlu2 %2045 }
 0x661   : > { %1865 = vst.msk [vmem:[#allocation3] sm:$0xff] %vm1864_vm3, %v1862_v7 }
 0x662   : > { %2048 = vst.msk [vmem:[#allocation3 + $0x8] sm:$0xff] %vm1802_vm2, %v2046_v8 }
 0x668   : > { %v2110_v11 = vld [vmem:[#allocation3] sm:$0xff] }
 0x680   : > { %v2107_v10 = vpop.permute.xlu1 %2106 }
 0x681   : > { %2109 = vst.msk [vmem:[#allocation3 + $0x8] sm:$0xff] %vm1864_vm3, %v2107_v10 }
 0x688   : > { %v2111_v12 = vld [vmem:[#allocation3 + $0x8] sm:$0xff] }
 0x689   : > { %v2116_v13 = vpack.c.bf16 %v2111_v12, %v2110_v11 }
 0x68b   : > { %3517 = vmatmul.msk.bf16.vlgmr.msra.gmra.mxu0 %vm1511_vm7, %v2116_v13 }
 0x708   : > { %v2141_v16 = vpop.f32.mrf.mxu0 }
 0x709   : > { %v2146_v17 = vadd.f32 %v2141_v16, %v4829_v19  ;;  %v3606_v19 = vld [vmem:[%s1184_s11] sm:$0xff]  ;;  %s5343_s11 = scalar_lea.vmem [#allocation10], %s4766_s30 }
 0x70a   : > { %2283 = vmatpush.bf16.msra.mxu3 %v3606_v19  ;;  %v3750_v13 = vld [vmem:[%s5343_s11] ss:$0 sm:$0xff] }
 0x70b   : > { %v5004_v18 = vadd.f32 %v3748_v15, %v2146_v17 }
 0x70d   : > { %v2156_v20 = vsel %vm1511_vm7, %v5004_v18, 0.0 }
 0x70e   : > { %2157 = vadd.xlane.f32.xlu2 %v2156_v20 }
 0x710   : > { %v2143_v22 = vpop.f32.mrf.mxu0 }
 0x711   : > { %v2147_v24 = vadd.f32 %v2143_v22, %v4833_v21  ;;  %v2252_v21 = vpack.c.bf16 %v1506_v28, %v1505_v27 }
 0x713   : > { %v5009_v23 = vadd.f32 %v3748_v15, %v2147_v24  ;;  %3535 = vmatmul.msk.bf16.vlgmr.msra.gmra.mxu3 %vm1511_vm7, %v2252_v21 }
 0x715   : > { %v2159_v25 = vsel %vm1511_vm7, %v5009_v23, 0.0 }
 0x716   : > { %2160 = vadd.xlane.f32.xlu0 %v2159_v25 }
 0x723   : > { %3536 = vmatmul.msk.bf16.gmra.mxu3 %vm1511_vm7, %v2253_v44 }
 0x781   : > { %v2158_v30 = vpop.xlane.xlu2 %2157 }
 0x782   : > { %v2162_v31 = vmul.f32 %v2158_v30, %v4837_v29 }
 0x784   : > { %v2164_v32 = vsub.f32 %v5004_v18, %v2162_v31 }
 0x786   : > { %v2166_v33 = vmul.f32 %v2164_v32, %v2164_v32 }
 0x788   : > { %v2168_v34 = vsel %vm1511_vm7, %v2166_v33, 0.0 }
 0x789   : > { %2169 = vadd.xlane.f32.xlu1 %v2168_v34  ;;  %v2161_v35 = vpop.xlane.xlu0 %2160 }
 0x78a   : > { %v2163_v36 = vmul.f32 %v2161_v35, %v4837_v29 }
 0x78c   : > { %v2165_v37 = vsub.f32 %v5009_v23, %v2163_v36 }
 0x78e   : > { %v2167_v38 = vmul.f32 %v2165_v37, %v2165_v37 }
 0x790   : > { %v2171_v39 = vsel %vm1511_vm7, %v2167_v38, 0.0 }
 0x791   : > { %2172 = vadd.xlane.f32.xlu2 %v2171_v39 }
 0x796   : > { %v2285_v48 = vpop.f32.mrf.mxu3 }
 0x797   : > { %v2286_v51 = vadd.f32 %v3751_v47, %v2285_v48 }
 0x799   : > { %v2299_v56 = vpack.c.bf16 %v2286_v51, %v2286_v51 }
 0x79b   : > { %v2305_v61 = vunpack.c.l.b16 %v2299_v56 }
 0x79e   : > { %v2287_v57 = vpop.f32.mrf.mxu3 }
 0x79f   : > { %v2288_v59 = vadd.f32 %v3751_v47, %v2287_v57 }
 0x7a1   : > { %v2300_v62 = vpack.c.bf16 %v2288_v59, %v2288_v59 }
 0x7a3   : > { %v2306_v2 = vunpack.c.l.b16 %v2300_v62 }
 0x7a5   : > { %v5045_v4 = vpack.c.b16 %v2306_v2, %v2305_v61 }
 0x7a6   : > { %v2290_v25 = vpop.f32.mrf.mxu3 }
 0x7a7   : > { %2340 = vrot.lane.b32.xlu1 %v5045_v4, %s4396_s12  ;;  %v2312_v7 = vsel %vm1622_vm15, %v5045_v4, 0  ;;  %v2291_v30 = vadd.f32 %v3751_v47, %v2290_v25 }
 0x7a8   : > { %2321 = vmatpush.bf16.xpose.msrb.mxu2 %v2312_v7 }
 0x7a9   : > { %2365 = vrot.lane.b32.xlu2 %v5045_v4, %s4397_s15 }
 0x7ae   : > { %v2292_v27 = vpop.f32.mrf.mxu3 }
 0x7af   : > { %v2293_v31 = vadd.f32 %v3751_v47, %v2292_v27 }
 0x7b1   : > { %2483 = vrot.lane.b32.xlu2 %v5045_v4, %s4401_s7  ;;  %v2302_v38 = vpack.c.bf16 %v2293_v31, %v2293_v31 }
 0x7b3   : > { %v2543_v43 = vunpack.c.l.b16 %v2302_v38 }
 0x7fc   : > { %v2170_v41 = vpop.xlane.xlu1 %2169 }
 0x7fd   : > { %v2174_v42 = vmul.f32 %v2170_v41, %v4837_v29 }
 0x7ff   : > { %v2176_v45 = vadd.f32 1e-05, %v2174_v42 }
 0x801   : > { %3796 = vrsqrt.f32 %v2176_v45  ;;  %vm2184_vm5 = vweird.f32 %v2176_v45 }
 0x804   : > { %v2173_v49 = vpop.xlane.xlu2 %2172 }
 0x805   : > { %v2175_v50 = vmul.f32 %v2173_v49, %v4837_v29 }
 0x807   : > { %v3797_v52 = vpop.eup %3796  ;;  %v2177_v53 = vadd.f32 1e-05, %v2175_v50 }
 0x808   : > { %v2179_v54 = vmul.f32 %v3797_v52, %v2176_v45  ;;  %vm2185_vm4 = vweird.f32 %v3797_v52 }
 0x809   : > { %3798 = vrsqrt.f32 %v2177_v53  ;;  %vm2186_vm6 = vmor %vm2184_vm5, %vm2185_vm4  ;;  %vm2194_vm9 = vweird.f32 %v2177_v53 }
 0x80a   : > { %v2180_v55 = vmul.f32 %v3797_v52, %v2179_v54 }
 0x80c   : > { %v2181_v58 = vmul.f32 0.5, %v2180_v55 }
 0x80e   : > { %v2182_v60 = vsub.f32 1.5, %v2181_v58 }
 0x80f   : > { %v3799_v63 = vpop.eup %3798 }
 0x810   : > { %v2183_v0 = vmul.f32 %v3797_v52, %v2182_v60  ;;  %v2189_v1 = vmul.f32 %v3799_v63, %v2177_v53  ;;  %vm2195_vm8 = vweird.f32 %v3799_v63 }
 0x811   : > { %vm2196_vm10 = vmor %vm2194_vm9, %vm2195_vm8 }
 0x812   : > { %v2190_v3 = vmul.f32 %v3799_v63, %v2189_v1  ;;  %v2187_v5 = vsel %vm2186_vm6, %v3797_v52, %v2183_v0 }
 0x813   : > { %v2198_v10 = vmul.f32 %v2187_v5, %v2164_v32  ;;  %v2366_v32 = vpop.permute.xlu2 %2365 }
 0x814   : > { %v2191_v6 = vmul.f32 0.5, %v2190_v3  ;;  %v2371_v34 = vsel %vm1622_vm15, %v2366_v32, 0 }
 0x815   : > { %v2203_v15 = vmul.f32 %v3749_v9, %v2198_v10  ;;  %2380 = vmatpush.bf16.xpose.msrb.mxu1 %v2371_v34 }
 0x816   : > { %v2192_v8 = vsub.f32 1.5, %v2191_v6 }
 0x817   : > { %v2208_v20 = vadd.f32 %v3750_v13, %v2203_v15 }
 0x818   : > { %v2193_v11 = vmul.f32 %v3799_v63, %v2192_v8 }
 0x819   : > { %v2341_v33 = vpop.permute.xlu1 %2340 }
 0x81a   : > { %v2197_v12 = vsel %vm2196_vm10, %v3799_v63, %v2193_v11  ;;  %2353 = vmatpush.bf16.msrb.mxu0 %v2341_v33 }
 0x81b   : > { %v2199_v16 = vmul.f32 %v2197_v12, %v2165_v37  ;;  %v2301_v37 = vpack.c.bf16 %v2291_v30, %v2291_v30  ;;  %v2484_v44 = vpop.permute.xlu2 %2483 }
 0x81c   : > { %v2489_v45 = vsel %vm1622_vm15, %v2484_v44, 0 }
 0x81d   : > { %v2204_v17 = vmul.f32 %v3749_v9, %v2199_v16  ;;  %v2542_v42 = vunpack.c.l.b16 %v2301_v37  ;;  %2498 = vmatpush.bf16.xpose.msrb.mxu3 %v2489_v45 }
 0x81f   : > { %v2209_v22 = vadd.f32 %v3750_v13, %v2204_v17  ;;  %v5071_v48 = vpack.c.b16 %v2543_v43, %v2542_v42 }
 0x821   : > { %v2214_v24 = vpack.c.bf16 %v2209_v22, %v2208_v20  ;;  %v2549_v13 = vsel %vm1622_vm15, %v5071_v48, 0 }
 0x823   : > { %3526 = vmatmul.msk.bf16.vlgmr.msra.gmra.mxu1 %vm1511_vm7, %v2214_v24 }
 0x8a0   : > { %v2243_v19 = vpop.f32.mrf.mxu1 }
 0x8a1   : > { %v2244_v28 = vadd.f32 %v3752_v26, %v2243_v19 }
 0x8a3   : > { %v2295_v21 = vmul.f32 0.35355338, %v2244_v28 }
 0x8a5   : > { %v2297_v35 = vpack.c.bf16 %v2295_v21, %v2295_v21 }
 0x8a7   : > { %v2361_v36 = vunpack.c.l.b16 %v2297_v35  ;;  %3537 = vmatmul.msk.bf16.vlgmr.msrb.gmra.mxu2 %vm1622_vm15, %v2297_v35 }
 0x8a8   : > { %v2245_v39 = vpop.f32.mrf.mxu1 }
 0x8a9   : > { %v2246_v40 = vadd.f32 %v3752_v26, %v2245_v39  ;;  %v2362_v41 = vpack.c.b16 %v2361_v36, %v2361_v36 }
 0x8ab   : > { %v2296_v14 = vmul.f32 0.35355338, %v2246_v40  ;;  %2422 = vrot.lane.b32.xlu1 %v2362_v41, %s4399_s13  ;;  %2481 = vrot.lane.b32.xlu2 %v2362_v41, %s4401_s7 }
 0x8ac   : > { %2363 = vrot.lane.b32.xlu0 %v2362_v41, %s4397_s15 }
 0x8ad   : > { %v2298_v46 = vpack.c.bf16 %v2296_v14, %v2296_v14 }
 0x8af   : > { %v2597_v47 = vunpack.c.l.b16 %v2298_v46 }
 0x8b1   : > { %v2598_v49 = vpack.c.b16 %v2597_v47, %v2597_v47 }
 0x8b3   : > { %2717 = vrot.lane.b32.xlu1 %v2598_v49, %s4401_s7  ;;  %2601 = vrot.lane.b32.xlu2 %v5071_v48, %s4397_s15 }
 0x8bb   : > { %2719 = vrot.lane.b32.xlu2 %v5071_v48, %s4401_s7 }
 0x8c3   : > { %2658 = vrot.lane.b32.xlu2 %v2598_v49, %s4399_s13 }
 0x905   : > { %v2482_v50 = vpop.permute.xlu2 %2481 }
 0x906   : > { %3543 = vmatmul.msk.bf16.vlgmr.msrb.gmra.mxu3 %vm1622_vm15, %v2482_v50 }
 0x90d   : > { %v2602_v51 = vpop.permute.xlu2 %2601 }
 0x90e   : > { %v2607_v52 = vsel %vm1622_vm15, %v2602_v51, 0 }
 0x90f   : > { %2616 = vmatpush.bf16.xpose.msra.mxu3 %v2607_v52 }
 0x915   : > { %v2720_v53 = vpop.permute.xlu2 %2719 }
 0x916   : > { %v2725_v54 = vsel %vm1622_vm15, %v2720_v53, 0 }
 0x917   : > { %2734 = vmatpush.bf16.xpose.msrb.mxu3 %v2725_v54 }
 0x91d   : > { %v2423_v16 = vpop.permute.xlu1 %2422  ;;  %v2659_v24 = vpop.permute.xlu2 %2658 }
 0x91e   : > { %v2364_v55 = vpop.permute.xlu0 %2363 }
 0x91f   : > { %3539 = vmatmul.msk.bf16.vlgmr.msrb.gmra.mxu1 %vm1622_vm15, %v2364_v55 }
 0x925   : > { %v2718_v22 = vpop.permute.xlu1 %2717 }
 0x92a   : > { %v2323_v56 = vpop.f32.mrf.mxu2 }
 0x92b   : > { %v2328_v57 = vsel %vm2327_vm11, %v2323_v56, -inf }
 0x92c   : > { %2329 = vmax.xlane.f32.xlu0 %v2328_v57 }
 0x932   : > { %v2325_v58 = vpop.f32.mrf.mxu2 }
 0x940   : > { %2424 = vrot.lane.b32.xlu0 %v5045_v4, %s4399_s13 }
 0x989   : > { %v2500_v59 = vpop.f32.mrf.mxu3 }
 0x98a   : > { %v2504_v8 = vsel %vm2327_vm11, %v2500_v59, -inf }
 0x991   : > { %v2502_v60 = vpop.f32.mrf.mxu3 }
 0x99c   : > { %v2382_v61 = vpop.f32.mrf.mxu1 }
 0x99d   : > { %v2386_v62 = vsel %vm2327_vm11, %v2382_v61, -inf }
 0x99e   : > { %2387 = vmax.xlane.f32.xlu1 %v2386_v62 }
 0x99f   : > { %v2330_v63 = vpop.xlane.xlu0 %2329 }
 0x9a0   : > { %v2331_v0 = vsub.f32 %v2323_v56, %v2330_v63 }
 0x9a2   : > { %v2332_v1 = vmul.f32 1.442695, %v2331_v0 }
 0x9a4   : > { %3800 = vpow2.f32 %v2332_v1  ;;  %v2384_v2 = vpop.f32.mrf.mxu1 }
 0x9aa   : > { %v3801_v3 = vpop.eup %3800 }
 0x9ab   : > { %v2334_v5 = vsel %vm2327_vm11, %v3801_v3, 0.0 }
 0x9ac   : > { %2335 = vadd.xlane.f32.xlu0 %v2334_v5 }
 0x9b2   : > { %v2425_v6 = vpop.permute.xlu0 %2424 }
 0x9b3   : > { %v2430_v7 = vsel %vm1622_vm15, %v2425_v6, 0 }
 0x9b4   : > { %2439 = vmatpush.bf16.xpose.msra.mxu0 %v2430_v7 }
 0x9c0   : > { %2599 = vrot.lane.b32.xlu0 %v2598_v49, %s4397_s15  ;;  %s5350_s15 = scalar_lea.vmem [#allocation23], %s4766_s30 }
 0x9c8   : > { %2660 = vrot.lane.b32.xlu0 %v5071_v48, %s4399_s13 }
 0x9f2   : > { %2505 = vmax.xlane.f32.xlu0 %v2504_v8 }
 0xa11   : > { %v2388_v26 = vpop.xlane.xlu1 %2387 }
 0xa12   : > { %v2389_v19 = vsub.f32 %v2382_v61, %v2388_v26 }
 0xa14   : > { %v2390_v28 = vmul.f32 1.442695, %v2389_v19 }
 0xa1f   : > { %v2336_v9 = vpop.xlane.xlu0 %2335 }
 0xa20   : > { %3802 = vrcp.f32 %v2336_v9 }
 0xa21   : > { %3804 = vpow2.f32 %v2390_v28 }
 0xa26   : > { %v3803_v10 = vpop.eup %3802 }
 0xa27   : > { %v2338_v11 = vmul.f32 %v3803_v10, %v3801_v3  ;;  %v3805_v35 = vpop.eup %3804 }
 0xa28   : > { %v2392_v37 = vsel %vm2327_vm11, %v3805_v35, 0.0 }
 0xa29   : > { %v2339_v12 = vpack.c.bf16 %v2338_v11, %v2338_v11 }
 0xa2b   : > { %3538 = vmatmul.msk.bf16.vlgmr.msrb.gmra.mxu0 %vm2327_vm11, %v2339_v12 }
 0xa2c   : > { %2558 = vmatpush.bf16.xpose.msrb.mxu0 %v2549_v13 }
 0xa32   : > { %v2600_v15 = vpop.permute.xlu0 %2599 }
 0xa33   : > { %3547 = vmatmul.msk.bf16.vlgmr.msra.gmra.mxu3 %vm1622_vm15, %v2600_v15 }
 0xa3a   : > { %v2661_v17 = vpop.permute.xlu0 %2660 }
 0xa3b   : > { %v2666_v20 = vsel %vm1622_vm15, %v2661_v17, 0  ;;  %3541 = vmatmul.msk.bf16.vlgmr.msra.gmra.mxu0 %vm1622_vm15, %v2423_v16 }
 0xa3c   : > { %2675 = vmatpush.bf16.xpose.msra.mxu0 %v2666_v20 }
 0xa43   : > { %3551 = vmatmul.msk.bf16.vlgmr.msrb.gmra.mxu3 %vm1622_vm15, %v2718_v22 }
 0xa4b   : > { %3545 = vmatmul.msk.bf16.vlgmr.msrb.gmra.mxu0 %vm1622_vm15, %v2298_v46 }
 0xa5b   : > { %3549 = vmatmul.msk.bf16.vlgmr.msra.gmra.mxu0 %vm1622_vm15, %v2659_v24 }
 0xa65   : > { %v2506_v21 = vpop.xlane.xlu0 %2505 }
 0xa66   : > { %v2507_v30 = vsub.f32 %v2500_v59, %v2506_v21 }
 0xa68   : > { %v2508_v34 = vmul.f32 1.442695, %v2507_v30 }
 0xa6a   : > { %3806 = vpow2.f32 %v2508_v34 }
 0xa70   : > { %v5105_v39 = vpop.eup %3806 }
 0xa71   : > { %v2510_v41 = vsel %vm2327_vm11, %v5105_v39, 0.0 }
 0xaa8   : > { %v2355_v25 = vpop.f32.mrf.mxu0 }
 0xaa9   : > { %2359 = vst.msk [vmem:[#allocation3] sm:$0xff] %vm1622_vm15, %v2355_v25 }
 0xab0   : > { %v2357_v27 = vpop.f32.mrf.mxu0 }
 0xab6   : > { %v2618_v31 = vpop.f32.mrf.mxu3 }
 0xab7   : > { %v2622_v32 = vsel %vm2327_vm11, %v2618_v31, -inf }
 0xab8   : > { %v2441_v33 = vpop.f32.mrf.mxu0  ;;  %2623 = vmax.xlane.f32.xlu1 %v2622_v32 }
 0xab9   : > { %v2445_v45 = vsel %vm2327_vm11, %v2441_v33, -inf }
 0xabe   : > { %v2620_v36 = vpop.f32.mrf.mxu3 }
 0xac0   : > { %v2443_v38 = vpop.f32.mrf.mxu0  ;;  %2393 = vadd.xlane.f32.xlu1 %v2392_v37 }
 0xac6   : > { %v2736_v40 = vpop.f32.mrf.mxu3 }
 0xac7   : > { %v2740_v42 = vsel %vm2327_vm11, %v2736_v40, -inf }
 0xac8   : > { %v2560_v14 = vpop.f32.mrf.mxu0  ;;  %2511 = vadd.xlane.f32.xlu1 %v2510_v41  ;;  %2741 = vmax.xlane.f32.xlu2 %v2740_v42 }
 0xac9   : > { %v2564_v43 = vsel %vm2327_vm11, %v2560_v14, -inf }
 0xaca   : > { %2565 = vmax.xlane.f32.xlu0 %v2564_v43 }
 0xace   : > { %v2738_v44 = vpop.f32.mrf.mxu3 }
 0xad0   : > { %v2562_v46 = vpop.f32.mrf.mxu0  ;;  %2446 = vmax.xlane.f32.xlu2 %v2445_v45 }
 0xad8   : > { %v2677_v47 = vpop.f32.mrf.mxu0 }
 0xad9   : > { %v2681_v49 = vsel %vm2327_vm11, %v2677_v47, -inf }
 0xada   : > { %2682 = vmax.xlane.f32.xlu0 %v2681_v49 }
 0xae0   : > { %v2679_v50 = vpop.f32.mrf.mxu0 }
 0xae1   : > { %2516 = vrot.lane.b32.xlu1 %v5045_v4, %s4395_s1 }
 0xae8   : > { %2398 = vrot.lane.b32.xlu2 %v5045_v4, %s4398_s10 }
 0xae9   : > { %2634 = vrot.lane.b32.xlu1 %v5071_v48, %s4398_s10 }
 0xaee   : > { %2457 = vrot.lane.b32.xlu0 %v5045_v4, %s4400_s2 }
 0xaf1   : > { %2576 = vrot.lane.b32.xlu1 %v5071_v48, %s4396_s12  ;;  %s5349_s12 = scalar_lea.vmem [#allocation22], %s4766_s30 }
 0xb2b   : > { %v2624_v51 = vpop.xlane.xlu1 %2623 }
 0xb2c   : > { %v2625_v52 = vsub.f32 %v2618_v31, %v2624_v51 }
 0xb2e   : > { %v2626_v53 = vmul.f32 1.442695, %v2625_v52 }
 0xb30   : > { %3808 = vpow2.f32 %v2626_v53 }
 0xb33   : > { %v2394_v57 = vpop.xlane.xlu1 %2393 }
 0xb34   : > { %3810 = vrcp.f32 %v2394_v57 }
 0xb36   : > { %v3809_v54 = vpop.eup %3808 }
 0xb37   : > { %v2628_v55 = vsel %vm2327_vm11, %v3809_v54, 0.0 }
 0xb38   : > { %2629 = vadd.xlane.f32.xlu2 %v2628_v55 }
 0xb3a   : > { %v3811_v62 = vpop.eup %3810 }
 0xb3b   : > { %v2742_v56 = vpop.xlane.xlu2 %2741  ;;  %v2396_v3 = vmul.f32 %v3811_v62, %v3805_v35  ;;  %v2512_v6 = vpop.xlane.xlu1 %2511 }
 0xb3c   : > { %v2743_v58 = vsub.f32 %v2736_v40, %v2742_v56 }
 0xb3d   : > { %v2566_v60 = vpop.xlane.xlu0 %2565  ;;  %v2397_v8 = vpack.c.bf16 %v2396_v3, %v2396_v3  ;;  %v3609_v3 = vld [vmem:[%s1203_s18 + $0x8] sm:$0xff] }
 0xb3e   : > { %v2744_v59 = vmul.f32 1.442695, %v2743_v58  ;;  %v2567_v0 = vsub.f32 %v2560_v14, %v2566_v60  ;;  %2804 = vmatpush.bf16.msrb.mxu0 %v3609_v3 }
 0xb40   : > { %3812 = vpow2.f32 %v2744_v59  ;;  %v2568_v5 = vmul.f32 1.442695, %v2567_v0 }
 0xb43   : > { %v2447_v61 = vpop.xlane.xlu2 %2446 }
 0xb44   : > { %v2448_v4 = vsub.f32 %v2441_v33, %v2447_v61 }
 0xb46   : > { %v3813_v63 = vpop.eup %3812  ;;  %v2449_v1 = vmul.f32 1.442695, %v2448_v4 }
 0xb47   : > { %v2746_v2 = vsel %vm2327_vm11, %v3813_v63, 0.0 }
 0xb48   : > { %3814 = vpow2.f32 %v2449_v1  ;;  %2747 = vadd.xlane.f32.xlu1 %v2746_v2 }
 0xb49   : > { %3816 = vpow2.f32 %v2568_v5  ;;  %v3608_v5 = vld [vmem:[%s1203_s18] sm:$0xff]  ;;  %s5345_s18 = scalar_lea.vmem [#allocation21], %s4774_s4  ;;  %s5347_s4 = scalar_lea.vmem [#allocation11], %s4766_s30 }
 0xb4a   : > { %3818 = vrcp.f32 %v2512_v6  ;;  %2805 = vmatpush.bf16.msrb.mxu0 %v3608_v5  ;;  %s5346_s6 = smov %s5345_s18 }
 0xb4b   : > { %v2399_v7 = vpop.permute.xlu2 %2398 }
 0xb4c   : > { %2411 = vmatpush.bf16.msra.mxu2 %v2399_v7 }
 0xb4d   : > { %v2683_v9 = vpop.xlane.xlu0 %2682 }
 0xb4e   : > { %v3815_v10 = vpop.eup %3814  ;;  %v2684_v11 = vsub.f32 %v2677_v47, %v2683_v9 }
 0xb4f   : > { %3540 = vmatmul.msk.bf16.vlgmr.msra.gmra.mxu2 %vm2327_vm11, %v2397_v8  ;;  %v2451_v12 = vsel %vm2327_vm11, %v3815_v10, 0.0  ;;  %v3817_v16 = vpop.eup %3816 }
 0xb50   : > { %v2685_v13 = vmul.f32 1.442695, %v2684_v11  ;;  %2452 = vadd.xlane.f32.xlu0 %v2451_v12  ;;  %v3819_v17 = vpop.eup %3818  ;;  %v2570_v20 = vsel %vm2327_vm11, %v3817_v16, 0.0  ;;  %v3753_v11 = vld [vmem:[%s5344_s26] ss:$0 sm:$0xff] }
 0xb51   : > { %v2514_v24 = vmul.f32 %v3819_v17, %v5105_v39 }
 0xb52   : > { %3820 = vpow2.f32 %v2685_v13 }
 0xb53   : > { %v2517_v15 = vpop.permute.xlu1 %2516  ;;  %v2515_v19 = vpack.c.bf16 %v2514_v24, %v2514_v24 }
 0xb54   : > { %2529 = vmatpush.bf16.msrb.mxu2 %v2517_v15 }
 0xb58   : > { %v3821_v22 = vpop.eup %3820  ;;  %2571 = vadd.xlane.f32.xlu0 %v2570_v20 }
 0xb59   : > { %v2687_v25 = vsel %vm2327_vm11, %v3821_v22, 0.0 }
 0xb5a   : > { %2688 = vadd.xlane.f32.xlu2 %v2687_v25 }
 0xb5b   : > { %v2635_v26 = vpop.permute.xlu1 %2634 }
 0xb5c   : > { %2647 = vmatpush.bf16.msra.mxu2 %v2635_v26 }
 0xb5f   : > { %3544 = vmatmul.msk.bf16.vlgmr.msrb.gmra.mxu2 %vm2327_vm11, %v2515_v19 }
 0xb60   : > { %v2458_v27 = vpop.permute.xlu0 %2457 }
 0xb61   : > { %2470 = vmatpush.bf16.msra.mxu1 %v2458_v27 }
 0xb63   : > { %v2577_v28 = vpop.permute.xlu1 %2576 }
 0xb65   : > { %2589 = vmatpush.bf16.msrb.mxu1 %v2577_v28 }
 0xb6c   : > { %2693 = vrot.lane.b32.xlu0 %v5071_v48, %s4400_s2 }
 0xb72   : > { %2752 = vrot.lane.b32.xlu2 %v5071_v48, %s4395_s1  ;;  %s5348_s1 = scalar_lea.vmem [#allocation12], %s4766_s30 }
 0xbab   : > { %v2630_v21 = vpop.xlane.xlu2 %2629 }
 0xbac   : > { %3822 = vrcp.f32 %v2630_v21 }
 0xbb2   : > { %v3823_v30 = vpop.eup %3822 }
 0xbb3   : > { %v2632_v31 = vmul.f32 %v3823_v30, %v3809_v54 }
 0xbb5   : > { %v2633_v32 = vpack.c.bf16 %v2632_v31, %v2632_v31 }
 0xbb7   : > { %3548 = vmatmul.msk.bf16.vlgmr.msra.gmra.mxu2 %vm2327_vm11, %v2633_v32  ;;  %v3611_v32 = vld [vmem:[%s5345_s18 + $0x8] sm:$0xff] }
 0xbbb   : > { %v2748_v34 = vpop.xlane.xlu1 %2747 }
 0xbc3   : > { %v2453_v33 = vpop.xlane.xlu0 %2452 }
 0xbc4   : > { %3824 = vrcp.f32 %v2453_v33 }
 0xbc5   : > { %3826 = vrcp.f32 %v2748_v34 }
 0xbca   : > { %v3825_v35 = vpop.eup %3824 }
 0xbcb   : > { %v2455_v36 = vmul.f32 %v3825_v35, %v3815_v10  ;;  %v2572_v38 = vpop.xlane.xlu0 %2571  ;;  %v3827_v40 = vpop.eup %3826 }
 0xbcc   : > { %3828 = vrcp.f32 %v2572_v38  ;;  %v2750_v41 = vmul.f32 %v3827_v40, %v3813_v63 }
 0xbcd   : > { %v2456_v37 = vpack.c.bf16 %v2455_v36, %v2455_v36  ;;  %v2689_v39 = vpop.xlane.xlu2 %2688  ;;  %v3610_v36 = vld [vmem:[%s5346_s6] sm:$0xff] }
 0xbce   : > { %v2751_v43 = vpack.c.bf16 %v2750_v41, %v2750_v41  ;;  %3830 = vrcp.f32 %v2689_v39 }
 0xbcf   : > { %3542 = vmatmul.msk.bf16.vlgmr.msra.gmra.mxu1 %vm2327_vm11, %v2456_v37 }
 0xbd2   : > { %v2413_v48 = vpop.f32.mrf.mxu2  ;;  %v3829_v14 = vpop.eup %3828 }
 0xbd3   : > { %2418 = vrot.lane.b32.xlu0 %v2413_v48, %s4407_s28  ;;  %v2574_v44 = vmul.f32 %v3829_v14, %v3817_v16 }
 0xbd4   : > { %v3831_v50 = vpop.eup %3830 }
 0xbd5   : > { %v2753_v42 = vpop.permute.xlu2 %2752  ;;  %v2575_v46 = vpack.c.bf16 %v2574_v44, %v2574_v44  ;;  %v2691_v51 = vmul.f32 %v3831_v50, %v3821_v22 }
 0xbd6   : > { %2765 = vmatpush.bf16.msrb.mxu2 %v2753_v42 }
 0xbd7   : > { %v2692_v53 = vpack.c.bf16 %v2691_v51, %v2691_v51  ;;  %v3754_v51 = vld [vmem:[%s5347_s4] ss:$0 sm:$0xff] }
 0xbd9   : > { %3552 = vmatmul.msk.bf16.vlgmr.msrb.gmra.mxu2 %vm2327_vm11, %v2751_v43 }
 0xbda   : > { %v2415_v45 = vpop.f32.mrf.mxu2 }
 0xbde   : > { %v2694_v47 = vpop.permute.xlu0 %2693 }
 0xbdf   : > { %3546 = vmatmul.msk.bf16.vlgmr.msrb.gmra.mxu1 %vm2327_vm11, %v2575_v46 }
 0xbe0   : > { %2706 = vmatpush.bf16.msra.mxu1 %v2694_v47 }
 0xbe2   : > { %v2531_v49 = vpop.f32.mrf.mxu2 }
 0xbe4   : > { %2906 = vmatpush.bf16.msrb.mxu1 %v3611_v32 }
 0xbe8   : > { %2907 = vmatpush.bf16.msrb.mxu1 %v3610_v36 }
 0xbea   : > { %v2533_v52 = vpop.f32.mrf.mxu2 }
 0xbef   : > { %3550 = vmatmul.msk.bf16.vlgmr.msra.gmra.mxu1 %vm2327_vm11, %v2692_v53 }
 0xc3a   : > { %v2649_v54 = vpop.f32.mrf.mxu2 }
 0xc3b   : > { %2654 = vrot.lane.b32.xlu1 %v2649_v54, %s4407_s28 }
 0xc42   : > { %v2651_v55 = vpop.f32.mrf.mxu2 }
 0xc43   : > { %v3755_v55 = vld [vmem:[%s5348_s1] ss:$0 sm:$0xff] }
 0xc45   : > { %v2419_v56 = vpop.permute.xlu0 %2418 }
 0xc46   : > { %2421 = vst.msk [vmem:[#allocation3] sm:$0xff] %vm1740_vm1, %v2419_v56 }
 0xc4c   : > { %v2472_v57 = vpop.f32.mrf.mxu1 }
 0xc4d   : > { %2477 = vrot.lane.b32.xlu2 %v2472_v57, %s4406_s5 }
 0xc54   : > { %v2474_v58 = vpop.f32.mrf.mxu1 }
 0xc55   : > { %2536 = vrot.lane.b32.xlu2 %v2531_v49, %s4408_s27 }
 0xc5c   : > { %v2591_v59 = vpop.f32.mrf.mxu1  ;;  %v2767_v60 = vpop.f32.mrf.mxu2 }
 0xc5d   : > { %2595 = vst.msk [vmem:[#allocation3 + $0x8] sm:$0xff] %vm1622_vm15, %v2591_v59 }
 0xc64   : > { %v2593_v61 = vpop.f32.mrf.mxu1  ;;  %v2769_v4 = vpop.f32.mrf.mxu2 }
 0xc65   : > { %v3615_v4 = vld [vmem:[%s4807_s0 + $0x18] sm:$0xff] }
 0xc66   : > { %2957 = vmatpush.bf16.msra.mxu3 %v3615_v4 }
 0xc6c   : > { %v2708_v62 = vpop.f32.mrf.mxu1 }
 0xc6d   : > { %2713 = vrot.lane.b32.xlu0 %v2708_v62, %s4406_s5  ;;  %v3614_v62 = vld [vmem:[%s4807_s0 + $0x10] sm:$0xff] }
 0xc6e   : > { %2958 = vmatpush.bf16.msra.mxu3 %v3614_v62 }
 0xc74   : > { %v2710_v63 = vpop.f32.mrf.mxu1 }
 0xc75   : > { %2772 = vrot.lane.b32.xlu0 %v2767_v60, %s4408_s27  ;;  %v3613_v63 = vld [vmem:[%s4807_s0 + $0x8] sm:$0xff] }
 0xc76   : > { %2959 = vmatpush.bf16.msra.mxu3 %v3613_v63 }
 0xca7   : > { %v2478_v0 = vpop.permute.xlu2 %2477 }
 0xca8   : > { %2480 = vst.msk [vmem:[#allocation3] sm:$0xff] %vm1802_vm2, %v2478_v0  ;;  %v3612_v0 = vld [vmem:[%s4807_s0] sm:$0xff]  ;;  %s5351_s0 = sld [smem:[#allocation30_spill]] }
 0xca9   : > { %2960 = vmatpush.bf16.msra.mxu3 %v3612_v0 }
 0xcad   : > { %v2655_v1 = vpop.permute.xlu1 %2654 }
 0xcae   : > { %2657 = vst.msk [vmem:[#allocation3 + $0x8] sm:$0xff] %vm1740_vm1, %v2655_v1  ;;  %p3588_p2 = scmp.ne.s32.totalorder %s5351_s0, 1 }
 0xcaf   : > { %v2537_v2 = vpop.permute.xlu2 %2536  ;;  %s5352_s13 = sld [smem:[#allocation56_spill]] (!%p3588_p2) }
 0xcb0   : > { %2539 = vst.msk [vmem:[#allocation3] sm:$0xff] %vm1864_vm3, %v2537_v2  ;;  %v3756_v2 = vld [vmem:[%s5349_s12] ss:$0 sm:$0xff]  ;;  %s5353_s5 = sld [smem:[#allocation57_spill]] (!%p3588_p2) }
 0xcb7   : > { %v2776_v8 = vld [vmem:[#allocation3] sm:$0xff] }
 0xcdf   : > { %v2714_v6 = vpop.permute.xlu0 %2713 }
 0xce0   : > { %2716 = vst.msk [vmem:[#allocation3 + $0x8] sm:$0xff] %vm1802_vm2, %v2714_v6  ;;  %vm2949_vm2 = vcmask 523264  }
 0xce7   : > { %v2773_v7 = vpop.permute.xlu0 %2772 }
 0xce8   : > { %2775 = vst.msk [vmem:[#allocation3 + $0x8] sm:$0xff] %vm1864_vm3, %v2773_v7 }
 0xcef   : > { %v2777_v9 = vld [vmem:[#allocation3 + $0x8] sm:$0xff] }
 0xcf0   : > { %v2782_v10 = vpack.c.bf16 %v2777_v9, %v2776_v8 }
 0xcf2   : > { %3561 = vmatmul.msk.bf16.vlgmr.msrb.gmra.mxu0 %vm1511_vm7, %v2782_v10  ;;  %v3757_v10 = vld [vmem:[%s5350_s15] ss:$0 sm:$0xff] }
 0xd6f   : > { %v2807_v12 = vpop.f32.mrf.mxu0 }
 0xd70   : > { %v2812_v13 = vadd.f32 %v2807_v12, %v5004_v18 }
 0xd72   : > { %v5161_v15 = vadd.f32 %v3753_v11, %v2812_v13 }
 0xd74   : > { %v2822_v16 = vsel %vm1511_vm7, %v5161_v15, 0.0 }
 0xd75   : > { %2823 = vadd.xlane.f32.xlu2 %v2822_v16 }
 0xd77   : > { %v2809_v17 = vpop.f32.mrf.mxu0 }
 0xd78   : > { %v2813_v20 = vadd.f32 %v2809_v17, %v5009_v23 }
 0xd7a   : > { %v5166_v22 = vadd.f32 %v3753_v11, %v2813_v20 }
 0xd7c   : > { %v2825_v24 = vsel %vm1511_vm7, %v5166_v22, 0.0 }
 0xd7d   : > { %2826 = vadd.xlane.f32.xlu0 %v2825_v24 }
 0xde8   : > { %v2824_v25 = vpop.xlane.xlu2 %2823 }
 0xde9   : > { %v2828_v26 = vmul.f32 %v2824_v25, %v4837_v29 }
 0xdeb   : > { %v2830_v18 = vsub.f32 %v5161_v15, %v2828_v26 }
 0xded   : > { %v2832_v19 = vmul.f32 %v2830_v18, %v2830_v18 }
 0xdef   : > { %v2834_v27 = vsel %vm1511_vm7, %v2832_v19, 0.0 }
 0xdf0   : > { %2835 = vadd.xlane.f32.xlu1 %v2834_v27  ;;  %v2827_v28 = vpop.xlane.xlu0 %2826 }
 0xdf1   : > { %v2829_v23 = vmul.f32 %v2827_v28, %v4837_v29 }
 0xdf3   : > { %v2831_v21 = vsub.f32 %v5166_v22, %v2829_v23 }
 0xdf5   : > { %v2833_v30 = vmul.f32 %v2831_v21, %v2831_v21 }
 0xdf7   : > { %v2837_v31 = vsel %vm1511_vm7, %v2833_v30, 0.0 }
 0xdf8   : > { %2838 = vadd.xlane.f32.xlu2 %v2837_v31 }
 0xe63   : > { %v2836_v33 = vpop.xlane.xlu1 %2835 }
 0xe64   : > { %v2840_v34 = vmul.f32 %v2836_v33, %v4837_v29 }
 0xe66   : > { %v2842_v35 = vadd.f32 1e-05, %v2840_v34 }
 0xe68   : > { %3832 = vrsqrt.f32 %v2842_v35  ;;  %vm2850_vm13 = vweird.f32 %v2842_v35 }
 0xe6b   : > { %v2839_v37 = vpop.xlane.xlu2 %2838 }
 0xe6c   : > { %v2841_v38 = vmul.f32 %v2839_v37, %v4837_v29 }
 0xe6e   : > { %v3833_v39 = vpop.eup %3832  ;;  %v2843_v40 = vadd.f32 1e-05, %v2841_v38 }
 0xe6f   : > { %v2845_v48 = vmul.f32 %v3833_v39, %v2842_v35  ;;  %vm2851_vm12 = vweird.f32 %v3833_v39 }
 0xe70   : > { %3834 = vrsqrt.f32 %v2843_v40  ;;  %vm2852_vm14 = vmor %vm2850_vm13, %vm2851_vm12  ;;  %vm2860_vm0 = vweird.f32 %v2843_v40 }
 0xe71   : > { %v2846_v41 = vmul.f32 %v3833_v39, %v2845_v48 }
 0xe73   : > { %v2847_v42 = vmul.f32 0.5, %v2846_v41 }
 0xe75   : > { %v2848_v14 = vsub.f32 1.5, %v2847_v42 }
 0xe76   : > { %v3835_v43 = vpop.eup %3834 }
 0xe77   : > { %v2849_v44 = vmul.f32 %v3833_v39, %v2848_v14  ;;  %v2855_v45 = vmul.f32 %v3835_v43, %v2843_v40  ;;  %vm2861_vm15 = vweird.f32 %v3835_v43 }
 0xe78   : > { %vm2862_vm1 = vmor %vm2860_vm0, %vm2861_vm15 }
 0xe79   : > { %v2856_v46 = vmul.f32 %v3835_v43, %v2855_v45  ;;  %v2853_v47 = vsel %vm2852_vm14, %v3833_v39, %v2849_v44 }
 0xe7a   : > { %v2864_v52 = vmul.f32 %v2853_v47, %v2830_v18 }
 0xe7b   : > { %v2857_v49 = vmul.f32 0.5, %v2856_v46 }
 0xe7c   : > { %v2869_v56 = vmul.f32 %v3754_v51, %v2864_v52 }
 0xe7d   : > { %v2858_v50 = vsub.f32 1.5, %v2857_v49 }
 0xe7e   : > { %v2874_v59 = vadd.f32 %v3755_v55, %v2869_v56 }
 0xe7f   : > { %v2859_v53 = vmul.f32 %v3835_v43, %v2858_v50 }
 0xe81   : > { %v2863_v54 = vsel %vm2862_vm1, %v3835_v43, %v2859_v53 }
 0xe82   : > { %v2865_v57 = vmul.f32 %v2863_v54, %v2831_v21 }
 0xe84   : > { %v2870_v58 = vmul.f32 %v3754_v51, %v2865_v57 }
 0xe86   : > { %v2875_v60 = vadd.f32 %v3755_v55, %v2870_v58 }
 0xe88   : > { %v2880_v61 = vpack.c.bf16 %v2875_v60, %v2874_v59 }
 0xe8a   : > { %3570 = vmatmul.msk.bf16.vlgmr.msrb.gmra.mxu1 %vm1511_vm7, %v2880_v61 }
 0xf07   : > { %v2909_v1 = vpop.f32.mrf.mxu1 }
 0xf08   : > { %v2910_v3 = vadd.f32 %v3756_v2, %v2909_v1 }
 0xf0a   : > { %v2914_v7 = vmax.f32 %v2910_v3, 0.0 }
 0xf0f   : > { %v2911_v5 = vpop.f32.mrf.mxu1 }
 0xf10   : > { %v2912_v6 = vadd.f32 %v3756_v2, %v2911_v5 }
 0xf12   : > { %v2915_v8 = vmax.f32 %v2912_v6, 0.0 }
 0xf14   : > { %v2924_v9 = vpack.c.bf16 %v2915_v8, %v2914_v7 }
 0xf16   : > { %3587 = vmatmul.msk.bf16.vlgmr.msra.gmra.mxu3 %vm2949_vm2, %v2924_v9 }
 0xf99   : > { %v2962_v11 = vpop.f32.mrf.mxu3 }
 0xf9a   : > { %v2967_v12 = vadd.f32 %v2962_v11, %v5161_v15 }
 0xf9c   : > { %v2973_v13 = vadd.f32 %v3757_v10, %v2967_v12 }
 0xf9e   : > { %2975 = vst.msk [vmem:[#allocation2] sm:$0xff] %vm1511_vm7, %v2973_v13 }
 0xfa1   : > { %v2964_v16 = vpop.f32.mrf.mxu3 }
 0xfa2   : > { %v2968_v17 = vadd.f32 %v2964_v16, %v5166_v22  ;;  %2980 = sbr.rel (%p3588_p2) target bundleno = 4284 (0x10bc), region = 196 }
 0xfa4   : > { %v2974_v20 = vadd.f32 %v3757_v10, %v2968_v17 }
 0xfa6   : > { %2976 = vst.msk [vmem:[#allocation2 + $0x8] sm:$0xff] %vm1511_vm7, %v2974_v20 }
 0xfa7   : > { %v2983_v24 = vsel %vm1511_vm7, %v2973_v13, 0.0  ;;  %v2986_v25 = vsel %vm1511_vm7, %v2974_v20, 0.0  ;;  %v3836_v43 = vld [vmem:[%s5352_s13] ss:$0 sm:$0xff] }
 0xfa8   : > { %2984 = vadd.xlane.f32.xlu0 %v2983_v24  ;;  %v3837_v46 = vld [vmem:[%s5353_s5] ss:$0 sm:$0xff] }
 0xfb0   : > { %2987 = vadd.xlane.f32.xlu0 %v2986_v25 }
0x101b   : > { %v2985_v26 = vpop.xlane.xlu0 %2984 }
0x101c   : > { %v2989_v15 = vmul.f32 %v2985_v26, %v4837_v29 }
0x101e   : > { %v2991_v18 = vsub.f32 %v2973_v13, %v2989_v15 }
0x1020   : > { %v2993_v19 = vmul.f32 %v2991_v18, %v2991_v18 }
0x1022   : > { %v2995_v27 = vsel %vm1511_vm7, %v2993_v19, 0.0 }
0x1023   : > { %2996 = vadd.xlane.f32.xlu1 %v2995_v27  ;;  %v2988_v22 = vpop.xlane.xlu0 %2987 }
0x1024   : > { %v2990_v28 = vmul.f32 %v2988_v22, %v4837_v29 }
0x1026   : > { %v2992_v23 = vsub.f32 %v2974_v20, %v2990_v28 }
0x1028   : > { %v2994_v21 = vmul.f32 %v2992_v23, %v2992_v23 }
0x102a   : > { %v2998_v30 = vsel %vm1511_vm7, %v2994_v21, 0.0 }
0x102b   : > { %2999 = vadd.xlane.f32.xlu1 %v2998_v30 }
0x1096   : > { %v2997_v31 = vpop.xlane.xlu1 %2996 }
0x1097   : > { %v3001_v32 = vmul.f32 %v2997_v31, %v4837_v29 }
0x1099   : > { %v3003_v33 = vadd.f32 1e-05, %v3001_v32 }
0x109b   : > { %3838 = vrsqrt.f32 %v3003_v33  ;;  %vm3011_vm4 = vweird.f32 %v3003_v33 }
0x109e   : > { %v3000_v34 = vpop.xlane.xlu1 %2999 }
0x109f   : > { %v3002_v35 = vmul.f32 %v3000_v34, %v4837_v29 }
0x10a1   : > { %v3839_v36 = vpop.eup %3838  ;;  %v3004_v37 = vadd.f32 1e-05, %v3002_v35 }
0x10a2   : > { %v3006_v38 = vmul.f32 %v3839_v36, %v3003_v33  ;;  %vm3012_vm3 = vweird.f32 %v3839_v36 }
0x10a3   : > { %3840 = vrsqrt.f32 %v3004_v37  ;;  %vm3013_vm5 = vmor %vm3011_vm4, %vm3012_vm3  ;;  %vm3021_vm8 = vweird.f32 %v3004_v37 }
0x10a4   : > { %v3007_v39 = vmul.f32 %v3839_v36, %v3006_v38 }
0x10a6   : > { %v3008_v40 = vmul.f32 0.5, %v3007_v39 }
0x10a8   : > { %v3009_v48 = vsub.f32 1.5, %v3008_v40 }
0x10a9   : > { %v3841_v41 = vpop.eup %3840 }
0x10aa   : > { %v3010_v42 = vmul.f32 %v3839_v36, %v3009_v48  ;;  %v3016_v14 = vmul.f32 %v3841_v41, %v3004_v37  ;;  %vm3022_vm6 = vweird.f32 %v3841_v41 }
0x10ab   : > { %vm3023_vm9 = vmor %vm3021_vm8, %vm3022_vm6 }
0x10ac   : > { %v3014_v44 = vsel %vm3013_vm5, %v3839_v36, %v3010_v42  ;;  %v3017_v45 = vmul.f32 %v3841_v41, %v3016_v14 }
0x10ad   : > { %v3025_v29 = vmul.f32 %v3014_v44, %v2991_v18 }
0x10ae   : > { %v3018_v47 = vmul.f32 0.5, %v3017_v45 }
0x10af   : > { %v3030_v49 = vmul.f32 %v3836_v43, %v3025_v29 }
0x10b0   : > { %v3019_v50 = vsub.f32 1.5, %v3018_v47 }
0x10b1   : > { %v3035_v51 = vadd.f32 %v3837_v46, %v3030_v49 }
0x10b2   : > { %v3020_v52 = vmul.f32 %v3841_v41, %v3019_v50 }
0x10b3   : > { %3037 = vst.msk [vmem:[#allocation24] sm:$0xff] %vm1511_vm7, %v3035_v51 }
0x10b4   : > { %v3024_v53 = vsel %vm3023_vm9, %v3841_v41, %v3020_v52 }
0x10b5   : > { %v3026_v54 = vmul.f32 %v3024_v53, %v2992_v23 }
0x10b7   : > { %v3031_v55 = vmul.f32 %v3836_v43, %v3026_v54 }
0x10b9   : > { %v3036_v56 = vadd.f32 %v3837_v46, %v3031_v55 }
0x10bb   : > { %3038 = vst.msk [vmem:[#allocation24 + $0x8] sm:$0xff] %vm1511_vm7, %v3036_v56 }
0x10bc PF: > { %p3669_p3 = scmp.eq.s32.totalorder %s4575_s29, 1  ;;  %s5354_s16 = sld [smem:[#allocation58_spill]] }
0x10bd   : > { %s4409_s14 = smov [#allocation24]   ;;  %s4410_s19 = smov 128  }
0x10be   : > { %s3047_s22 = sshll.u32 %s4409_s14, 4  ;;  %s3048_s22 = int_to_ptr.vmem [resolvable:$true] %s3047_s22 }
0x10c2   : > { %s3049_s17 = sshll.u32 %s5354_s16, 4  ;;  %s3050_s17 = int_to_ptr.hbm [resolvable:$true] %s3049_s17 }
0x10c3   : > { %3655 = dma.vmem_to_hbm [thread:$0]  (%p3669_p3), %s3048_s22, 256, %s3050_s17, [#allocation7], %s4410_s19, %s4410_s19, %s4407_s28  }
0x10c4   : > { %4359 = dma.done.wait (%p3669_p3), [#allocation7], 256  }
0x10c5   : > { %4361 = vsyncadd (%p3669_p3), [#allocation7], 4294967040 }
0x10c6 PF: > { %s5355_s11 = sld [smem:[#allocation31_spill]]  ;;  %s5359_s27 = smov %s4368_s3 }
0x10c7   : > { %s5356_s26 = sld [smem:[#allocation29_spill]]  ;;  %s5361_s28 = smov %s4380_s8 }
0x10c8   : > { %s5357_s7 = sld [smem:[#allocation34_spill]] }
0x10c9   : > { %s5358_s29 = sld [smem:[#allocation32_spill]] }
0x10cc   : > { %s39_s4 = sadd.s32 1, %s5355_s11  }
0x10cd   : > { %p36_p4 = scmp.ge.s32.totalorder %s39_s4, 4   ;;  %s5360_s3 = smov %s5356_s26 }
0x10cf   : > { %s5362_s8 = smov %s5358_s29  ;;  %38 = sbr.rel (!%p36_p4) target bundleno = 30 (0x1e), region = 344 }
0x10d4   :  { %3066 = vsyncpa [#allocation6], 1 }
0x10d5   :  { %3068 = vsyncpa [#allocation6 + $0x1], 1 }
0x10d6   :  { %3069 = vsyncpa [#allocation9], 1 }
0x10d7   :  { %3070 = vsyncpa [#allocation7], 1 }
0x10d8   :  { %3072 = vsyncpa [#allocation7 + $0x1], 1 }

</bundles_post_ra>
